<compile_context>
chip_gen: v7x
topology: tpu7x:2x2x1
jax: 0.10.0
libtpu: 0.0.40
codegen_flags: <defaults>
</compile_context>

<pallas_src>
import jax
import jax.numpy as jnp
from jax import lax
from jax.experimental import pallas as pl
from jax.experimental.pallas import tpu as pltpu


_VMEM_LIMIT = 48 * 1024 * 1024        # < 64 MiB physical VMEM on v7x
_S_TILE_CAP = 512                     # rows of output positions per block


# ----------------------------------------------------------------------------
# Pallas kernels
# ----------------------------------------------------------------------------

def gemm_stats_kernel(x_ref, w_ref, b_ref, y_ref, sum_ref, ssq_ref):
    """GEMM + bias for one (batch, S-tile); accumulate per-channel sum/sumsq.

    x: (1, St, K) bf16 patches, w: (K, C) bf16, b: (1, C) f32.
    y: (1, St, C) f32, sum/ssq: (1, 1, C) f32 resident across the S axis.
    """
    @pl.when(pl.program_id(1) == 0)
    def _():
        sum_ref[...] = jnp.zeros_like(sum_ref)
        ssq_ref[...] = jnp.zeros_like(ssq_ref)

    y = jnp.dot(x_ref[0], w_ref[...],
                preferred_element_type=jnp.float32) + b_ref[...]
    y_ref[0] = y
    sum_ref[...] += jnp.sum(y, axis=0, keepdims=True)[None]
    ssq_ref[...] += jnp.sum(y * y, axis=0, keepdims=True)[None]


def norm_lrelu_kernel(y_ref, scale_ref, shift_ref, o_ref):
    """Apply precomputed per-channel GroupNorm affine + LeakyReLU(0.01)."""
    y = y_ref[0]                               # (St, C) f32
    yn = y * scale_ref[0] + shift_ref[0]       # (1, C) broadcast
    o_ref[0] = jnp.where(yn >= 0.0, yn, 0.01 * yn).astype(o_ref.dtype)


def gemm_bias_kernel(x_ref, w_ref, b_ref, o_ref):
    """Final Conv3d: GEMM + bias only (no norm / activation)."""
    o_ref[0] = jnp.dot(x_ref[0], w_ref[...],
                       preferred_element_type=jnp.float32) + b_ref[...]


def latent_kernel(f_ref, wmu_ref, bmu_ref, wvar_ref, bvar_ref, eps_ref,
                  wd_ref, bd_ref, mu_ref, lv_ref, z_ref, h_ref):
    """fc_mu, fc_var, reparameterize, decoder_input fused (bf16 GEMM, f32 acc)."""
    f = f_ref[...]
    mu = jnp.dot(f, wmu_ref[...], preferred_element_type=jnp.float32) + bmu_ref[...]
    lv = jnp.dot(f, wvar_ref[...], preferred_element_type=jnp.float32) + bvar_ref[...]
    z = eps_ref[...] * jnp.exp(0.5 * lv) + mu
    h = jnp.dot(z.astype(jnp.bfloat16), wd_ref[...],
                preferred_element_type=jnp.float32) + bd_ref[...]
    mu_ref[...] = mu
    lv_ref[...] = lv
    z_ref[...] = z
    h_ref[...] = h


# ----------------------------------------------------------------------------
# Pallas wrappers
# ----------------------------------------------------------------------------

def _pick_tile(s, cap=_S_TILE_CAP):
    """Largest S-tile <= cap that divides S (falls back to the full extent)."""
    t = min(s, cap)
    while t > 8 and (s % t):
        t //= 2
    return s if (s % t) else t


def gemm_stats(patches, w_mat, bias):
    B, S, K = patches.shape
    C = w_mat.shape[1]
    St = _pick_tile(S)
    return pl.pallas_call(
        gemm_stats_kernel,
        out_shape=(jax.ShapeDtypeStruct((B, S, C), jnp.float32),
                   jax.ShapeDtypeStruct((B, 1, C), jnp.float32),
                   jax.ShapeDtypeStruct((B, 1, C), jnp.float32)),
        grid=(B, S // St),
        in_specs=[pl.BlockSpec((1, St, K), lambda b, s: (b, s, 0)),
                  pl.BlockSpec((K, C), lambda b, s: (0, 0)),
                  pl.BlockSpec((1, C), lambda b, s: (0, 0))],
        out_specs=(pl.BlockSpec((1, St, C), lambda b, s: (b, s, 0)),
                   pl.BlockSpec((1, 1, C), lambda b, s: (b, 0, 0)),
                   pl.BlockSpec((1, 1, C), lambda b, s: (b, 0, 0))),
        compiler_params=pltpu.CompilerParams(
            dimension_semantics=("parallel", "arbitrary"),
            vmem_limit_bytes=_VMEM_LIMIT),
    )(patches, w_mat, bias)


def normalize_lrelu(y, scale, shift, out_dtype=jnp.bfloat16):
    B, S, C = y.shape
    St = _pick_tile(S)
    return pl.pallas_call(
        norm_lrelu_kernel,
        out_shape=jax.ShapeDtypeStruct((B, S, C), out_dtype),
        grid=(B, S // St),
        in_specs=[pl.BlockSpec((1, St, C), lambda b, s: (b, s, 0)),
                  pl.BlockSpec((1, 1, C), lambda b, s: (b, 0, 0)),
                  pl.BlockSpec((1, 1, C), lambda b, s: (b, 0, 0))],
        out_specs=pl.BlockSpec((1, St, C), lambda b, s: (b, s, 0)),
        compiler_params=pltpu.CompilerParams(
            dimension_semantics=("parallel", "parallel"),
            vmem_limit_bytes=_VMEM_LIMIT),
    )(y, scale, shift)


def gemm_bias(patches, w_mat, bias):
    B, S, K = patches.shape
    C = w_mat.shape[1]
    St = _pick_tile(S)
    return pl.pallas_call(
        gemm_bias_kernel,
        out_shape=jax.ShapeDtypeStruct((B, S, C), jnp.float32),
        grid=(B, S // St),
        in_specs=[pl.BlockSpec((1, St, K), lambda b, s: (b, s, 0)),
                  pl.BlockSpec((K, C), lambda b, s: (0, 0)),
                  pl.BlockSpec((1, C), lambda b, s: (0, 0))],
        out_specs=pl.BlockSpec((1, St, C), lambda b, s: (b, s, 0)),
        compiler_params=pltpu.CompilerParams(
            dimension_semantics=("parallel", "parallel"),
            vmem_limit_bytes=_VMEM_LIMIT),
    )(patches, w_mat, bias)


def latent_step(feat, fc_mu, fc_var, dec_in, eps):
    B = feat.shape[0]
    L = fc_mu["w"].shape[1]
    F2 = dec_in["w"].shape[1]
    return pl.pallas_call(
        latent_kernel,
        out_shape=(jax.ShapeDtypeStruct((B, L), jnp.float32),   # mu
                   jax.ShapeDtypeStruct((B, L), jnp.float32),   # log_var
                   jax.ShapeDtypeStruct((B, L), jnp.float32),   # z
                   jax.ShapeDtypeStruct((B, F2), jnp.float32)),  # decoder_input(z)
    )(feat, fc_mu["w"], fc_mu["b"], fc_var["w"], fc_var["b"], eps,
      dec_in["w"], dec_in["b"])


# ----------------------------------------------------------------------------
# Plain-JAX glue: im2col (channels-last), GroupNorm affine, phase-decomposed
# transposed conv, parameter setup.
# ----------------------------------------------------------------------------

def im2col_3d_cl(x, ksize, stride, pad):
    """x: [B, D, H, W, C] -> patches [B, S, k^3*C]; K-order (kd, kh, kw, c)."""
    B, D, H, W, C = x.shape
    Do = (D + 2 * pad - ksize) // stride + 1
    Ho = (H + 2 * pad - ksize) // stride + 1
    Wo = (W + 2 * pad - ksize) // stride + 1
    xp = jnp.pad(x, ((0, 0), (pad, pad), (pad, pad), (pad, pad), (0, 0)))
    cols = []
    for kd in range(ksize):
        for kh in range(ksize):
            for kw in range(ksize):
                cols.append(xp[:,
                               kd:kd + stride * (Do - 1) + 1:stride,
                               kh:kh + stride * (Ho - 1) + 1:stride,
                               kw:kw + stride * (Wo - 1) + 1:stride, :])
    col = jnp.stack(cols, axis=4)                    # [B, Do, Ho, Wo, k^3, C]
    return col.reshape(B, Do * Ho * Wo, ksize ** 3 * C), (Do, Ho, Wo)


def gn_affine(csum, csq, count, gamma, beta, eps=1e-5):
    """Per-channel sum/sumsq (B,1,C) -> GroupNorm(C//2) scale/shift (B,1,C)."""
    B = csum.shape[0]
    C = csum.shape[-1]
    s = csum.reshape(B, C // 2, 2).sum(-1)
    sq = csq.reshape(B, C // 2, 2).sum(-1)
    n = 2.0 * float(count)                            # elements per group
    mean_g = s / n
    var_g = jnp.maximum(sq / n - mean_g * mean_g, 0.0)
    inv_g = lax.rsqrt(var_g + eps)
    mean = jnp.repeat(mean_g, 2, axis=1)              # channel c -> group c//2
    inv = jnp.repeat(inv_g, 2, axis=1)
    scale = gamma * inv
    shift = beta - mean * scale
    return scale[:, None, :], shift[:, None, :]


# --- phase-decomposed ConvTranspose3d(k=3, s=2, p=1, output_padding=1) ------
# out[2m + p] per dim:  p=0 -> w[1]*in[m];  p=1 -> w[2]*in[m] + w[0]*in[m+1]
_TAPS = {0: [(1, 0)], 1: [(2, 0), (0, 1)]}
_PHASES = [(pd, ph, pw) for pd in (0, 1) for ph in (0, 1) for pw in (0, 1)]


def _phase_taps(phase):
    taps = []
    for kd, dd in _TAPS[phase[0]]:
        for kh, dh in _TAPS[phase[1]]:
            for kw, dw in _TAPS[phase[2]]:
                taps.append(((kd, kh, kw), (dd, dh, dw)))
    return taps


def _phase_weight_mats(wt):
    """wt: ConvTranspose3d weight [Cin, Cout, 3, 3, 3] -> 8 GEMM matrices."""
    mats = []
    for phase in _PHASES:
        blocks = [wt[:, :, kd, kh, kw] for (kd, kh, kw), _ in _phase_taps(phase)]
        mats.append(jnp.concatenate(blocks, axis=0).astype(jnp.bfloat16))
    return mats


def _shift_up(x, axis):
    """out[..., m, ...] = x[..., m+1, ...]; zero at the trailing boundary."""
    n = x.shape[axis]
    sl = lax.slice_in_dim(x, 1, n, axis=axis)
    pad_cfg = [(0, 0)] * x.ndim
    pad_cfg[axis] = (0, 1)
    return jnp.pad(sl, pad_cfg)


def conv_gn_lrelu_layer(h, layer):
    """Encoder block: Conv3d(k=3, s=2, p=1) + GroupNorm(C//2) + LeakyReLU."""
    B = h.shape[0]
    patches, (Do, Ho, Wo) = im2col_3d_cl(h, 3, 2, 1)
    C = layer["w_mat"].shape[1]
    y, s1, s2 = gemm_stats(patches, layer["w_mat"], layer["b"])
    scale, shift = gn_affine(s1, s2, Do * Ho * Wo, layer["gamma"], layer["beta"])
    out = normalize_lrelu(y, scale, shift)
    return out.reshape(B, Do, Ho, Wo, C)


def convt_gn_lrelu_layer(h, layer):
    """Decoder block: phase-decomposed ConvTranspose3d + GroupNorm + LeakyReLU."""
    B, D, H, W, Cin = h.shape
    C = layer["b"].shape[-1]
    ys, s1s, s2s = [], [], []
    for pi, phase in enumerate(_PHASES):
        parts = []
        for _, (dd, dh, dw) in _phase_taps(phase):
            xs = h
            if dd:
                xs = _shift_up(xs, 1)
            if dh:
                xs = _shift_up(xs, 2)
            if dw:
                xs = _shift_up(xs, 3)
            parts.append(xs)
        patches = jnp.concatenate(parts, axis=-1).reshape(B, D * H * W, -1)
        y, s1, s2 = gemm_stats(patches, layer["w_phase"][pi], layer["b"])
        ys.append(y)
        s1s.append(s1)
        s2s.append(s2)
    # pool GroupNorm statistics over all 8 output phases
    csum = sum(s1s)
    csq = sum(s2s)
    scale, shift = gn_affine(csum, csq, 8 * D * H * W,
                             layer["gamma"], layer["beta"])
    outs = [normalize_lrelu(y, scale, shift).reshape(B, D, H, W, C) for y in ys]
    # interleave phases: out[b, 2d+pd, 2h+ph, 2w+pw, c]
    zw = [[jnp.stack([outs[pd * 4 + ph * 2 + 0], outs[pd * 4 + ph * 2 + 1]],
                     axis=4) for ph in (0, 1)] for pd in (0, 1)]
    zh = [jnp.stack([zw[pd][0], zw[pd][1]], axis=3) for pd in (0, 1)]
    zd = jnp.stack([zh[0], zh[1]], axis=2)            # [B, D, 2, H, 2, W, 2, C]
    return zd.reshape(B, 2 * D, 2 * H, 2 * W, C)


def make_params(key, in_channels, hidden_dims, latent_dim):
    ks = iter(jax.random.split(key, 128))

    def nrm(shape, scale=0.1):
        return (scale * jax.random.normal(next(ks), shape)).astype(jnp.float32)

    p = {}

    # --- encoder: Conv3d(k=3, s=2, p=1) + GN(h//2, h) + LeakyReLU ---
    enc, cin = [], in_channels
    for hdim in hidden_dims:
        w = nrm((hdim, cin, 3, 3, 3))                 # PyTorch [Cout, Cin, k, k, k]
        w_mat = jnp.transpose(w, (2, 3, 4, 1, 0)).reshape(27 * cin, hdim)
        enc.append(dict(w_mat=w_mat.astype(jnp.bfloat16),
                        b=nrm((1, hdim), 0.05),
                        gamma=1.0 + nrm((1, hdim), 0.05),
                        beta=nrm((1, hdim), 0.05)))
        cin = hdim
    p["encoder"] = enc

    feat = hidden_dims[-1] * 8
    p["fc_mu"] = dict(w=nrm((feat, latent_dim)).astype(jnp.bfloat16),
                      b=nrm((1, latent_dim), 0.05))
    p["fc_var"] = dict(w=nrm((feat, latent_dim)).astype(jnp.bfloat16),
                       b=nrm((1, latent_dim), 0.05))
    p["dec_in"] = dict(w=nrm((latent_dim, feat)).astype(jnp.bfloat16),
                       b=nrm((1, feat), 0.05))

    # --- decoder: ConvTranspose3d(k=3, s=2, p=1, op=1) + GN + LeakyReLU ---
    rev = list(reversed(hidden_dims))
    dec = []
    for i in range(len(rev) - 1):
        wt = nrm((rev[i], rev[i + 1], 3, 3, 3))       # PyTorch [Cin, Cout, k, k, k]
        dec.append(dict(w_phase=_phase_weight_mats(wt),
                        b=nrm((1, rev[i + 1]), 0.05),
                        gamma=1.0 + nrm((1, rev[i + 1]), 0.05),
                        beta=nrm((1, rev[i + 1]), 0.05)))
    p["decoder"] = dec

    # --- final layer: ConvTranspose3d + GN + LeakyReLU, then Conv3d(k=3, p=1) ---
    hl = rev[-1]
    wt = nrm((hl, hl, 3, 3, 3))
    p["final_convt"] = dict(w_phase=_phase_weight_mats(wt), b=nrm((1, hl), 0.05),
                            gamma=1.0 + nrm((1, hl), 0.05), beta=nrm((1, hl), 0.05))
    wf = nrm((in_channels, hl, 3, 3, 3))
    p["final_conv"] = dict(
        w_mat=jnp.transpose(wf, (2, 3, 4, 1, 0)).reshape(27 * hl, in_channels)
              .astype(jnp.bfloat16),
        b=nrm((1, in_channels), 0.05))
    return p


# ----------------------------------------------------------------------------
# Forward pass: returns [recon, input, z, mu, log_var] like the PyTorch module
# ----------------------------------------------------------------------------

def infovae_forward(params, x, eps):
    B = x.shape[0]
    h = jnp.transpose(x, (0, 2, 3, 4, 1)).astype(jnp.bfloat16)   # NCDHW -> NDHWC

    # encoder
    for layer in params["encoder"]:
        h = conv_gn_lrelu_layer(h, layer)

    # flatten in PyTorch NCDHW order (torch.flatten(start_dim=1))
    feat = jnp.transpose(h, (0, 4, 1, 2, 3)).reshape(B, -1)
    mu, log_var, z, dec_h = latent_step(feat, params["fc_mu"], params["fc_var"],
                                        params["dec_in"], eps)

    # decoder input view: [B, hidden_dims[-1], 2, 2, 2] -> channels-last
    Cl = params["dec_in"]["w"].shape[1] // 8
    h = jnp.transpose(dec_h.reshape(B, Cl, 2, 2, 2),
                      (0, 2, 3, 4, 1)).astype(jnp.bfloat16)

    # decoder blocks + final ConvTranspose block
    for layer in params["decoder"]:
        h = convt_gn_lrelu_layer(h, layer)
    h = convt_gn_lrelu_layer(h, params["final_convt"])

    # final plain Conv3d (k=3, s=1, p=1), no norm / activation
    fc = params["final_conv"]
    patches, (Do, Ho, Wo) = im2col_3d_cl(h, 3, 1, 1)
    out = gemm_bias(patches, fc["w_mat"], fc["b"])
    C = fc["w_mat"].shape[1]
    recon = jnp.transpose(out.reshape(B, Do, Ho, Wo, C), (0, 4, 1, 2, 3))

    return [recon, x, z, mu, log_var]


if __name__ == "__main__":
    key = jax.random.PRNGKey(0)
    kp, kx, ke = jax.random.split(key, 3)

    in_channels, latent_dim = 4, 8
    hidden_dims = [8, 16]                 # small stand-in for [32,32,64,64,128,256]
    # encoder has len(hidden_dims) stride-2 convs and must end at 2x2x2 spatial
    spatial = 2 * 2 ** len(hidden_dims)   # = 8

    params = make_params(kp, in_channels, hidden_dims, latent_dim)
    x = jax.random.normal(kx, (2, in_channels, spatial, spatial, spatial),
                          dtype=jnp.float32)
    # TODO(synk): torch.randn_like RNG inside reparameterize has no in-kernel
    # equivalent tied to torch's generator; eps is supplied as an explicit input.
    eps = jax.random.normal(ke, (2, latent_dim), dtype=jnp.float32)

    fwd = jax.jit(infovae_forward)
    recon, inp, z, mu, log_var = fwd(params, x, eps)
    jax.block_until_ready((recon, z, mu, log_var))

    assert recon.shape == x.shape
    assert mu.shape == (2, latent_dim) and log_var.shape == (2, latent_dim)
    assert z.shape == (2, latent_dim)
    assert bool(jnp.all(jnp.isfinite(recon)))
    assert bool(jnp.all(jnp.isfinite(z)))
    print("KERNEL_OK")
</pallas_src>

<mosaic_0001>
module attributes {stable_mosaic.version = 11 : i64} {
  func.func @gemm_stats_kernel(%arg0: i32, %arg1: i32, %arg2: memref<1x64x108xbf16, #tpu.memory_space<vmem>>, %arg3: memref<108x8xbf16, #tpu.memory_space<vmem>>, %arg4: memref<1x8xf32, #tpu.memory_space<vmem>>, %arg5: memref<1x64x8xf32, #tpu.memory_space<vmem>>, %arg6: memref<1x1x8xf32, #tpu.memory_space<vmem>>, %arg7: memref<1x1x8xf32, #tpu.memory_space<vmem>>) attributes {dimension_semantics = [#tpu.dimension_semantics<parallel>, #tpu.dimension_semantics<arbitrary>], iteration_bounds = array<i64: 2, 1>, scalar_prefetch = 0 : i64, scratch_operands = 0 : i64, tpu.core_type = #tpu.core_type<tc>, window_params = [{transform_indices = @transform_0, window_bounds = array<i64: 1, 64, 108>}, {pipeline_mode = #tpu.pipeline_mode<synchronous>, transform_indices = @transform_1, window_bounds = array<i64: 108, 8>}, {pipeline_mode = #tpu.pipeline_mode<synchronous>, transform_indices = @transform_2, window_bounds = array<i64: 1, 8>}, {transform_indices = @transform_3, window_bounds = array<i64: 1, 64, 8>}, {transform_indices = @transform_4, window_bounds = array<i64: 1, 1, 8>}, {transform_indices = @transform_5, window_bounds = array<i64: 1, 1, 8>}]} {
    %c0_i32 = arith.constant 0 : i32
    %0 = arith.cmpi eq, %arg1, %c0_i32 : i32
    %1 = arith.extui %0 : i1 to i32
    %c0_i32_0 = arith.constant 0 : i32
    %2 = arith.cmpi ne, %1, %c0_i32_0 : i32
    scf.if %2 {
      %cst_24 = arith.constant 0.000000e+00 : f32
      %26 = vector.broadcast %cst_24 : f32 to vector<1x1x8xf32>
      %c0_25 = arith.constant 0 : index
      %c0_26 = arith.constant 0 : index
      %c0_27 = arith.constant 0 : index
      %27 = vector.load %arg6[%c0_25, %c0_26, %c0_27] : memref<1x1x8xf32, #tpu.memory_space<vmem>>, vector<1x1x8xf32>
      tpu.vector_store %arg6[%c0_25, %c0_26, %c0_27], %26 {strides = array<i32>} : memref<1x1x8xf32, #tpu.memory_space<vmem>>, vector<1x1x8xf32>,
      %cst_28 = arith.constant 0.000000e+00 : f32
      %28 = vector.broadcast %cst_28 : f32 to vector<1x1x8xf32>
      %c0_29 = arith.constant 0 : index
      %c0_30 = arith.constant 0 : index
      %c0_31 = arith.constant 0 : index
      %29 = vector.load %arg7[%c0_29, %c0_30, %c0_31] : memref<1x1x8xf32, #tpu.memory_space<vmem>>, vector<1x1x8xf32>
      tpu.vector_store %arg7[%c0_29, %c0_30, %c0_31], %28 {strides = array<i32>} : memref<1x1x8xf32, #tpu.memory_space<vmem>>, vector<1x1x8xf32>,
    } else {
    }
    %c0 = arith.constant 0 : index
    %c0_1 = arith.constant 0 : index
    %c0_2 = arith.constant 0 : index
    %3 = vector.load %arg2[%c0, %c0_1, %c0_2] : memref<1x64x108xbf16, #tpu.memory_space<vmem>>, vector<1x64x108xbf16>
    %4 = vector.shape_cast %3 : vector<1x64x108xbf16> to vector<64x108xbf16>
    %c0_3 = arith.constant 0 : index
    %c0_4 = arith.constant 0 : index
    %5 = vector.load %arg3[%c0_3, %c0_4] : memref<108x8xbf16, #tpu.memory_space<vmem>>, vector<108x8xbf16>
    %cst = arith.constant dense<0.000000e+00> : vector<64x8xf32>
    %6 = tpu.matmul %4, %5, %cst {dimension_numbers = #tpu.dot_dimension_numbers<[1], [0], [0], [1], [0, 0, 1, 1], [], []>} : vector<64x108xbf16>, vector<108x8xbf16>, vector<64x8xf32> -> vector<64x8xf32>
    %c0_5 = arith.constant 0 : index
    %c0_6 = arith.constant 0 : index
    %7 = vector.load %arg4[%c0_5, %c0_6] : memref<1x8xf32, #tpu.memory_space<vmem>>, vector<1x8xf32>
    %8 = vector.broadcast %7 : vector<1x8xf32> to vector<64x8xf32>
    %9 = arith.addf %6, %8 : vector<64x8xf32>
    %c0_7 = arith.constant 0 : index
    %c0_8 = arith.constant 0 : index
    %c0_9 = arith.constant 0 : index
    %10 = vector.load %arg5[%c0_7, %c0_8, %c0_9] : memref<1x64x8xf32, #tpu.memory_space<vmem>>, vector<1x64x8xf32>
    %11 = vector.shape_cast %10 : vector<1x64x8xf32> to vector<64x8xf32>
    %12 = vector.shape_cast %9 : vector<64x8xf32> to vector<1x64x8xf32>
    tpu.vector_store %arg5[%c0_7, %c0_8, %c0_9], %12 {strides = array<i32>} : memref<1x64x8xf32, #tpu.memory_space<vmem>>, vector<1x64x8xf32>,
    %c0_10 = arith.constant 0 : index
    %c0_11 = arith.constant 0 : index
    %c0_12 = arith.constant 0 : index
    %13 = vector.load %arg6[%c0_10, %c0_11, %c0_12] : memref<1x1x8xf32, #tpu.memory_space<vmem>>, vector<1x1x8xf32>
    %cst_13 = arith.constant dense<0.000000e+00> : vector<8xf32>
    %14 = vector.multi_reduction <add>, %9, %cst_13 [0] : vector<64x8xf32> to vector<8xf32>
    %15 = vector.shape_cast %14 : vector<8xf32> to vector<1x8xf32>
    %16 = vector.shape_cast %15 : vector<1x8xf32> to vector<1x1x8xf32>
    %17 = arith.addf %13, %16 : vector<1x1x8xf32>
    %c0_14 = arith.constant 0 : index
    %c0_15 = arith.constant 0 : index
    %c0_16 = arith.constant 0 : index
    %18 = vector.load %arg6[%c0_14, %c0_15, %c0_16] : memref<1x1x8xf32, #tpu.memory_space<vmem>>, vector<1x1x8xf32>
    tpu.vector_store %arg6[%c0_14, %c0_15, %c0_16], %17 {strides = array<i32>} : memref<1x1x8xf32, #tpu.memory_space<vmem>>, vector<1x1x8xf32>,
    %c0_17 = arith.constant 0 : index
    %c0_18 = arith.constant 0 : index
    %c0_19 = arith.constant 0 : index
    %19 = vector.load %arg7[%c0_17, %c0_18, %c0_19] : memref<1x1x8xf32, #tpu.memory_space<vmem>>, vector<1x1x8xf32>
    %20 = arith.mulf %9, %9 : vector<64x8xf32>
    %cst_20 = arith.constant dense<0.000000e+00> : vector<8xf32>
    %21 = vector.multi_reduction <add>, %20, %cst_20 [0] : vector<64x8xf32> to vector<8xf32>
    %22 = vector.shape_cast %21 : vector<8xf32> to vector<1x8xf32>
    %23 = vector.shape_cast %22 : vector<1x8xf32> to vector<1x1x8xf32>
    %24 = arith.addf %19, %23 : vector<1x1x8xf32>
    %c0_21 = arith.constant 0 : index
    %c0_22 = arith.constant 0 : index
    %c0_23 = arith.constant 0 : index
    %25 = vector.load %arg7[%c0_21, %c0_22, %c0_23] : memref<1x1x8xf32, #tpu.memory_space<vmem>>, vector<1x1x8xf32>
    tpu.vector_store %arg7[%c0_21, %c0_22, %c0_23], %24 {strides = array<i32>} : memref<1x1x8xf32, #tpu.memory_space<vmem>>, vector<1x1x8xf32>,
    return
  }
  func.func @transform_0(%arg0: i32, %arg1: i32) -> (i32, i32, i32) {
    %c0_i32 = arith.constant 0 : i32
    %c0_i32_0 = arith.constant 0 : i32
    return %arg0, %arg1, %c0_i32 : i32, i32, i32
  }
  func.func @transform_1(%arg0: i32, %arg1: i32) -> (i32, i32) {
    %c0_i32 = arith.constant 0 : i32
    %c0_i32_0 = arith.constant 0 : i32
    %c0_i32_1 = arith.constant 0 : i32
    return %c0_i32, %c0_i32_0 : i32, i32
  }
  func.func @transform_2(%arg0: i32, %arg1: i32) -> (i32, i32) {
    %c0_i32 = arith.constant 0 : i32
    %c0_i32_0 = arith.constant 0 : i32
    %c0_i32_1 = arith.constant 0 : i32
    return %c0_i32, %c0_i32_0 : i32, i32
  }
  func.func @transform_3(%arg0: i32, %arg1: i32) -> (i32, i32, i32) {
    %c0_i32 = arith.constant 0 : i32
    %c0_i32_0 = arith.constant 0 : i32
    return %arg0, %arg1, %c0_i32 : i32, i32, i32
  }
  func.func @transform_4(%arg0: i32, %arg1: i32) -> (i32, i32, i32) {
    %c0_i32 = arith.constant 0 : i32
    %c0_i32_0 = arith.constant 0 : i32
    %c0_i32_1 = arith.constant 0 : i32
    return %arg0, %c0_i32, %c0_i32_0 : i32, i32, i32
  }
  func.func @transform_5(%arg0: i32, %arg1: i32) -> (i32, i32, i32) {
    %c0_i32 = arith.constant 0 : i32
    %c0_i32_0 = arith.constant 0 : i32
    %c0_i32_1 = arith.constant 0 : i32
    return %arg0, %c0_i32, %c0_i32_0 : i32, i32, i32
  }
}

module attributes {stable_mosaic.version = 11 : i64} {
  func.func @norm_lrelu_kernel(%arg0: i32, %arg1: i32, %arg2: memref<1x64x8xf32, #tpu.memory_space<vmem>>, %arg3: memref<1x1x8xf32, #tpu.memory_space<vmem>>, %arg4: memref<1x1x8xf32, #tpu.memory_space<vmem>>, %arg5: memref<1x64x8xbf16, #tpu.memory_space<vmem>>) attributes {dimension_semantics = [#tpu.dimension_semantics<parallel>, #tpu.dimension_semantics<parallel>], iteration_bounds = array<i64: 2, 1>, scalar_prefetch = 0 : i64, scratch_operands = 0 : i64, tpu.core_type = #tpu.core_type<tc>, window_params = [{transform_indices = @transform_0, window_bounds = array<i64: 1, 64, 8>}, {transform_indices = @transform_1, window_bounds = array<i64: 1, 1, 8>}, {transform_indices = @transform_2, window_bounds = array<i64: 1, 1, 8>}, {transform_indices = @transform_3, window_bounds = array<i64: 1, 64, 8>}]} {
    %c0 = arith.constant 0 : index
    %c0_0 = arith.constant 0 : index
    %c0_1 = arith.constant 0 : index
    %0 = vector.load %arg2[%c0, %c0_0, %c0_1] : memref<1x64x8xf32, #tpu.memory_space<vmem>>, vector<1x64x8xf32>
    %1 = vector.shape_cast %0 : vector<1x64x8xf32> to vector<64x8xf32>
    %c0_2 = arith.constant 0 : index
    %c0_3 = arith.constant 0 : index
    %c0_4 = arith.constant 0 : index
    %2 = vector.load %arg3[%c0_2, %c0_3, %c0_4] : memref<1x1x8xf32, #tpu.memory_space<vmem>>, vector<1x1x8xf32>
    %3 = vector.shape_cast %2 : vector<1x1x8xf32> to vector<1x8xf32>
    %4 = vector.broadcast %3 : vector<1x8xf32> to vector<64x8xf32>
    %5 = arith.mulf %1, %4 : vector<64x8xf32>
    %c0_5 = arith.constant 0 : index
    %c0_6 = arith.constant 0 : index
    %c0_7 = arith.constant 0 : index
    %6 = vector.load %arg4[%c0_5, %c0_6, %c0_7] : memref<1x1x8xf32, #tpu.memory_space<vmem>>, vector<1x1x8xf32>
    %7 = vector.shape_cast %6 : vector<1x1x8xf32> to vector<1x8xf32>
    %8 = vector.broadcast %7 : vector<1x8xf32> to vector<64x8xf32>
    %9 = arith.addf %5, %8 : vector<64x8xf32>
    %cst = arith.constant 0.000000e+00 : f32
    %10 = vector.broadcast %cst : f32 to vector<64x8xf32>
    %11 = arith.cmpf oge, %9, %10 : vector<64x8xf32>
    %cst_8 = arith.constant 0.00999999977 : f32
    %12 = vector.broadcast %cst_8 : f32 to vector<64x8xf32>
    %13 = arith.mulf %12, %9 : vector<64x8xf32>
    %14 = arith.select %11, %9, %13 : vector<64x8xi1>, vector<64x8xf32>
    %15 = arith.truncf %14 : vector<64x8xf32> to vector<64x8xbf16>
    %c0_9 = arith.constant 0 : index
    %c0_10 = arith.constant 0 : index
    %c0_11 = arith.constant 0 : index
    %16 = vector.load %arg5[%c0_9, %c0_10, %c0_11] : memref<1x64x8xbf16, #tpu.memory_space<vmem>>, vector<1x64x8xbf16>
    %17 = vector.shape_cast %16 : vector<1x64x8xbf16> to vector<64x8xbf16>
    %18 = vector.shape_cast %15 : vector<64x8xbf16> to vector<1x64x8xbf16>
    tpu.vector_store %arg5[%c0_9, %c0_10, %c0_11], %18 {strides = array<i32>} : memref<1x64x8xbf16, #tpu.memory_space<vmem>>, vector<1x64x8xbf16>,
    return
  }
  func.func @transform_0(%arg0: i32, %arg1: i32) -> (i32, i32, i32) {
    %c0_i32 = arith.constant 0 : i32
    %c0_i32_0 = arith.constant 0 : i32
    return %arg0, %arg1, %c0_i32 : i32, i32, i32
  }
  func.func @transform_1(%arg0: i32, %arg1: i32) -> (i32, i32, i32) {
    %c0_i32 = arith.constant 0 : i32
    %c0_i32_0 = arith.constant 0 : i32
    %c0_i32_1 = arith.constant 0 : i32
    return %arg0, %c0_i32, %c0_i32_0 : i32, i32, i32
  }
  func.func @transform_2(%arg0: i32, %arg1: i32) -> (i32, i32, i32) {
    %c0_i32 = arith.constant 0 : i32
    %c0_i32_0 = arith.constant 0 : i32
    %c0_i32_1 = arith.constant 0 : i32
    return %arg0, %c0_i32, %c0_i32_0 : i32, i32, i32
  }
  func.func @transform_3(%arg0: i32, %arg1: i32) -> (i32, i32, i32) {
    %c0_i32 = arith.constant 0 : i32
    %c0_i32_0 = arith.constant 0 : i32
    return %arg0, %arg1, %c0_i32 : i32, i32, i32
  }
}

module attributes {stable_mosaic.version = 11 : i64} {
  func.func @gemm_stats_kernel(%arg0: i32, %arg1: i32, %arg2: memref<1x8x216xbf16, #tpu.memory_space<vmem>>, %arg3: memref<216x16xbf16, #tpu.memory_space<vmem>>, %arg4: memref<1x16xf32, #tpu.memory_space<vmem>>, %arg5: memref<1x8x16xf32, #tpu.memory_space<vmem>>, %arg6: memref<1x1x16xf32, #tpu.memory_space<vmem>>, %arg7: memref<1x1x16xf32, #tpu.memory_space<vmem>>) attributes {dimension_semantics = [#tpu.dimension_semantics<parallel>, #tpu.dimension_semantics<arbitrary>], iteration_bounds = array<i64: 2, 1>, scalar_prefetch = 0 : i64, scratch_operands = 0 : i64, tpu.core_type = #tpu.core_type<tc>, window_params = [{transform_indices = @transform_0, window_bounds = array<i64: 1, 8, 216>}, {pipeline_mode = #tpu.pipeline_mode<synchronous>, transform_indices = @transform_1, window_bounds = array<i64: 216, 16>}, {pipeline_mode = #tpu.pipeline_mode<synchronous>, transform_indices = @transform_2, window_bounds = array<i64: 1, 16>}, {transform_indices = @transform_3, window_bounds = array<i64: 1, 8, 16>}, {transform_indices = @transform_4, window_bounds = array<i64: 1, 1, 16>}, {transform_indices = @transform_5, window_bounds = array<i64: 1, 1, 16>}]} {
    %c0_i32 = arith.constant 0 : i32
    %0 = arith.cmpi eq, %arg1, %c0_i32 : i32
    %1 = arith.extui %0 : i1 to i32
    %c0_i32_0 = arith.constant 0 : i32
    %2 = arith.cmpi ne, %1, %c0_i32_0 : i32
    scf.if %2 {
      %cst_24 = arith.constant 0.000000e+00 : f32
      %26 = vector.broadcast %cst_24 : f32 to vector<1x1x16xf32>
      %c0_25 = arith.constant 0 : index
      %c0_26 = arith.constant 0 : index
      %c0_27 = arith.constant 0 : index
      %27 = vector.load %arg6[%c0_25, %c0_26, %c0_27] : memref<1x1x16xf32, #tpu.memory_space<vmem>>, vector<1x1x16xf32>
      tpu.vector_store %arg6[%c0_25, %c0_26, %c0_27], %26 {strides = array<i32>} : memref<1x1x16xf32, #tpu.memory_space<vmem>>, vector<1x1x16xf32>,
      %cst_28 = arith.constant 0.000000e+00 : f32
      %28 = vector.broadcast %cst_28 : f32 to vector<1x1x16xf32>
      %c0_29 = arith.constant 0 : index
      %c0_30 = arith.constant 0 : index
      %c0_31 = arith.constant 0 : index
      %29 = vector.load %arg7[%c0_29, %c0_30, %c0_31] : memref<1x1x16xf32, #tpu.memory_space<vmem>>, vector<1x1x16xf32>
      tpu.vector_store %arg7[%c0_29, %c0_30, %c0_31], %28 {strides = array<i32>} : memref<1x1x16xf32, #tpu.memory_space<vmem>>, vector<1x1x16xf32>,
    } else {
    }
    %c0 = arith.constant 0 : index
    %c0_1 = arith.constant 0 : index
    %c0_2 = arith.constant 0 : index
    %3 = vector.load %arg2[%c0, %c0_1, %c0_2] : memref<1x8x216xbf16, #tpu.memory_space<vmem>>, vector<1x8x216xbf16>
    %4 = vector.shape_cast %3 : vector<1x8x216xbf16> to vector<8x216xbf16>
    %c0_3 = arith.constant 0 : index
    %c0_4 = arith.constant 0 : index
    %5 = vector.load %arg3[%c0_3, %c0_4] : memref<216x16xbf16, #tpu.memory_space<vmem>>, vector<216x16xbf16>
    %cst = arith.constant dense<0.000000e+00> : vector<8x16xf32>
    %6 = tpu.matmul %4, %5, %cst {dimension_numbers = #tpu.dot_dimension_numbers<[1], [0], [0], [1], [0, 0, 1, 1], [], []>} : vector<8x216xbf16>, vector<216x16xbf16>, vector<8x16xf32> -> vector<8x16xf32>
    %c0_5 = arith.constant 0 : index
    %c0_6 = arith.constant 0 : index
    %7 = vector.load %arg4[%c0_5, %c0_6] : memref<1x16xf32, #tpu.memory_space<vmem>>, vector<1x16xf32>
    %8 = vector.broadcast %7 : vector<1x16xf32> to vector<8x16xf32>
    %9 = arith.addf %6, %8 : vector<8x16xf32>
    %c0_7 = arith.constant 0 : index
    %c0_8 = arith.constant 0 : index
    %c0_9 = arith.constant 0 : index
    %10 = vector.load %arg5[%c0_7, %c0_8, %c0_9] : memref<1x8x16xf32, #tpu.memory_space<vmem>>, vector<1x8x16xf32>
    %11 = vector.shape_cast %10 : vector<1x8x16xf32> to vector<8x16xf32>
    %12 = vector.shape_cast %9 : vector<8x16xf32> to vector<1x8x16xf32>
    tpu.vector_store %arg5[%c0_7, %c0_8, %c0_9], %12 {strides = array<i32>} : memref<1x8x16xf32, #tpu.memory_space<vmem>>, vector<1x8x16xf32>,
    %c0_10 = arith.constant 0 : index
    %c0_11 = arith.constant 0 : index
    %c0_12 = arith.constant 0 : index
    %13 = vector.load %arg6[%c0_10, %c0_11, %c0_12] : memref<1x1x16xf32, #tpu.memory_space<vmem>>, vector<1x1x16xf32>
    %cst_13 = arith.constant dense<0.000000e+00> : vector<16xf32>
    %14 = vector.multi_reduction <add>, %9, %cst_13 [0] : vector<8x16xf32> to vector<16xf32>
    %15 = vector.shape_cast %14 : vector<16xf32> to vector<1x16xf32>
    %16 = vector.shape_cast %15 : vector<1x16xf32> to vector<1x1x16xf32>
    %17 = arith.addf %13, %16 : vector<1x1x16xf32>
    %c0_14 = arith.constant 0 : index
    %c0_15 = arith.constant 0 : index
    %c0_16 = arith.constant 0 : index
    %18 = vector.load %arg6[%c0_14, %c0_15, %c0_16] : memref<1x1x16xf32, #tpu.memory_space<vmem>>, vector<1x1x16xf32>
    tpu.vector_store %arg6[%c0_14, %c0_15, %c0_16], %17 {strides = array<i32>} : memref<1x1x16xf32, #tpu.memory_space<vmem>>, vector<1x1x16xf32>,
    %c0_17 = arith.constant 0 : index
    %c0_18 = arith.constant 0 : index
    %c0_19 = arith.constant 0 : index
    %19 = vector.load %arg7[%c0_17, %c0_18, %c0_19] : memref<1x1x16xf32, #tpu.memory_space<vmem>>, vector<1x1x16xf32>
    %20 = arith.mulf %9, %9 : vector<8x16xf32>
    %cst_20 = arith.constant dense<0.000000e+00> : vector<16xf32>
    %21 = vector.multi_reduction <add>, %20, %cst_20 [0] : vector<8x16xf32> to vector<16xf32>
    %22 = vector.shape_cast %21 : vector<16xf32> to vector<1x16xf32>
    %23 = vector.shape_cast %22 : vector<1x16xf32> to vector<1x1x16xf32>
    %24 = arith.addf %19, %23 : vector<1x1x16xf32>
    %c0_21 = arith.constant 0 : index
    %c0_22 = arith.constant 0 : index
    %c0_23 = arith.constant 0 : index
    %25 = vector.load %arg7[%c0_21, %c0_22, %c0_23] : memref<1x1x16xf32, #tpu.memory_space<vmem>>, vector<1x1x16xf32>
    tpu.vector_store %arg7[%c0_21, %c0_22, %c0_23], %24 {strides = array<i32>} : memref<1x1x16xf32, #tpu.memory_space<vmem>>, vector<1x1x16xf32>,
    return
  }
  func.func @transform_0(%arg0: i32, %arg1: i32) -> (i32, i32, i32) {
    %c0_i32 = arith.constant 0 : i32
    %c0_i32_0 = arith.constant 0 : i32
    return %arg0, %arg1, %c0_i32 : i32, i32, i32
  }
  func.func @transform_1(%arg0: i32, %arg1: i32) -> (i32, i32) {
    %c0_i32 = arith.constant 0 : i32
    %c0_i32_0 = arith.constant 0 : i32
    %c0_i32_1 = arith.constant 0 : i32
    return %c0_i32, %c0_i32_0 : i32, i32
  }
  func.func @transform_2(%arg0: i32, %arg1: i32) -> (i32, i32) {
    %c0_i32 = arith.constant 0 : i32
    %c0_i32_0 = arith.constant 0 : i32
    %c0_i32_1 = arith.constant 0 : i32
    return %c0_i32, %c0_i32_0 : i32, i32
  }
  func.func @transform_3(%arg0: i32, %arg1: i32) -> (i32, i32, i32) {
    %c0_i32 = arith.constant 0 : i32
    %c0_i32_0 = arith.constant 0 : i32
    return %arg0, %arg1, %c0_i32 : i32, i32, i32
  }
  func.func @transform_4(%arg0: i32, %arg1: i32) -> (i32, i32, i32) {
    %c0_i32 = arith.constant 0 : i32
    %c0_i32_0 = arith.constant 0 : i32
    %c0_i32_1 = arith.constant 0 : i32
    return %arg0, %c0_i32, %c0_i32_0 : i32, i32, i32
  }
  func.func @transform_5(%arg0: i32, %arg1: i32) -> (i32, i32, i32) {
    %c0_i32 = arith.constant 0 : i32
    %c0_i32_0 = arith.constant 0 : i32
    %c0_i32_1 = arith.constant 0 : i32
    return %arg0, %c0_i32, %c0_i32_0 : i32, i32, i32
  }
}

module attributes {stable_mosaic.version = 11 : i64} {
  func.func @norm_lrelu_kernel(%arg0: i32, %arg1: i32, %arg2: memref<1x8x16xf32, #tpu.memory_space<vmem>>, %arg3: memref<1x1x16xf32, #tpu.memory_space<vmem>>, %arg4: memref<1x1x16xf32, #tpu.memory_space<vmem>>, %arg5: memref<1x8x16xbf16, #tpu.memory_space<vmem>>) attributes {dimension_semantics = [#tpu.dimension_semantics<parallel>, #tpu.dimension_semantics<parallel>], iteration_bounds = array<i64: 2, 1>, scalar_prefetch = 0 : i64, scratch_operands = 0 : i64, tpu.core_type = #tpu.core_type<tc>, window_params = [{transform_indices = @transform_0, window_bounds = array<i64: 1, 8, 16>}, {transform_indices = @transform_1, window_bounds = array<i64: 1, 1, 16>}, {transform_indices = @transform_2, window_bounds = array<i64: 1, 1, 16>}, {transform_indices = @transform_3, window_bounds = array<i64: 1, 8, 16>}]} {
    %c0 = arith.constant 0 : index
    %c0_0 = arith.constant 0 : index
    %c0_1 = arith.constant 0 : index
    %0 = vector.load %arg2[%c0, %c0_0, %c0_1] : memref<1x8x16xf32, #tpu.memory_space<vmem>>, vector<1x8x16xf32>
    %1 = vector.shape_cast %0 : vector<1x8x16xf32> to vector<8x16xf32>
    %c0_2 = arith.constant 0 : index
    %c0_3 = arith.constant 0 : index
    %c0_4 = arith.constant 0 : index
    %2 = vector.load %arg3[%c0_2, %c0_3, %c0_4] : memref<1x1x16xf32, #tpu.memory_space<vmem>>, vector<1x1x16xf32>
    %3 = vector.shape_cast %2 : vector<1x1x16xf32> to vector<1x16xf32>
    %4 = vector.broadcast %3 : vector<1x16xf32> to vector<8x16xf32>
    %5 = arith.mulf %1, %4 : vector<8x16xf32>
    %c0_5 = arith.constant 0 : index
    %c0_6 = arith.constant 0 : index
    %c0_7 = arith.constant 0 : index
    %6 = vector.load %arg4[%c0_5, %c0_6, %c0_7] : memref<1x1x16xf32, #tpu.memory_space<vmem>>, vector<1x1x16xf32>
    %7 = vector.shape_cast %6 : vector<1x1x16xf32> to vector<1x16xf32>
    %8 = vector.broadcast %7 : vector<1x16xf32> to vector<8x16xf32>
    %9 = arith.addf %5, %8 : vector<8x16xf32>
    %cst = arith.constant 0.000000e+00 : f32
    %10 = vector.broadcast %cst : f32 to vector<8x16xf32>
    %11 = arith.cmpf oge, %9, %10 : vector<8x16xf32>
    %cst_8 = arith.constant 0.00999999977 : f32
    %12 = vector.broadcast %cst_8 : f32 to vector<8x16xf32>
    %13 = arith.mulf %12, %9 : vector<8x16xf32>
    %14 = arith.select %11, %9, %13 : vector<8x16xi1>, vector<8x16xf32>
    %15 = arith.truncf %14 : vector<8x16xf32> to vector<8x16xbf16>
    %c0_9 = arith.constant 0 : index
    %c0_10 = arith.constant 0 : index
    %c0_11 = arith.constant 0 : index
    %16 = vector.load %arg5[%c0_9, %c0_10, %c0_11] : memref<1x8x16xbf16, #tpu.memory_space<vmem>>, vector<1x8x16xbf16>
    %17 = vector.shape_cast %16 : vector<1x8x16xbf16> to vector<8x16xbf16>
    %18 = vector.shape_cast %15 : vector<8x16xbf16> to vector<1x8x16xbf16>
    tpu.vector_store %arg5[%c0_9, %c0_10, %c0_11], %18 {strides = array<i32>} : memref<1x8x16xbf16, #tpu.memory_space<vmem>>, vector<1x8x16xbf16>,
    return
  }
  func.func @transform_0(%arg0: i32, %arg1: i32) -> (i32, i32, i32) {
    %c0_i32 = arith.constant 0 : i32
    %c0_i32_0 = arith.constant 0 : i32
    return %arg0, %arg1, %c0_i32 : i32, i32, i32
  }
  func.func @transform_1(%arg0: i32, %arg1: i32) -> (i32, i32, i32) {
    %c0_i32 = arith.constant 0 : i32
    %c0_i32_0 = arith.constant 0 : i32
    %c0_i32_1 = arith.constant 0 : i32
    return %arg0, %c0_i32, %c0_i32_0 : i32, i32, i32
  }
  func.func @transform_2(%arg0: i32, %arg1: i32) -> (i32, i32, i32) {
    %c0_i32 = arith.constant 0 : i32
    %c0_i32_0 = arith.constant 0 : i32
    %c0_i32_1 = arith.constant 0 : i32
    return %arg0, %c0_i32, %c0_i32_0 : i32, i32, i32
  }
  func.func @transform_3(%arg0: i32, %arg1: i32) -> (i32, i32, i32) {
    %c0_i32 = arith.constant 0 : i32
    %c0_i32_0 = arith.constant 0 : i32
    return %arg0, %arg1, %c0_i32 : i32, i32, i32
  }
}

module attributes {stable_mosaic.version = 11 : i64} {
  func.func @latent_kernel(%arg0: memref<2x128xbf16, #tpu.memory_space<vmem>>, %arg1: memref<128x8xbf16, #tpu.memory_space<vmem>>, %arg2: memref<1x8xf32, #tpu.memory_space<vmem>>, %arg3: memref<128x8xbf16, #tpu.memory_space<vmem>>, %arg4: memref<1x8xf32, #tpu.memory_space<vmem>>, %arg5: memref<2x8xf32, #tpu.memory_space<vmem>>, %arg6: memref<8x128xbf16, #tpu.memory_space<vmem>>, %arg7: memref<1x128xf32, #tpu.memory_space<vmem>>, %arg8: memref<2x8xf32, #tpu.memory_space<vmem>>, %arg9: memref<2x8xf32, #tpu.memory_space<vmem>>, %arg10: memref<2x8xf32, #tpu.memory_space<vmem>>, %arg11: memref<2x128xf32, #tpu.memory_space<vmem>>) attributes {dimension_semantics = [], scalar_prefetch = 0 : i64, scratch_operands = 0 : i64, tpu.core_type = #tpu.core_type<tc>} {
    %c0 = arith.constant 0 : index
    %c0_0 = arith.constant 0 : index
    %0 = vector.load %arg0[%c0, %c0_0] : memref<2x128xbf16, #tpu.memory_space<vmem>>, vector<2x128xbf16>
    %c0_1 = arith.constant 0 : index
    %c0_2 = arith.constant 0 : index
    %1 = vector.load %arg1[%c0_1, %c0_2] : memref<128x8xbf16, #tpu.memory_space<vmem>>, vector<128x8xbf16>
    %cst = arith.constant dense<0.000000e+00> : vector<2x8xf32>
    %2 = tpu.matmul %0, %1, %cst {dimension_numbers = #tpu.dot_dimension_numbers<[1], [0], [0], [1], [0, 0, 1, 1], [], []>} : vector<2x128xbf16>, vector<128x8xbf16>, vector<2x8xf32> -> vector<2x8xf32>
    %c0_3 = arith.constant 0 : index
    %c0_4 = arith.constant 0 : index
    %3 = vector.load %arg2[%c0_3, %c0_4] : memref<1x8xf32, #tpu.memory_space<vmem>>, vector<1x8xf32>
    %4 = vector.broadcast %3 : vector<1x8xf32> to vector<2x8xf32>
    %5 = arith.addf %2, %4 : vector<2x8xf32>
    %c0_5 = arith.constant 0 : index
    %c0_6 = arith.constant 0 : index
    %6 = vector.load %arg3[%c0_5, %c0_6] : memref<128x8xbf16, #tpu.memory_space<vmem>>, vector<128x8xbf16>
    %cst_7 = arith.constant dense<0.000000e+00> : vector<2x8xf32>
    %7 = tpu.matmul %0, %6, %cst_7 {dimension_numbers = #tpu.dot_dimension_numbers<[1], [0], [0], [1], [0, 0, 1, 1], [], []>} : vector<2x128xbf16>, vector<128x8xbf16>, vector<2x8xf32> -> vector<2x8xf32>
    %c0_8 = arith.constant 0 : index
    %c0_9 = arith.constant 0 : index
    %8 = vector.load %arg4[%c0_8, %c0_9] : memref<1x8xf32, #tpu.memory_space<vmem>>, vector<1x8xf32>
    %9 = vector.broadcast %8 : vector<1x8xf32> to vector<2x8xf32>
    %10 = arith.addf %7, %9 : vector<2x8xf32>
    %c0_10 = arith.constant 0 : index
    %c0_11 = arith.constant 0 : index
    %11 = vector.load %arg5[%c0_10, %c0_11] : memref<2x8xf32, #tpu.memory_space<vmem>>, vector<2x8xf32>
    %cst_12 = arith.constant 5.000000e-01 : f32
    %12 = vector.broadcast %cst_12 : f32 to vector<2x8xf32>
    %13 = arith.mulf %12, %10 : vector<2x8xf32>
    %14 = math.exp %13 : vector<2x8xf32>
    %15 = arith.mulf %11, %14 : vector<2x8xf32>
    %16 = arith.addf %15, %5 : vector<2x8xf32>
    %17 = arith.truncf %16 : vector<2x8xf32> to vector<2x8xbf16>
    %c0_13 = arith.constant 0 : index
    %c0_14 = arith.constant 0 : index
    %18 = vector.load %arg6[%c0_13, %c0_14] : memref<8x128xbf16, #tpu.memory_space<vmem>>, vector<8x128xbf16>
    %cst_15 = arith.constant dense<0.000000e+00> : vector<2x128xf32>
    %19 = tpu.matmul %17, %18, %cst_15 {dimension_numbers = #tpu.dot_dimension_numbers<[1], [0], [0], [1], [0, 0, 1, 1], [], []>} : vector<2x8xbf16>, vector<8x128xbf16>, vector<2x128xf32> -> vector<2x128xf32>
    %c0_16 = arith.constant 0 : index
    %c0_17 = arith.constant 0 : index
    %20 = vector.load %arg7[%c0_16, %c0_17] : memref<1x128xf32, #tpu.memory_space<vmem>>, vector<1x128xf32>
    %21 = vector.broadcast %20 : vector<1x128xf32> to vector<2x128xf32>
    %22 = arith.addf %19, %21 : vector<2x128xf32>
    %c0_18 = arith.constant 0 : index
    %c0_19 = arith.constant 0 : index
    %23 = vector.load %arg8[%c0_18, %c0_19] : memref<2x8xf32, #tpu.memory_space<vmem>>, vector<2x8xf32>
    tpu.vector_store %arg8[%c0_18, %c0_19], %5 {strides = array<i32>} : memref<2x8xf32, #tpu.memory_space<vmem>>, vector<2x8xf32>,
    %c0_20 = arith.constant 0 : index
    %c0_21 = arith.constant 0 : index
    %24 = vector.load %arg9[%c0_20, %c0_21] : memref<2x8xf32, #tpu.memory_space<vmem>>, vector<2x8xf32>
    tpu.vector_store %arg9[%c0_20, %c0_21], %10 {strides = array<i32>} : memref<2x8xf32, #tpu.memory_space<vmem>>, vector<2x8xf32>,
    %c0_22 = arith.constant 0 : index
    %c0_23 = arith.constant 0 : index
    %25 = vector.load %arg10[%c0_22, %c0_23] : memref<2x8xf32, #tpu.memory_space<vmem>>, vector<2x8xf32>
    tpu.vector_store %arg10[%c0_22, %c0_23], %16 {strides = array<i32>} : memref<2x8xf32, #tpu.memory_space<vmem>>, vector<2x8xf32>,
    %c0_24 = arith.constant 0 : index
    %c0_25 = arith.constant 0 : index
    %26 = vector.load %arg11[%c0_24, %c0_25] : memref<2x128xf32, #tpu.memory_space<vmem>>, vector<2x128xf32>
    tpu.vector_store %arg11[%c0_24, %c0_25], %22 {strides = array<i32>} : memref<2x128xf32, #tpu.memory_space<vmem>>, vector<2x128xf32>,
    return
  }
}

module attributes {stable_mosaic.version = 11 : i64} {
  func.func @gemm_stats_kernel(%arg0: i32, %arg1: i32, %arg2: memref<1x8x32xbf16, #tpu.memory_space<vmem>>, %arg3: memref<32x8xbf16, #tpu.memory_space<vmem>>, %arg4: memref<1x8xf32, #tpu.memory_space<vmem>>, %arg5: memref<1x8x8xf32, #tpu.memory_space<vmem>>, %arg6: memref<1x1x8xf32, #tpu.memory_space<vmem>>, %arg7: memref<1x1x8xf32, #tpu.memory_space<vmem>>) attributes {dimension_semantics = [#tpu.dimension_semantics<parallel>, #tpu.dimension_semantics<arbitrary>], iteration_bounds = array<i64: 2, 1>, scalar_prefetch = 0 : i64, scratch_operands = 0 : i64, tpu.core_type = #tpu.core_type<tc>, window_params = [{transform_indices = @transform_0, window_bounds = array<i64: 1, 8, 32>}, {pipeline_mode = #tpu.pipeline_mode<synchronous>, transform_indices = @transform_1, window_bounds = array<i64: 32, 8>}, {pipeline_mode = #tpu.pipeline_mode<synchronous>, transform_indices = @transform_2, window_bounds = array<i64: 1, 8>}, {transform_indices = @transform_3, window_bounds = array<i64: 1, 8, 8>}, {transform_indices = @transform_4, window_bounds = array<i64: 1, 1, 8>}, {transform_indices = @transform_5, window_bounds = array<i64: 1, 1, 8>}]} {
    %c0_i32 = arith.constant 0 : i32
    %0 = arith.cmpi eq, %arg1, %c0_i32 : i32
    %1 = arith.extui %0 : i1 to i32
    %c0_i32_0 = arith.constant 0 : i32
    %2 = arith.cmpi ne, %1, %c0_i32_0 : i32
    scf.if %2 {
      %cst_24 = arith.constant 0.000000e+00 : f32
      %26 = vector.broadcast %cst_24 : f32 to vector<1x1x8xf32>
      %c0_25 = arith.constant 0 : index
      %c0_26 = arith.constant 0 : index
      %c0_27 = arith.constant 0 : index
      %27 = vector.load %arg6[%c0_25, %c0_26, %c0_27] : memref<1x1x8xf32, #tpu.memory_space<vmem>>, vector<1x1x8xf32>
      tpu.vector_store %arg6[%c0_25, %c0_26, %c0_27], %26 {strides = array<i32>} : memref<1x1x8xf32, #tpu.memory_space<vmem>>, vector<1x1x8xf32>,
      %cst_28 = arith.constant 0.000000e+00 : f32
      %28 = vector.broadcast %cst_28 : f32 to vector<1x1x8xf32>
      %c0_29 = arith.constant 0 : index
      %c0_30 = arith.constant 0 : index
      %c0_31 = arith.constant 0 : index
      %29 = vector.load %arg7[%c0_29, %c0_30, %c0_31] : memref<1x1x8xf32, #tpu.memory_space<vmem>>, vector<1x1x8xf32>
      tpu.vector_store %arg7[%c0_29, %c0_30, %c0_31], %28 {strides = array<i32>} : memref<1x1x8xf32, #tpu.memory_space<vmem>>, vector<1x1x8xf32>,
    } else {
    }
    %c0 = arith.constant 0 : index
    %c0_1 = arith.constant 0 : index
    %c0_2 = arith.constant 0 : index
    %3 = vector.load %arg2[%c0, %c0_1, %c0_2] : memref<1x8x32xbf16, #tpu.memory_space<vmem>>, vector<1x8x32xbf16>
    %4 = vector.shape_cast %3 : vector<1x8x32xbf16> to vector<8x32xbf16>
    %c0_3 = arith.constant 0 : index
    %c0_4 = arith.constant 0 : index
    %5 = vector.load %arg3[%c0_3, %c0_4] : memref<32x8xbf16, #tpu.memory_space<vmem>>, vector<32x8xbf16>
    %cst = arith.constant dense<0.000000e+00> : vector<8x8xf32>
    %6 = tpu.matmul %4, %5, %cst {dimension_numbers = #tpu.dot_dimension_numbers<[1], [0], [0], [1], [0, 0, 1, 1], [], []>} : vector<8x32xbf16>, vector<32x8xbf16>, vector<8x8xf32> -> vector<8x8xf32>
    %c0_5 = arith.constant 0 : index
    %c0_6 = arith.constant 0 : index
    %7 = vector.load %arg4[%c0_5, %c0_6] : memref<1x8xf32, #tpu.memory_space<vmem>>, vector<1x8xf32>
    %8 = vector.broadcast %7 : vector<1x8xf32> to vector<8x8xf32>
    %9 = arith.addf %6, %8 : vector<8x8xf32>
    %c0_7 = arith.constant 0 : index
    %c0_8 = arith.constant 0 : index
    %c0_9 = arith.constant 0 : index
    %10 = vector.load %arg5[%c0_7, %c0_8, %c0_9] : memref<1x8x8xf32, #tpu.memory_space<vmem>>, vector<1x8x8xf32>
    %11 = vector.shape_cast %10 : vector<1x8x8xf32> to vector<8x8xf32>
    %12 = vector.shape_cast %9 : vector<8x8xf32> to vector<1x8x8xf32>
    tpu.vector_store %arg5[%c0_7, %c0_8, %c0_9], %12 {strides = array<i32>} : memref<1x8x8xf32, #tpu.memory_space<vmem>>, vector<1x8x8xf32>,
    %c0_10 = arith.constant 0 : index
    %c0_11 = arith.constant 0 : index
    %c0_12 = arith.constant 0 : index
    %13 = vector.load %arg6[%c0_10, %c0_11, %c0_12] : memref<1x1x8xf32, #tpu.memory_space<vmem>>, vector<1x1x8xf32>
    %cst_13 = arith.constant dense<0.000000e+00> : vector<8xf32>
    %14 = vector.multi_reduction <add>, %9, %cst_13 [0] : vector<8x8xf32> to vector<8xf32>
    %15 = vector.shape_cast %14 : vector<8xf32> to vector<1x8xf32>
    %16 = vector.shape_cast %15 : vector<1x8xf32> to vector<1x1x8xf32>
    %17 = arith.addf %13, %16 : vector<1x1x8xf32>
    %c0_14 = arith.constant 0 : index
    %c0_15 = arith.constant 0 : index
    %c0_16 = arith.constant 0 : index
    %18 = vector.load %arg6[%c0_14, %c0_15, %c0_16] : memref<1x1x8xf32, #tpu.memory_space<vmem>>, vector<1x1x8xf32>
    tpu.vector_store %arg6[%c0_14, %c0_15, %c0_16], %17 {strides = array<i32>} : memref<1x1x8xf32, #tpu.memory_space<vmem>>, vector<1x1x8xf32>,
    %c0_17 = arith.constant 0 : index
    %c0_18 = arith.constant 0 : index
    %c0_19 = arith.constant 0 : index
    %19 = vector.load %arg7[%c0_17, %c0_18, %c0_19] : memref<1x1x8xf32, #tpu.memory_space<vmem>>, vector<1x1x8xf32>
    %20 = arith.mulf %9, %9 : vector<8x8xf32>
    %cst_20 = arith.constant dense<0.000000e+00> : vector<8xf32>
    %21 = vector.multi_reduction <add>, %20, %cst_20 [0] : vector<8x8xf32> to vector<8xf32>
    %22 = vector.shape_cast %21 : vector<8xf32> to vector<1x8xf32>
    %23 = vector.shape_cast %22 : vector<1x8xf32> to vector<1x1x8xf32>
    %24 = arith.addf %19, %23 : vector<1x1x8xf32>
    %c0_21 = arith.constant 0 : index
    %c0_22 = arith.constant 0 : index
    %c0_23 = arith.constant 0 : index
    %25 = vector.load %arg7[%c0_21, %c0_22, %c0_23] : memref<1x1x8xf32, #tpu.memory_space<vmem>>, vector<1x1x8xf32>
    tpu.vector_store %arg7[%c0_21, %c0_22, %c0_23], %24 {strides = array<i32>} : memref<1x1x8xf32, #tpu.memory_space<vmem>>, vector<1x1x8xf32>,
    return
  }
  func.func @transform_0(%arg0: i32, %arg1: i32) -> (i32, i32, i32) {
    %c0_i32 = arith.constant 0 : i32
    %c0_i32_0 = arith.constant 0 : i32
    return %arg0, %arg1, %c0_i32 : i32, i32, i32
  }
  func.func @transform_1(%arg0: i32, %arg1: i32) -> (i32, i32) {
    %c0_i32 = arith.constant 0 : i32
    %c0_i32_0 = arith.constant 0 : i32
    %c0_i32_1 = arith.constant 0 : i32
    return %c0_i32, %c0_i32_0 : i32, i32
  }
  func.func @transform_2(%arg0: i32, %arg1: i32) -> (i32, i32) {
    %c0_i32 = arith.constant 0 : i32
    %c0_i32_0 = arith.constant 0 : i32
    %c0_i32_1 = arith.constant 0 : i32
    return %c0_i32, %c0_i32_0 : i32, i32
  }
  func.func @transform_3(%arg0: i32, %arg1: i32) -> (i32, i32, i32) {
    %c0_i32 = arith.constant 0 : i32
    %c0_i32_0 = arith.constant 0 : i32
    return %arg0, %arg1, %c0_i32 : i32, i32, i32
  }
  func.func @transform_4(%arg0: i32, %arg1: i32) -> (i32, i32, i32) {
    %c0_i32 = arith.constant 0 : i32
    %c0_i32_0 = arith.constant 0 : i32
    %c0_i32_1 = arith.constant 0 : i32
    return %arg0, %c0_i32, %c0_i32_0 : i32, i32, i32
  }
  func.func @transform_5(%arg0: i32, %arg1: i32) -> (i32, i32, i32) {
    %c0_i32 = arith.constant 0 : i32
    %c0_i32_0 = arith.constant 0 : i32
    %c0_i32_1 = arith.constant 0 : i32
    return %arg0, %c0_i32, %c0_i32_0 : i32, i32, i32
  }
}

module attributes {stable_mosaic.version = 11 : i64} {
  func.func @gemm_stats_kernel(%arg0: i32, %arg1: i32, %arg2: memref<1x8x64xbf16, #tpu.memory_space<vmem>>, %arg3: memref<64x8xbf16, #tpu.memory_space<vmem>>, %arg4: memref<1x8xf32, #tpu.memory_space<vmem>>, %arg5: memref<1x8x8xf32, #tpu.memory_space<vmem>>, %arg6: memref<1x1x8xf32, #tpu.memory_space<vmem>>, %arg7: memref<1x1x8xf32, #tpu.memory_space<vmem>>) attributes {dimension_semantics = [#tpu.dimension_semantics<parallel>, #tpu.dimension_semantics<arbitrary>], iteration_bounds = array<i64: 2, 1>, scalar_prefetch = 0 : i64, scratch_operands = 0 : i64, tpu.core_type = #tpu.core_type<tc>, window_params = [{transform_indices = @transform_0, window_bounds = array<i64: 1, 8, 64>}, {pipeline_mode = #tpu.pipeline_mode<synchronous>, transform_indices = @transform_1, window_bounds = array<i64: 64, 8>}, {pipeline_mode = #tpu.pipeline_mode<synchronous>, transform_indices = @transform_2, window_bounds = array<i64: 1, 8>}, {transform_indices = @transform_3, window_bounds = array<i64: 1, 8, 8>}, {transform_indices = @transform_4, window_bounds = array<i64: 1, 1, 8>}, {transform_indices = @transform_5, window_bounds = array<i64: 1, 1, 8>}]} {
    %c0_i32 = arith.constant 0 : i32
    %0 = arith.cmpi eq, %arg1, %c0_i32 : i32
    %1 = arith.extui %0 : i1 to i32
    %c0_i32_0 = arith.constant 0 : i32
    %2 = arith.cmpi ne, %1, %c0_i32_0 : i32
    scf.if %2 {
      %cst_24 = arith.constant 0.000000e+00 : f32
      %26 = vector.broadcast %cst_24 : f32 to vector<1x1x8xf32>
      %c0_25 = arith.constant 0 : index
      %c0_26 = arith.constant 0 : index
      %c0_27 = arith.constant 0 : index
      %27 = vector.load %arg6[%c0_25, %c0_26, %c0_27] : memref<1x1x8xf32, #tpu.memory_space<vmem>>, vector<1x1x8xf32>
      tpu.vector_store %arg6[%c0_25, %c0_26, %c0_27], %26 {strides = array<i32>} : memref<1x1x8xf32, #tpu.memory_space<vmem>>, vector<1x1x8xf32>,
      %cst_28 = arith.constant 0.000000e+00 : f32
      %28 = vector.broadcast %cst_28 : f32 to vector<1x1x8xf32>
      %c0_29 = arith.constant 0 : index
      %c0_30 = arith.constant 0 : index
      %c0_31 = arith.constant 0 : index
      %29 = vector.load %arg7[%c0_29, %c0_30, %c0_31] : memref<1x1x8xf32, #tpu.memory_space<vmem>>, vector<1x1x8xf32>
      tpu.vector_store %arg7[%c0_29, %c0_30, %c0_31], %28 {strides = array<i32>} : memref<1x1x8xf32, #tpu.memory_space<vmem>>, vector<1x1x8xf32>,
    } else {
    }
    %c0 = arith.constant 0 : index
    %c0_1 = arith.constant 0 : index
    %c0_2 = arith.constant 0 : index
    %3 = vector.load %arg2[%c0, %c0_1, %c0_2] : memref<1x8x64xbf16, #tpu.memory_space<vmem>>, vector<1x8x64xbf16>
    %4 = vector.shape_cast %3 : vector<1x8x64xbf16> to vector<8x64xbf16>
    %c0_3 = arith.constant 0 : index
    %c0_4 = arith.constant 0 : index
    %5 = vector.load %arg3[%c0_3, %c0_4] : memref<64x8xbf16, #tpu.memory_space<vmem>>, vector<64x8xbf16>
    %cst = arith.constant dense<0.000000e+00> : vector<8x8xf32>
    %6 = tpu.matmul %4, %5, %cst {dimension_numbers = #tpu.dot_dimension_numbers<[1], [0], [0], [1], [0, 0, 1, 1], [], []>} : vector<8x64xbf16>, vector<64x8xbf16>, vector<8x8xf32> -> vector<8x8xf32>
    %c0_5 = arith.constant 0 : index
    %c0_6 = arith.constant 0 : index
    %7 = vector.load %arg4[%c0_5, %c0_6] : memref<1x8xf32, #tpu.memory_space<vmem>>, vector<1x8xf32>
    %8 = vector.broadcast %7 : vector<1x8xf32> to vector<8x8xf32>
    %9 = arith.addf %6, %8 : vector<8x8xf32>
    %c0_7 = arith.constant 0 : index
    %c0_8 = arith.constant 0 : index
    %c0_9 = arith.constant 0 : index
    %10 = vector.load %arg5[%c0_7, %c0_8, %c0_9] : memref<1x8x8xf32, #tpu.memory_space<vmem>>, vector<1x8x8xf32>
    %11 = vector.shape_cast %10 : vector<1x8x8xf32> to vector<8x8xf32>
    %12 = vector.shape_cast %9 : vector<8x8xf32> to vector<1x8x8xf32>
    tpu.vector_store %arg5[%c0_7, %c0_8, %c0_9], %12 {strides = array<i32>} : memref<1x8x8xf32, #tpu.memory_space<vmem>>, vector<1x8x8xf32>,
    %c0_10 = arith.constant 0 : index
    %c0_11 = arith.constant 0 : index
    %c0_12 = arith.constant 0 : index
    %13 = vector.load %arg6[%c0_10, %c0_11, %c0_12] : memref<1x1x8xf32, #tpu.memory_space<vmem>>, vector<1x1x8xf32>
    %cst_13 = arith.constant dense<0.000000e+00> : vector<8xf32>
    %14 = vector.multi_reduction <add>, %9, %cst_13 [0] : vector<8x8xf32> to vector<8xf32>
    %15 = vector.shape_cast %14 : vector<8xf32> to vector<1x8xf32>
    %16 = vector.shape_cast %15 : vector<1x8xf32> to vector<1x1x8xf32>
    %17 = arith.addf %13, %16 : vector<1x1x8xf32>
    %c0_14 = arith.constant 0 : index
    %c0_15 = arith.constant 0 : index
    %c0_16 = arith.constant 0 : index
    %18 = vector.load %arg6[%c0_14, %c0_15, %c0_16] : memref<1x1x8xf32, #tpu.memory_space<vmem>>, vector<1x1x8xf32>
    tpu.vector_store %arg6[%c0_14, %c0_15, %c0_16], %17 {strides = array<i32>} : memref<1x1x8xf32, #tpu.memory_space<vmem>>, vector<1x1x8xf32>,
    %c0_17 = arith.constant 0 : index
    %c0_18 = arith.constant 0 : index
    %c0_19 = arith.constant 0 : index
    %19 = vector.load %arg7[%c0_17, %c0_18, %c0_19] : memref<1x1x8xf32, #tpu.memory_space<vmem>>, vector<1x1x8xf32>
    %20 = arith.mulf %9, %9 : vector<8x8xf32>
    %cst_20 = arith.constant dense<0.000000e+00> : vector<8xf32>
    %21 = vector.multi_reduction <add>, %20, %cst_20 [0] : vector<8x8xf32> to vector<8xf32>
    %22 = vector.shape_cast %21 : vector<8xf32> to vector<1x8xf32>
    %23 = vector.shape_cast %22 : vector<1x8xf32> to vector<1x1x8xf32>
    %24 = arith.addf %19, %23 : vector<1x1x8xf32>
    %c0_21 = arith.constant 0 : index
    %c0_22 = arith.constant 0 : index
    %c0_23 = arith.constant 0 : index
    %25 = vector.load %arg7[%c0_21, %c0_22, %c0_23] : memref<1x1x8xf32, #tpu.memory_space<vmem>>, vector<1x1x8xf32>
    tpu.vector_store %arg7[%c0_21, %c0_22, %c0_23], %24 {strides = array<i32>} : memref<1x1x8xf32, #tpu.memory_space<vmem>>, vector<1x1x8xf32>,
    return
  }
  func.func @transform_0(%arg0: i32, %arg1: i32) -> (i32, i32, i32) {
    %c0_i32 = arith.constant 0 : i32
    %c0_i32_0 = arith.constant 0 : i32
    return %arg0, %arg1, %c0_i32 : i32, i32, i32
  }
  func.func @transform_1(%arg0: i32, %arg1: i32) -> (i32, i32) {
    %c0_i32 = arith.constant 0 : i32
    %c0_i32_0 = arith.constant 0 : i32
    %c0_i32_1 = arith.constant 0 : i32
    return %c0_i32, %c0_i32_0 : i32, i32
  }
  func.func @transform_2(%arg0: i32, %arg1: i32) -> (i32, i32) {
    %c0_i32 = arith.constant 0 : i32
    %c0_i32_0 = arith.constant 0 : i32
    %c0_i32_1 = arith.constant 0 : i32
    return %c0_i32, %c0_i32_0 : i32, i32
  }
  func.func @transform_3(%arg0: i32, %arg1: i32) -> (i32, i32, i32) {
    %c0_i32 = arith.constant 0 : i32
    %c0_i32_0 = arith.constant 0 : i32
    return %arg0, %arg1, %c0_i32 : i32, i32, i32
  }
  func.func @transform_4(%arg0: i32, %arg1: i32) -> (i32, i32, i32) {
    %c0_i32 = arith.constant 0 : i32
    %c0_i32_0 = arith.constant 0 : i32
    %c0_i32_1 = arith.constant 0 : i32
    return %arg0, %c0_i32, %c0_i32_0 : i32, i32, i32
  }
  func.func @transform_5(%arg0: i32, %arg1: i32) -> (i32, i32, i32) {
    %c0_i32 = arith.constant 0 : i32
    %c0_i32_0 = arith.constant 0 : i32
    %c0_i32_1 = arith.constant 0 : i32
    return %arg0, %c0_i32, %c0_i32_0 : i32, i32, i32
  }
}

module attributes {stable_mosaic.version = 11 : i64} {
  func.func @gemm_stats_kernel(%arg0: i32, %arg1: i32, %arg2: memref<1x8x128xbf16, #tpu.memory_space<vmem>>, %arg3: memref<128x8xbf16, #tpu.memory_space<vmem>>, %arg4: memref<1x8xf32, #tpu.memory_space<vmem>>, %arg5: memref<1x8x8xf32, #tpu.memory_space<vmem>>, %arg6: memref<1x1x8xf32, #tpu.memory_space<vmem>>, %arg7: memref<1x1x8xf32, #tpu.memory_space<vmem>>) attributes {dimension_semantics = [#tpu.dimension_semantics<parallel>, #tpu.dimension_semantics<arbitrary>], iteration_bounds = array<i64: 2, 1>, scalar_prefetch = 0 : i64, scratch_operands = 0 : i64, tpu.core_type = #tpu.core_type<tc>, window_params = [{transform_indices = @transform_0, window_bounds = array<i64: 1, 8, 128>}, {pipeline_mode = #tpu.pipeline_mode<synchronous>, transform_indices = @transform_1, window_bounds = array<i64: 128, 8>}, {pipeline_mode = #tpu.pipeline_mode<synchronous>, transform_indices = @transform_2, window_bounds = array<i64: 1, 8>}, {transform_indices = @transform_3, window_bounds = array<i64: 1, 8, 8>}, {transform_indices = @transform_4, window_bounds = array<i64: 1, 1, 8>}, {transform_indices = @transform_5, window_bounds = array<i64: 1, 1, 8>}]} {
    %c0_i32 = arith.constant 0 : i32
    %0 = arith.cmpi eq, %arg1, %c0_i32 : i32
    %1 = arith.extui %0 : i1 to i32
    %c0_i32_0 = arith.constant 0 : i32
    %2 = arith.cmpi ne, %1, %c0_i32_0 : i32
    scf.if %2 {
      %cst_24 = arith.constant 0.000000e+00 : f32
      %26 = vector.broadcast %cst_24 : f32 to vector<1x1x8xf32>
      %c0_25 = arith.constant 0 : index
      %c0_26 = arith.constant 0 : index
      %c0_27 = arith.constant 0 : index
      %27 = vector.load %arg6[%c0_25, %c0_26, %c0_27] : memref<1x1x8xf32, #tpu.memory_space<vmem>>, vector<1x1x8xf32>
      tpu.vector_store %arg6[%c0_25, %c0_26, %c0_27], %26 {strides = array<i32>} : memref<1x1x8xf32, #tpu.memory_space<vmem>>, vector<1x1x8xf32>,
      %cst_28 = arith.constant 0.000000e+00 : f32
      %28 = vector.broadcast %cst_28 : f32 to vector<1x1x8xf32>
      %c0_29 = arith.constant 0 : index
      %c0_30 = arith.constant 0 : index
      %c0_31 = arith.constant 0 : index
      %29 = vector.load %arg7[%c0_29, %c0_30, %c0_31] : memref<1x1x8xf32, #tpu.memory_space<vmem>>, vector<1x1x8xf32>
      tpu.vector_store %arg7[%c0_29, %c0_30, %c0_31], %28 {strides = array<i32>} : memref<1x1x8xf32, #tpu.memory_space<vmem>>, vector<1x1x8xf32>,
    } else {
    }
    %c0 = arith.constant 0 : index
    %c0_1 = arith.constant 0 : index
    %c0_2 = arith.constant 0 : index
    %3 = vector.load %arg2[%c0, %c0_1, %c0_2] : memref<1x8x128xbf16, #tpu.memory_space<vmem>>, vector<1x8x128xbf16>
    %4 = vector.shape_cast %3 : vector<1x8x128xbf16> to vector<8x128xbf16>
    %c0_3 = arith.constant 0 : index
    %c0_4 = arith.constant 0 : index
    %5 = vector.load %arg3[%c0_3, %c0_4] : memref<128x8xbf16, #tpu.memory_space<vmem>>, vector<128x8xbf16>
    %cst = arith.constant dense<0.000000e+00> : vector<8x8xf32>
    %6 = tpu.matmul %4, %5, %cst {dimension_numbers = #tpu.dot_dimension_numbers<[1], [0], [0], [1], [0, 0, 1, 1], [], []>} : vector<8x128xbf16>, vector<128x8xbf16>, vector<8x8xf32> -> vector<8x8xf32>
    %c0_5 = arith.constant 0 : index
    %c0_6 = arith.constant 0 : index
    %7 = vector.load %arg4[%c0_5, %c0_6] : memref<1x8xf32, #tpu.memory_space<vmem>>, vector<1x8xf32>
    %8 = vector.broadcast %7 : vector<1x8xf32> to vector<8x8xf32>
    %9 = arith.addf %6, %8 : vector<8x8xf32>
    %c0_7 = arith.constant 0 : index
    %c0_8 = arith.constant 0 : index
    %c0_9 = arith.constant 0 : index
    %10 = vector.load %arg5[%c0_7, %c0_8, %c0_9] : memref<1x8x8xf32, #tpu.memory_space<vmem>>, vector<1x8x8xf32>
    %11 = vector.shape_cast %10 : vector<1x8x8xf32> to vector<8x8xf32>
    %12 = vector.shape_cast %9 : vector<8x8xf32> to vector<1x8x8xf32>
    tpu.vector_store %arg5[%c0_7, %c0_8, %c0_9], %12 {strides = array<i32>} : memref<1x8x8xf32, #tpu.memory_space<vmem>>, vector<1x8x8xf32>,
    %c0_10 = arith.constant 0 : index
    %c0_11 = arith.constant 0 : index
    %c0_12 = arith.constant 0 : index
    %13 = vector.load %arg6[%c0_10, %c0_11, %c0_12] : memref<1x1x8xf32, #tpu.memory_space<vmem>>, vector<1x1x8xf32>
    %cst_13 = arith.constant dense<0.000000e+00> : vector<8xf32>
    %14 = vector.multi_reduction <add>, %9, %cst_13 [0] : vector<8x8xf32> to vector<8xf32>
    %15 = vector.shape_cast %14 : vector<8xf32> to vector<1x8xf32>
    %16 = vector.shape_cast %15 : vector<1x8xf32> to vector<1x1x8xf32>
    %17 = arith.addf %13, %16 : vector<1x1x8xf32>
    %c0_14 = arith.constant 0 : index
    %c0_15 = arith.constant 0 : index
    %c0_16 = arith.constant 0 : index
    %18 = vector.load %arg6[%c0_14, %c0_15, %c0_16] : memref<1x1x8xf32, #tpu.memory_space<vmem>>, vector<1x1x8xf32>
    tpu.vector_store %arg6[%c0_14, %c0_15, %c0_16], %17 {strides = array<i32>} : memref<1x1x8xf32, #tpu.memory_space<vmem>>, vector<1x1x8xf32>,
    %c0_17 = arith.constant 0 : index
    %c0_18 = arith.constant 0 : index
    %c0_19 = arith.constant 0 : index
    %19 = vector.load %arg7[%c0_17, %c0_18, %c0_19] : memref<1x1x8xf32, #tpu.memory_space<vmem>>, vector<1x1x8xf32>
    %20 = arith.mulf %9, %9 : vector<8x8xf32>
    %cst_20 = arith.constant dense<0.000000e+00> : vector<8xf32>
    %21 = vector.multi_reduction <add>, %20, %cst_20 [0] : vector<8x8xf32> to vector<8xf32>
    %22 = vector.shape_cast %21 : vector<8xf32> to vector<1x8xf32>
    %23 = vector.shape_cast %22 : vector<1x8xf32> to vector<1x1x8xf32>
    %24 = arith.addf %19, %23 : vector<1x1x8xf32>
    %c0_21 = arith.constant 0 : index
    %c0_22 = arith.constant 0 : index
    %c0_23 = arith.constant 0 : index
    %25 = vector.load %arg7[%c0_21, %c0_22, %c0_23] : memref<1x1x8xf32, #tpu.memory_space<vmem>>, vector<1x1x8xf32>
    tpu.vector_store %arg7[%c0_21, %c0_22, %c0_23], %24 {strides = array<i32>} : memref<1x1x8xf32, #tpu.memory_space<vmem>>, vector<1x1x8xf32>,
    return
  }
  func.func @transform_0(%arg0: i32, %arg1: i32) -> (i32, i32, i32) {
    %c0_i32 = arith.constant 0 : i32
    %c0_i32_0 = arith.constant 0 : i32
    return %arg0, %arg1, %c0_i32 : i32, i32, i32
  }
  func.func @transform_1(%arg0: i32, %arg1: i32) -> (i32, i32) {
    %c0_i32 = arith.constant 0 : i32
    %c0_i32_0 = arith.constant 0 : i32
    %c0_i32_1 = arith.constant 0 : i32
    return %c0_i32, %c0_i32_0 : i32, i32
  }
  func.func @transform_2(%arg0: i32, %arg1: i32) -> (i32, i32) {
    %c0_i32 = arith.constant 0 : i32
    %c0_i32_0 = arith.constant 0 : i32
    %c0_i32_1 = arith.constant 0 : i32
    return %c0_i32, %c0_i32_0 : i32, i32
  }
  func.func @transform_3(%arg0: i32, %arg1: i32) -> (i32, i32, i32) {
    %c0_i32 = arith.constant 0 : i32
    %c0_i32_0 = arith.constant 0 : i32
    return %arg0, %arg1, %c0_i32 : i32, i32, i32
  }
  func.func @transform_4(%arg0: i32, %arg1: i32) -> (i32, i32, i32) {
    %c0_i32 = arith.constant 0 : i32
    %c0_i32_0 = arith.constant 0 : i32
    %c0_i32_1 = arith.constant 0 : i32
    return %arg0, %c0_i32, %c0_i32_0 : i32, i32, i32
  }
  func.func @transform_5(%arg0: i32, %arg1: i32) -> (i32, i32, i32) {
    %c0_i32 = arith.constant 0 : i32
    %c0_i32_0 = arith.constant 0 : i32
    %c0_i32_1 = arith.constant 0 : i32
    return %arg0, %c0_i32, %c0_i32_0 : i32, i32, i32
  }
}

module attributes {stable_mosaic.version = 11 : i64} {
  func.func @gemm_stats_kernel(%arg0: i32, %arg1: i32, %arg2: memref<1x8x16xbf16, #tpu.memory_space<vmem>>, %arg3: memref<16x8xbf16, #tpu.memory_space<vmem>>, %arg4: memref<1x8xf32, #tpu.memory_space<vmem>>, %arg5: memref<1x8x8xf32, #tpu.memory_space<vmem>>, %arg6: memref<1x1x8xf32, #tpu.memory_space<vmem>>, %arg7: memref<1x1x8xf32, #tpu.memory_space<vmem>>) attributes {dimension_semantics = [#tpu.dimension_semantics<parallel>, #tpu.dimension_semantics<arbitrary>], iteration_bounds = array<i64: 2, 1>, scalar_prefetch = 0 : i64, scratch_operands = 0 : i64, tpu.core_type = #tpu.core_type<tc>, window_params = [{transform_indices = @transform_0, window_bounds = array<i64: 1, 8, 16>}, {pipeline_mode = #tpu.pipeline_mode<synchronous>, transform_indices = @transform_1, window_bounds = array<i64: 16, 8>}, {pipeline_mode = #tpu.pipeline_mode<synchronous>, transform_indices = @transform_2, window_bounds = array<i64: 1, 8>}, {transform_indices = @transform_3, window_bounds = array<i64: 1, 8, 8>}, {transform_indices = @transform_4, window_bounds = array<i64: 1, 1, 8>}, {transform_indices = @transform_5, window_bounds = array<i64: 1, 1, 8>}]} {
    %c0_i32 = arith.constant 0 : i32
    %0 = arith.cmpi eq, %arg1, %c0_i32 : i32
    %1 = arith.extui %0 : i1 to i32
    %c0_i32_0 = arith.constant 0 : i32
    %2 = arith.cmpi ne, %1, %c0_i32_0 : i32
    scf.if %2 {
      %cst_24 = arith.constant 0.000000e+00 : f32
      %26 = vector.broadcast %cst_24 : f32 to vector<1x1x8xf32>
      %c0_25 = arith.constant 0 : index
      %c0_26 = arith.constant 0 : index
      %c0_27 = arith.constant 0 : index
      %27 = vector.load %arg6[%c0_25, %c0_26, %c0_27] : memref<1x1x8xf32, #tpu.memory_space<vmem>>, vector<1x1x8xf32>
      tpu.vector_store %arg6[%c0_25, %c0_26, %c0_27], %26 {strides = array<i32>} : memref<1x1x8xf32, #tpu.memory_space<vmem>>, vector<1x1x8xf32>,
      %cst_28 = arith.constant 0.000000e+00 : f32
      %28 = vector.broadcast %cst_28 : f32 to vector<1x1x8xf32>
      %c0_29 = arith.constant 0 : index
      %c0_30 = arith.constant 0 : index
      %c0_31 = arith.constant 0 : index
      %29 = vector.load %arg7[%c0_29, %c0_30, %c0_31] : memref<1x1x8xf32, #tpu.memory_space<vmem>>, vector<1x1x8xf32>
      tpu.vector_store %arg7[%c0_29, %c0_30, %c0_31], %28 {strides = array<i32>} : memref<1x1x8xf32, #tpu.memory_space<vmem>>, vector<1x1x8xf32>,
    } else {
    }
    %c0 = arith.constant 0 : index
    %c0_1 = arith.constant 0 : index
    %c0_2 = arith.constant 0 : index
    %3 = vector.load %arg2[%c0, %c0_1, %c0_2] : memref<1x8x16xbf16, #tpu.memory_space<vmem>>, vector<1x8x16xbf16>
    %4 = vector.shape_cast %3 : vector<1x8x16xbf16> to vector<8x16xbf16>
    %c0_3 = arith.constant 0 : index
    %c0_4 = arith.constant 0 : index
    %5 = vector.load %arg3[%c0_3, %c0_4] : memref<16x8xbf16, #tpu.memory_space<vmem>>, vector<16x8xbf16>
    %cst = arith.constant dense<0.000000e+00> : vector<8x8xf32>
    %6 = tpu.matmul %4, %5, %cst {dimension_numbers = #tpu.dot_dimension_numbers<[1], [0], [0], [1], [0, 0, 1, 1], [], []>} : vector<8x16xbf16>, vector<16x8xbf16>, vector<8x8xf32> -> vector<8x8xf32>
    %c0_5 = arith.constant 0 : index
    %c0_6 = arith.constant 0 : index
    %7 = vector.load %arg4[%c0_5, %c0_6] : memref<1x8xf32, #tpu.memory_space<vmem>>, vector<1x8xf32>
    %8 = vector.broadcast %7 : vector<1x8xf32> to vector<8x8xf32>
    %9 = arith.addf %6, %8 : vector<8x8xf32>
    %c0_7 = arith.constant 0 : index
    %c0_8 = arith.constant 0 : index
    %c0_9 = arith.constant 0 : index
    %10 = vector.load %arg5[%c0_7, %c0_8, %c0_9] : memref<1x8x8xf32, #tpu.memory_space<vmem>>, vector<1x8x8xf32>
    %11 = vector.shape_cast %10 : vector<1x8x8xf32> to vector<8x8xf32>
    %12 = vector.shape_cast %9 : vector<8x8xf32> to vector<1x8x8xf32>
    tpu.vector_store %arg5[%c0_7, %c0_8, %c0_9], %12 {strides = array<i32>} : memref<1x8x8xf32, #tpu.memory_space<vmem>>, vector<1x8x8xf32>,
    %c0_10 = arith.constant 0 : index
    %c0_11 = arith.constant 0 : index
    %c0_12 = arith.constant 0 : index
    %13 = vector.load %arg6[%c0_10, %c0_11, %c0_12] : memref<1x1x8xf32, #tpu.memory_space<vmem>>, vector<1x1x8xf32>
    %cst_13 = arith.constant dense<0.000000e+00> : vector<8xf32>
    %14 = vector.multi_reduction <add>, %9, %cst_13 [0] : vector<8x8xf32> to vector<8xf32>
    %15 = vector.shape_cast %14 : vector<8xf32> to vector<1x8xf32>
    %16 = vector.shape_cast %15 : vector<1x8xf32> to vector<1x1x8xf32>
    %17 = arith.addf %13, %16 : vector<1x1x8xf32>
    %c0_14 = arith.constant 0 : index
    %c0_15 = arith.constant 0 : index
    %c0_16 = arith.constant 0 : index
    %18 = vector.load %arg6[%c0_14, %c0_15, %c0_16] : memref<1x1x8xf32, #tpu.memory_space<vmem>>, vector<1x1x8xf32>
    tpu.vector_store %arg6[%c0_14, %c0_15, %c0_16], %17 {strides = array<i32>} : memref<1x1x8xf32, #tpu.memory_space<vmem>>, vector<1x1x8xf32>,
    %c0_17 = arith.constant 0 : index
    %c0_18 = arith.constant 0 : index
    %c0_19 = arith.constant 0 : index
    %19 = vector.load %arg7[%c0_17, %c0_18, %c0_19] : memref<1x1x8xf32, #tpu.memory_space<vmem>>, vector<1x1x8xf32>
    %20 = arith.mulf %9, %9 : vector<8x8xf32>
    %cst_20 = arith.constant dense<0.000000e+00> : vector<8xf32>
    %21 = vector.multi_reduction <add>, %20, %cst_20 [0] : vector<8x8xf32> to vector<8xf32>
    %22 = vector.shape_cast %21 : vector<8xf32> to vector<1x8xf32>
    %23 = vector.shape_cast %22 : vector<1x8xf32> to vector<1x1x8xf32>
    %24 = arith.addf %19, %23 : vector<1x1x8xf32>
    %c0_21 = arith.constant 0 : index
    %c0_22 = arith.constant 0 : index
    %c0_23 = arith.constant 0 : index
    %25 = vector.load %arg7[%c0_21, %c0_22, %c0_23] : memref<1x1x8xf32, #tpu.memory_space<vmem>>, vector<1x1x8xf32>
    tpu.vector_store %arg7[%c0_21, %c0_22, %c0_23], %24 {strides = array<i32>} : memref<1x1x8xf32, #tpu.memory_space<vmem>>, vector<1x1x8xf32>,
    return
  }
  func.func @transform_0(%arg0: i32, %arg1: i32) -> (i32, i32, i32) {
    %c0_i32 = arith.constant 0 : i32
    %c0_i32_0 = arith.constant 0 : i32
    return %arg0, %arg1, %c0_i32 : i32, i32, i32
  }
  func.func @transform_1(%arg0: i32, %arg1: i32) -> (i32, i32) {
    %c0_i32 = arith.constant 0 : i32
    %c0_i32_0 = arith.constant 0 : i32
    %c0_i32_1 = arith.constant 0 : i32
    return %c0_i32, %c0_i32_0 : i32, i32
  }
  func.func @transform_2(%arg0: i32, %arg1: i32) -> (i32, i32) {
    %c0_i32 = arith.constant 0 : i32
    %c0_i32_0 = arith.constant 0 : i32
    %c0_i32_1 = arith.constant 0 : i32
    return %c0_i32, %c0_i32_0 : i32, i32
  }
  func.func @transform_3(%arg0: i32, %arg1: i32) -> (i32, i32, i32) {
    %c0_i32 = arith.constant 0 : i32
    %c0_i32_0 = arith.constant 0 : i32
    return %arg0, %arg1, %c0_i32 : i32, i32, i32
  }
  func.func @transform_4(%arg0: i32, %arg1: i32) -> (i32, i32, i32) {
    %c0_i32 = arith.constant 0 : i32
    %c0_i32_0 = arith.constant 0 : i32
    %c0_i32_1 = arith.constant 0 : i32
    return %arg0, %c0_i32, %c0_i32_0 : i32, i32, i32
  }
  func.func @transform_5(%arg0: i32, %arg1: i32) -> (i32, i32, i32) {
    %c0_i32 = arith.constant 0 : i32
    %c0_i32_0 = arith.constant 0 : i32
    %c0_i32_1 = arith.constant 0 : i32
    return %arg0, %c0_i32, %c0_i32_0 : i32, i32, i32
  }
}

module attributes {stable_mosaic.version = 11 : i64} {
  func.func @norm_lrelu_kernel(%arg0: i32, %arg1: i32, %arg2: memref<1x8x8xf32, #tpu.memory_space<vmem>>, %arg3: memref<1x1x8xf32, #tpu.memory_space<vmem>>, %arg4: memref<1x1x8xf32, #tpu.memory_space<vmem>>, %arg5: memref<1x8x8xbf16, #tpu.memory_space<vmem>>) attributes {dimension_semantics = [#tpu.dimension_semantics<parallel>, #tpu.dimension_semantics<parallel>], iteration_bounds = array<i64: 2, 1>, scalar_prefetch = 0 : i64, scratch_operands = 0 : i64, tpu.core_type = #tpu.core_type<tc>, window_params = [{transform_indices = @transform_0, window_bounds = array<i64: 1, 8, 8>}, {transform_indices = @transform_1, window_bounds = array<i64: 1, 1, 8>}, {transform_indices = @transform_2, window_bounds = array<i64: 1, 1, 8>}, {transform_indices = @transform_3, window_bounds = array<i64: 1, 8, 8>}]} {
    %c0 = arith.constant 0 : index
    %c0_0 = arith.constant 0 : index
    %c0_1 = arith.constant 0 : index
    %0 = vector.load %arg2[%c0, %c0_0, %c0_1] : memref<1x8x8xf32, #tpu.memory_space<vmem>>, vector<1x8x8xf32>
    %1 = vector.shape_cast %0 : vector<1x8x8xf32> to vector<8x8xf32>
    %c0_2 = arith.constant 0 : index
    %c0_3 = arith.constant 0 : index
    %c0_4 = arith.constant 0 : index
    %2 = vector.load %arg3[%c0_2, %c0_3, %c0_4] : memref<1x1x8xf32, #tpu.memory_space<vmem>>, vector<1x1x8xf32>
    %3 = vector.shape_cast %2 : vector<1x1x8xf32> to vector<1x8xf32>
    %4 = vector.broadcast %3 : vector<1x8xf32> to vector<8x8xf32>
    %5 = arith.mulf %1, %4 : vector<8x8xf32>
    %c0_5 = arith.constant 0 : index
    %c0_6 = arith.constant 0 : index
    %c0_7 = arith.constant 0 : index
    %6 = vector.load %arg4[%c0_5, %c0_6, %c0_7] : memref<1x1x8xf32, #tpu.memory_space<vmem>>, vector<1x1x8xf32>
    %7 = vector.shape_cast %6 : vector<1x1x8xf32> to vector<1x8xf32>
    %8 = vector.broadcast %7 : vector<1x8xf32> to vector<8x8xf32>
    %9 = arith.addf %5, %8 : vector<8x8xf32>
    %cst = arith.constant 0.000000e+00 : f32
    %10 = vector.broadcast %cst : f32 to vector<8x8xf32>
    %11 = arith.cmpf oge, %9, %10 : vector<8x8xf32>
    %cst_8 = arith.constant 0.00999999977 : f32
    %12 = vector.broadcast %cst_8 : f32 to vector<8x8xf32>
    %13 = arith.mulf %12, %9 : vector<8x8xf32>
    %14 = arith.select %11, %9, %13 : vector<8x8xi1>, vector<8x8xf32>
    %15 = arith.truncf %14 : vector<8x8xf32> to vector<8x8xbf16>
    %c0_9 = arith.constant 0 : index
    %c0_10 = arith.constant 0 : index
    %c0_11 = arith.constant 0 : index
    %16 = vector.load %arg5[%c0_9, %c0_10, %c0_11] : memref<1x8x8xbf16, #tpu.memory_space<vmem>>, vector<1x8x8xbf16>
    %17 = vector.shape_cast %16 : vector<1x8x8xbf16> to vector<8x8xbf16>
    %18 = vector.shape_cast %15 : vector<8x8xbf16> to vector<1x8x8xbf16>
    tpu.vector_store %arg5[%c0_9, %c0_10, %c0_11], %18 {strides = array<i32>} : memref<1x8x8xbf16, #tpu.memory_space<vmem>>, vector<1x8x8xbf16>,
    return
  }
  func.func @transform_0(%arg0: i32, %arg1: i32) -> (i32, i32, i32) {
    %c0_i32 = arith.constant 0 : i32
    %c0_i32_0 = arith.constant 0 : i32
    return %arg0, %arg1, %c0_i32 : i32, i32, i32
  }
  func.func @transform_1(%arg0: i32, %arg1: i32) -> (i32, i32, i32) {
    %c0_i32 = arith.constant 0 : i32
    %c0_i32_0 = arith.constant 0 : i32
    %c0_i32_1 = arith.constant 0 : i32
    return %arg0, %c0_i32, %c0_i32_0 : i32, i32, i32
  }
  func.func @transform_2(%arg0: i32, %arg1: i32) -> (i32, i32, i32) {
    %c0_i32 = arith.constant 0 : i32
    %c0_i32_0 = arith.constant 0 : i32
    %c0_i32_1 = arith.constant 0 : i32
    return %arg0, %c0_i32, %c0_i32_0 : i32, i32, i32
  }
  func.func @transform_3(%arg0: i32, %arg1: i32) -> (i32, i32, i32) {
    %c0_i32 = arith.constant 0 : i32
    %c0_i32_0 = arith.constant 0 : i32
    return %arg0, %arg1, %c0_i32 : i32, i32, i32
  }
}

module attributes {stable_mosaic.version = 11 : i64} {
  func.func @gemm_stats_kernel(%arg0: i32, %arg1: i32, %arg2: memref<1x64x16xbf16, #tpu.memory_space<vmem>>, %arg3: memref<16x8xbf16, #tpu.memory_space<vmem>>, %arg4: memref<1x8xf32, #tpu.memory_space<vmem>>, %arg5: memref<1x64x8xf32, #tpu.memory_space<vmem>>, %arg6: memref<1x1x8xf32, #tpu.memory_space<vmem>>, %arg7: memref<1x1x8xf32, #tpu.memory_space<vmem>>) attributes {dimension_semantics = [#tpu.dimension_semantics<parallel>, #tpu.dimension_semantics<arbitrary>], iteration_bounds = array<i64: 2, 1>, scalar_prefetch = 0 : i64, scratch_operands = 0 : i64, tpu.core_type = #tpu.core_type<tc>, window_params = [{transform_indices = @transform_0, window_bounds = array<i64: 1, 64, 16>}, {pipeline_mode = #tpu.pipeline_mode<synchronous>, transform_indices = @transform_1, window_bounds = array<i64: 16, 8>}, {pipeline_mode = #tpu.pipeline_mode<synchronous>, transform_indices = @transform_2, window_bounds = array<i64: 1, 8>}, {transform_indices = @transform_3, window_bounds = array<i64: 1, 64, 8>}, {transform_indices = @transform_4, window_bounds = array<i64: 1, 1, 8>}, {transform_indices = @transform_5, window_bounds = array<i64: 1, 1, 8>}]} {
    %c0_i32 = arith.constant 0 : i32
    %0 = arith.cmpi eq, %arg1, %c0_i32 : i32
    %1 = arith.extui %0 : i1 to i32
    %c0_i32_0 = arith.constant 0 : i32
    %2 = arith.cmpi ne, %1, %c0_i32_0 : i32
    scf.if %2 {
      %cst_24 = arith.constant 0.000000e+00 : f32
      %26 = vector.broadcast %cst_24 : f32 to vector<1x1x8xf32>
      %c0_25 = arith.constant 0 : index
      %c0_26 = arith.constant 0 : index
      %c0_27 = arith.constant 0 : index
      %27 = vector.load %arg6[%c0_25, %c0_26, %c0_27] : memref<1x1x8xf32, #tpu.memory_space<vmem>>, vector<1x1x8xf32>
      tpu.vector_store %arg6[%c0_25, %c0_26, %c0_27], %26 {strides = array<i32>} : memref<1x1x8xf32, #tpu.memory_space<vmem>>, vector<1x1x8xf32>,
      %cst_28 = arith.constant 0.000000e+00 : f32
      %28 = vector.broadcast %cst_28 : f32 to vector<1x1x8xf32>
      %c0_29 = arith.constant 0 : index
      %c0_30 = arith.constant 0 : index
      %c0_31 = arith.constant 0 : index
      %29 = vector.load %arg7[%c0_29, %c0_30, %c0_31] : memref<1x1x8xf32, #tpu.memory_space<vmem>>, vector<1x1x8xf32>
      tpu.vector_store %arg7[%c0_29, %c0_30, %c0_31], %28 {strides = array<i32>} : memref<1x1x8xf32, #tpu.memory_space<vmem>>, vector<1x1x8xf32>,
    } else {
    }
    %c0 = arith.constant 0 : index
    %c0_1 = arith.constant 0 : index
    %c0_2 = arith.constant 0 : index
    %3 = vector.load %arg2[%c0, %c0_1, %c0_2] : memref<1x64x16xbf16, #tpu.memory_space<vmem>>, vector<1x64x16xbf16>
    %4 = vector.shape_cast %3 : vector<1x64x16xbf16> to vector<64x16xbf16>
    %c0_3 = arith.constant 0 : index
    %c0_4 = arith.constant 0 : index
    %5 = vector.load %arg3[%c0_3, %c0_4] : memref<16x8xbf16, #tpu.memory_space<vmem>>, vector<16x8xbf16>
    %cst = arith.constant dense<0.000000e+00> : vector<64x8xf32>
    %6 = tpu.matmul %4, %5, %cst {dimension_numbers = #tpu.dot_dimension_numbers<[1], [0], [0], [1], [0, 0, 1, 1], [], []>} : vector<64x16xbf16>, vector<16x8xbf16>, vector<64x8xf32> -> vector<64x8xf32>
    %c0_5 = arith.constant 0 : index
    %c0_6 = arith.constant 0 : index
    %7 = vector.load %arg4[%c0_5, %c0_6] : memref<1x8xf32, #tpu.memory_space<vmem>>, vector<1x8xf32>
    %8 = vector.broadcast %7 : vector<1x8xf32> to vector<64x8xf32>
    %9 = arith.addf %6, %8 : vector<64x8xf32>
    %c0_7 = arith.constant 0 : index
    %c0_8 = arith.constant 0 : index
    %c0_9 = arith.constant 0 : index
    %10 = vector.load %arg5[%c0_7, %c0_8, %c0_9] : memref<1x64x8xf32, #tpu.memory_space<vmem>>, vector<1x64x8xf32>
    %11 = vector.shape_cast %10 : vector<1x64x8xf32> to vector<64x8xf32>
    %12 = vector.shape_cast %9 : vector<64x8xf32> to vector<1x64x8xf32>
    tpu.vector_store %arg5[%c0_7, %c0_8, %c0_9], %12 {strides = array<i32>} : memref<1x64x8xf32, #tpu.memory_space<vmem>>, vector<1x64x8xf32>,
    %c0_10 = arith.constant 0 : index
    %c0_11 = arith.constant 0 : index
    %c0_12 = arith.constant 0 : index
    %13 = vector.load %arg6[%c0_10, %c0_11, %c0_12] : memref<1x1x8xf32, #tpu.memory_space<vmem>>, vector<1x1x8xf32>
    %cst_13 = arith.constant dense<0.000000e+00> : vector<8xf32>
    %14 = vector.multi_reduction <add>, %9, %cst_13 [0] : vector<64x8xf32> to vector<8xf32>
    %15 = vector.shape_cast %14 : vector<8xf32> to vector<1x8xf32>
    %16 = vector.shape_cast %15 : vector<1x8xf32> to vector<1x1x8xf32>
    %17 = arith.addf %13, %16 : vector<1x1x8xf32>
    %c0_14 = arith.constant 0 : index
    %c0_15 = arith.constant 0 : index
    %c0_16 = arith.constant 0 : index
    %18 = vector.load %arg6[%c0_14, %c0_15, %c0_16] : memref<1x1x8xf32, #tpu.memory_space<vmem>>, vector<1x1x8xf32>
    tpu.vector_store %arg6[%c0_14, %c0_15, %c0_16], %17 {strides = array<i32>} : memref<1x1x8xf32, #tpu.memory_space<vmem>>, vector<1x1x8xf32>,
    %c0_17 = arith.constant 0 : index
    %c0_18 = arith.constant 0 : index
    %c0_19 = arith.constant 0 : index
    %19 = vector.load %arg7[%c0_17, %c0_18, %c0_19] : memref<1x1x8xf32, #tpu.memory_space<vmem>>, vector<1x1x8xf32>
    %20 = arith.mulf %9, %9 : vector<64x8xf32>
    %cst_20 = arith.constant dense<0.000000e+00> : vector<8xf32>
    %21 = vector.multi_reduction <add>, %20, %cst_20 [0] : vector<64x8xf32> to vector<8xf32>
    %22 = vector.shape_cast %21 : vector<8xf32> to vector<1x8xf32>
    %23 = vector.shape_cast %22 : vector<1x8xf32> to vector<1x1x8xf32>
    %24 = arith.addf %19, %23 : vector<1x1x8xf32>
    %c0_21 = arith.constant 0 : index
    %c0_22 = arith.constant 0 : index
    %c0_23 = arith.constant 0 : index
    %25 = vector.load %arg7[%c0_21, %c0_22, %c0_23] : memref<1x1x8xf32, #tpu.memory_space<vmem>>, vector<1x1x8xf32>
    tpu.vector_store %arg7[%c0_21, %c0_22, %c0_23], %24 {strides = array<i32>} : memref<1x1x8xf32, #tpu.memory_space<vmem>>, vector<1x1x8xf32>,
    return
  }
  func.func @transform_0(%arg0: i32, %arg1: i32) -> (i32, i32, i32) {
    %c0_i32 = arith.constant 0 : i32
    %c0_i32_0 = arith.constant 0 : i32
    return %arg0, %arg1, %c0_i32 : i32, i32, i32
  }
  func.func @transform_1(%arg0: i32, %arg1: i32) -> (i32, i32) {
    %c0_i32 = arith.constant 0 : i32
    %c0_i32_0 = arith.constant 0 : i32
    %c0_i32_1 = arith.constant 0 : i32
    return %c0_i32, %c0_i32_0 : i32, i32
  }
  func.func @transform_2(%arg0: i32, %arg1: i32) -> (i32, i32) {
    %c0_i32 = arith.constant 0 : i32
    %c0_i32_0 = arith.constant 0 : i32
    %c0_i32_1 = arith.constant 0 : i32
    return %c0_i32, %c0_i32_0 : i32, i32
  }
  func.func @transform_3(%arg0: i32, %arg1: i32) -> (i32, i32, i32) {
    %c0_i32 = arith.constant 0 : i32
    %c0_i32_0 = arith.constant 0 : i32
    return %arg0, %arg1, %c0_i32 : i32, i32, i32
  }
  func.func @transform_4(%arg0: i32, %arg1: i32) -> (i32, i32, i32) {
    %c0_i32 = arith.constant 0 : i32
    %c0_i32_0 = arith.constant 0 : i32
    %c0_i32_1 = arith.constant 0 : i32
    return %arg0, %c0_i32, %c0_i32_0 : i32, i32, i32
  }
  func.func @transform_5(%arg0: i32, %arg1: i32) -> (i32, i32, i32) {
    %c0_i32 = arith.constant 0 : i32
    %c0_i32_0 = arith.constant 0 : i32
    %c0_i32_1 = arith.constant 0 : i32
    return %arg0, %c0_i32, %c0_i32_0 : i32, i32, i32
  }
}

module attributes {stable_mosaic.version = 11 : i64} {
  func.func @gemm_stats_kernel(%arg0: i32, %arg1: i32, %arg2: memref<1x64x32xbf16, #tpu.memory_space<vmem>>, %arg3: memref<32x8xbf16, #tpu.memory_space<vmem>>, %arg4: memref<1x8xf32, #tpu.memory_space<vmem>>, %arg5: memref<1x64x8xf32, #tpu.memory_space<vmem>>, %arg6: memref<1x1x8xf32, #tpu.memory_space<vmem>>, %arg7: memref<1x1x8xf32, #tpu.memory_space<vmem>>) attributes {dimension_semantics = [#tpu.dimension_semantics<parallel>, #tpu.dimension_semantics<arbitrary>], iteration_bounds = array<i64: 2, 1>, scalar_prefetch = 0 : i64, scratch_operands = 0 : i64, tpu.core_type = #tpu.core_type<tc>, window_params = [{transform_indices = @transform_0, window_bounds = array<i64: 1, 64, 32>}, {pipeline_mode = #tpu.pipeline_mode<synchronous>, transform_indices = @transform_1, window_bounds = array<i64: 32, 8>}, {pipeline_mode = #tpu.pipeline_mode<synchronous>, transform_indices = @transform_2, window_bounds = array<i64: 1, 8>}, {transform_indices = @transform_3, window_bounds = array<i64: 1, 64, 8>}, {transform_indices = @transform_4, window_bounds = array<i64: 1, 1, 8>}, {transform_indices = @transform_5, window_bounds = array<i64: 1, 1, 8>}]} {
    %c0_i32 = arith.constant 0 : i32
    %0 = arith.cmpi eq, %arg1, %c0_i32 : i32
    %1 = arith.extui %0 : i1 to i32
    %c0_i32_0 = arith.constant 0 : i32
    %2 = arith.cmpi ne, %1, %c0_i32_0 : i32
    scf.if %2 {
      %cst_24 = arith.constant 0.000000e+00 : f32
      %26 = vector.broadcast %cst_24 : f32 to vector<1x1x8xf32>
      %c0_25 = arith.constant 0 : index
      %c0_26 = arith.constant 0 : index
      %c0_27 = arith.constant 0 : index
      %27 = vector.load %arg6[%c0_25, %c0_26, %c0_27] : memref<1x1x8xf32, #tpu.memory_space<vmem>>, vector<1x1x8xf32>
      tpu.vector_store %arg6[%c0_25, %c0_26, %c0_27], %26 {strides = array<i32>} : memref<1x1x8xf32, #tpu.memory_space<vmem>>, vector<1x1x8xf32>,
      %cst_28 = arith.constant 0.000000e+00 : f32
      %28 = vector.broadcast %cst_28 : f32 to vector<1x1x8xf32>
      %c0_29 = arith.constant 0 : index
      %c0_30 = arith.constant 0 : index
      %c0_31 = arith.constant 0 : index
      %29 = vector.load %arg7[%c0_29, %c0_30, %c0_31] : memref<1x1x8xf32, #tpu.memory_space<vmem>>, vector<1x1x8xf32>
      tpu.vector_store %arg7[%c0_29, %c0_30, %c0_31], %28 {strides = array<i32>} : memref<1x1x8xf32, #tpu.memory_space<vmem>>, vector<1x1x8xf32>,
    } else {
    }
    %c0 = arith.constant 0 : index
    %c0_1 = arith.constant 0 : index
    %c0_2 = arith.constant 0 : index
    %3 = vector.load %arg2[%c0, %c0_1, %c0_2] : memref<1x64x32xbf16, #tpu.memory_space<vmem>>, vector<1x64x32xbf16>
    %4 = vector.shape_cast %3 : vector<1x64x32xbf16> to vector<64x32xbf16>
    %c0_3 = arith.constant 0 : index
    %c0_4 = arith.constant 0 : index
    %5 = vector.load %arg3[%c0_3, %c0_4] : memref<32x8xbf16, #tpu.memory_space<vmem>>, vector<32x8xbf16>
    %cst = arith.constant dense<0.000000e+00> : vector<64x8xf32>
    %6 = tpu.matmul %4, %5, %cst {dimension_numbers = #tpu.dot_dimension_numbers<[1], [0], [0], [1], [0, 0, 1, 1], [], []>} : vector<64x32xbf16>, vector<32x8xbf16>, vector<64x8xf32> -> vector<64x8xf32>
    %c0_5 = arith.constant 0 : index
    %c0_6 = arith.constant 0 : index
    %7 = vector.load %arg4[%c0_5, %c0_6] : memref<1x8xf32, #tpu.memory_space<vmem>>, vector<1x8xf32>
    %8 = vector.broadcast %7 : vector<1x8xf32> to vector<64x8xf32>
    %9 = arith.addf %6, %8 : vector<64x8xf32>
    %c0_7 = arith.constant 0 : index
    %c0_8 = arith.constant 0 : index
    %c0_9 = arith.constant 0 : index
    %10 = vector.load %arg5[%c0_7, %c0_8, %c0_9] : memref<1x64x8xf32, #tpu.memory_space<vmem>>, vector<1x64x8xf32>
    %11 = vector.shape_cast %10 : vector<1x64x8xf32> to vector<64x8xf32>
    %12 = vector.shape_cast %9 : vector<64x8xf32> to vector<1x64x8xf32>
    tpu.vector_store %arg5[%c0_7, %c0_8, %c0_9], %12 {strides = array<i32>} : memref<1x64x8xf32, #tpu.memory_space<vmem>>, vector<1x64x8xf32>,
    %c0_10 = arith.constant 0 : index
    %c0_11 = arith.constant 0 : index
    %c0_12 = arith.constant 0 : index
    %13 = vector.load %arg6[%c0_10, %c0_11, %c0_12] : memref<1x1x8xf32, #tpu.memory_space<vmem>>, vector<1x1x8xf32>
    %cst_13 = arith.constant dense<0.000000e+00> : vector<8xf32>
    %14 = vector.multi_reduction <add>, %9, %cst_13 [0] : vector<64x8xf32> to vector<8xf32>
    %15 = vector.shape_cast %14 : vector<8xf32> to vector<1x8xf32>
    %16 = vector.shape_cast %15 : vector<1x8xf32> to vector<1x1x8xf32>
    %17 = arith.addf %13, %16 : vector<1x1x8xf32>
    %c0_14 = arith.constant 0 : index
    %c0_15 = arith.constant 0 : index
    %c0_16 = arith.constant 0 : index
    %18 = vector.load %arg6[%c0_14, %c0_15, %c0_16] : memref<1x1x8xf32, #tpu.memory_space<vmem>>, vector<1x1x8xf32>
    tpu.vector_store %arg6[%c0_14, %c0_15, %c0_16], %17 {strides = array<i32>} : memref<1x1x8xf32, #tpu.memory_space<vmem>>, vector<1x1x8xf32>,
    %c0_17 = arith.constant 0 : index
    %c0_18 = arith.constant 0 : index
    %c0_19 = arith.constant 0 : index
    %19 = vector.load %arg7[%c0_17, %c0_18, %c0_19] : memref<1x1x8xf32, #tpu.memory_space<vmem>>, vector<1x1x8xf32>
    %20 = arith.mulf %9, %9 : vector<64x8xf32>
    %cst_20 = arith.constant dense<0.000000e+00> : vector<8xf32>
    %21 = vector.multi_reduction <add>, %20, %cst_20 [0] : vector<64x8xf32> to vector<8xf32>
    %22 = vector.shape_cast %21 : vector<8xf32> to vector<1x8xf32>
    %23 = vector.shape_cast %22 : vector<1x8xf32> to vector<1x1x8xf32>
    %24 = arith.addf %19, %23 : vector<1x1x8xf32>
    %c0_21 = arith.constant 0 : index
    %c0_22 = arith.constant 0 : index
    %c0_23 = arith.constant 0 : index
    %25 = vector.load %arg7[%c0_21, %c0_22, %c0_23] : memref<1x1x8xf32, #tpu.memory_space<vmem>>, vector<1x1x8xf32>
    tpu.vector_store %arg7[%c0_21, %c0_22, %c0_23], %24 {strides = array<i32>} : memref<1x1x8xf32, #tpu.memory_space<vmem>>, vector<1x1x8xf32>,
    return
  }
  func.func @transform_0(%arg0: i32, %arg1: i32) -> (i32, i32, i32) {
    %c0_i32 = arith.constant 0 : i32
    %c0_i32_0 = arith.constant 0 : i32
    return %arg0, %arg1, %c0_i32 : i32, i32, i32
  }
  func.func @transform_1(%arg0: i32, %arg1: i32) -> (i32, i32) {
    %c0_i32 = arith.constant 0 : i32
    %c0_i32_0 = arith.constant 0 : i32
    %c0_i32_1 = arith.constant 0 : i32
    return %c0_i32, %c0_i32_0 : i32, i32
  }
  func.func @transform_2(%arg0: i32, %arg1: i32) -> (i32, i32) {
    %c0_i32 = arith.constant 0 : i32
    %c0_i32_0 = arith.constant 0 : i32
    %c0_i32_1 = arith.constant 0 : i32
    return %c0_i32, %c0_i32_0 : i32, i32
  }
  func.func @transform_3(%arg0: i32, %arg1: i32) -> (i32, i32, i32) {
    %c0_i32 = arith.constant 0 : i32
    %c0_i32_0 = arith.constant 0 : i32
    return %arg0, %arg1, %c0_i32 : i32, i32, i32
  }
  func.func @transform_4(%arg0: i32, %arg1: i32) -> (i32, i32, i32) {
    %c0_i32 = arith.constant 0 : i32
    %c0_i32_0 = arith.constant 0 : i32
    %c0_i32_1 = arith.constant 0 : i32
    return %arg0, %c0_i32, %c0_i32_0 : i32, i32, i32
  }
  func.func @transform_5(%arg0: i32, %arg1: i32) -> (i32, i32, i32) {
    %c0_i32 = arith.constant 0 : i32
    %c0_i32_0 = arith.constant 0 : i32
    %c0_i32_1 = arith.constant 0 : i32
    return %arg0, %c0_i32, %c0_i32_0 : i32, i32, i32
  }
}

module attributes {stable_mosaic.version = 11 : i64} {
  func.func @gemm_stats_kernel(%arg0: i32, %arg1: i32, %arg2: memref<1x64x64xbf16, #tpu.memory_space<vmem>>, %arg3: memref<64x8xbf16, #tpu.memory_space<vmem>>, %arg4: memref<1x8xf32, #tpu.memory_space<vmem>>, %arg5: memref<1x64x8xf32, #tpu.memory_space<vmem>>, %arg6: memref<1x1x8xf32, #tpu.memory_space<vmem>>, %arg7: memref<1x1x8xf32, #tpu.memory_space<vmem>>) attributes {dimension_semantics = [#tpu.dimension_semantics<parallel>, #tpu.dimension_semantics<arbitrary>], iteration_bounds = array<i64: 2, 1>, scalar_prefetch = 0 : i64, scratch_operands = 0 : i64, tpu.core_type = #tpu.core_type<tc>, window_params = [{transform_indices = @transform_0, window_bounds = array<i64: 1, 64, 64>}, {pipeline_mode = #tpu.pipeline_mode<synchronous>, transform_indices = @transform_1, window_bounds = array<i64: 64, 8>}, {pipeline_mode = #tpu.pipeline_mode<synchronous>, transform_indices = @transform_2, window_bounds = array<i64: 1, 8>}, {transform_indices = @transform_3, window_bounds = array<i64: 1, 64, 8>}, {transform_indices = @transform_4, window_bounds = array<i64: 1, 1, 8>}, {transform_indices = @transform_5, window_bounds = array<i64: 1, 1, 8>}]} {
    %c0_i32 = arith.constant 0 : i32
    %0 = arith.cmpi eq, %arg1, %c0_i32 : i32
    %1 = arith.extui %0 : i1 to i32
    %c0_i32_0 = arith.constant 0 : i32
    %2 = arith.cmpi ne, %1, %c0_i32_0 : i32
    scf.if %2 {
      %cst_24 = arith.constant 0.000000e+00 : f32
      %26 = vector.broadcast %cst_24 : f32 to vector<1x1x8xf32>
      %c0_25 = arith.constant 0 : index
      %c0_26 = arith.constant 0 : index
      %c0_27 = arith.constant 0 : index
      %27 = vector.load %arg6[%c0_25, %c0_26, %c0_27] : memref<1x1x8xf32, #tpu.memory_space<vmem>>, vector<1x1x8xf32>
      tpu.vector_store %arg6[%c0_25, %c0_26, %c0_27], %26 {strides = array<i32>} : memref<1x1x8xf32, #tpu.memory_space<vmem>>, vector<1x1x8xf32>,
      %cst_28 = arith.constant 0.000000e+00 : f32
      %28 = vector.broadcast %cst_28 : f32 to vector<1x1x8xf32>
      %c0_29 = arith.constant 0 : index
      %c0_30 = arith.constant 0 : index
      %c0_31 = arith.constant 0 : index
      %29 = vector.load %arg7[%c0_29, %c0_30, %c0_31] : memref<1x1x8xf32, #tpu.memory_space<vmem>>, vector<1x1x8xf32>
      tpu.vector_store %arg7[%c0_29, %c0_30, %c0_31], %28 {strides = array<i32>} : memref<1x1x8xf32, #tpu.memory_space<vmem>>, vector<1x1x8xf32>,
    } else {
    }
    %c0 = arith.constant 0 : index
    %c0_1 = arith.constant 0 : index
    %c0_2 = arith.constant 0 : index
    %3 = vector.load %arg2[%c0, %c0_1, %c0_2] : memref<1x64x64xbf16, #tpu.memory_space<vmem>>, vector<1x64x64xbf16>
    %4 = vector.shape_cast %3 : vector<1x64x64xbf16> to vector<64x64xbf16>
    %c0_3 = arith.constant 0 : index
    %c0_4 = arith.constant 0 : index
    %5 = vector.load %arg3[%c0_3, %c0_4] : memref<64x8xbf16, #tpu.memory_space<vmem>>, vector<64x8xbf16>
    %cst = arith.constant dense<0.000000e+00> : vector<64x8xf32>
    %6 = tpu.matmul %4, %5, %cst {dimension_numbers = #tpu.dot_dimension_numbers<[1], [0], [0], [1], [0, 0, 1, 1], [], []>} : vector<64x64xbf16>, vector<64x8xbf16>, vector<64x8xf32> -> vector<64x8xf32>
    %c0_5 = arith.constant 0 : index
    %c0_6 = arith.constant 0 : index
    %7 = vector.load %arg4[%c0_5, %c0_6] : memref<1x8xf32, #tpu.memory_space<vmem>>, vector<1x8xf32>
    %8 = vector.broadcast %7 : vector<1x8xf32> to vector<64x8xf32>
    %9 = arith.addf %6, %8 : vector<64x8xf32>
    %c0_7 = arith.constant 0 : index
    %c0_8 = arith.constant 0 : index
    %c0_9 = arith.constant 0 : index
    %10 = vector.load %arg5[%c0_7, %c0_8, %c0_9] : memref<1x64x8xf32, #tpu.memory_space<vmem>>, vector<1x64x8xf32>
    %11 = vector.shape_cast %10 : vector<1x64x8xf32> to vector<64x8xf32>
    %12 = vector.shape_cast %9 : vector<64x8xf32> to vector<1x64x8xf32>
    tpu.vector_store %arg5[%c0_7, %c0_8, %c0_9], %12 {strides = array<i32>} : memref<1x64x8xf32, #tpu.memory_space<vmem>>, vector<1x64x8xf32>,
    %c0_10 = arith.constant 0 : index
    %c0_11 = arith.constant 0 : index
    %c0_12 = arith.constant 0 : index
    %13 = vector.load %arg6[%c0_10, %c0_11, %c0_12] : memref<1x1x8xf32, #tpu.memory_space<vmem>>, vector<1x1x8xf32>
    %cst_13 = arith.constant dense<0.000000e+00> : vector<8xf32>
    %14 = vector.multi_reduction <add>, %9, %cst_13 [0] : vector<64x8xf32> to vector<8xf32>
    %15 = vector.shape_cast %14 : vector<8xf32> to vector<1x8xf32>
    %16 = vector.shape_cast %15 : vector<1x8xf32> to vector<1x1x8xf32>
    %17 = arith.addf %13, %16 : vector<1x1x8xf32>
    %c0_14 = arith.constant 0 : index
    %c0_15 = arith.constant 0 : index
    %c0_16 = arith.constant 0 : index
    %18 = vector.load %arg6[%c0_14, %c0_15, %c0_16] : memref<1x1x8xf32, #tpu.memory_space<vmem>>, vector<1x1x8xf32>
    tpu.vector_store %arg6[%c0_14, %c0_15, %c0_16], %17 {strides = array<i32>} : memref<1x1x8xf32, #tpu.memory_space<vmem>>, vector<1x1x8xf32>,
    %c0_17 = arith.constant 0 : index
    %c0_18 = arith.constant 0 : index
    %c0_19 = arith.constant 0 : index
    %19 = vector.load %arg7[%c0_17, %c0_18, %c0_19] : memref<1x1x8xf32, #tpu.memory_space<vmem>>, vector<1x1x8xf32>
    %20 = arith.mulf %9, %9 : vector<64x8xf32>
    %cst_20 = arith.constant dense<0.000000e+00> : vector<8xf32>
    %21 = vector.multi_reduction <add>, %20, %cst_20 [0] : vector<64x8xf32> to vector<8xf32>
    %22 = vector.shape_cast %21 : vector<8xf32> to vector<1x8xf32>
    %23 = vector.shape_cast %22 : vector<1x8xf32> to vector<1x1x8xf32>
    %24 = arith.addf %19, %23 : vector<1x1x8xf32>
    %c0_21 = arith.constant 0 : index
    %c0_22 = arith.constant 0 : index
    %c0_23 = arith.constant 0 : index
    %25 = vector.load %arg7[%c0_21, %c0_22, %c0_23] : memref<1x1x8xf32, #tpu.memory_space<vmem>>, vector<1x1x8xf32>
    tpu.vector_store %arg7[%c0_21, %c0_22, %c0_23], %24 {strides = array<i32>} : memref<1x1x8xf32, #tpu.memory_space<vmem>>, vector<1x1x8xf32>,
    return
  }
  func.func @transform_0(%arg0: i32, %arg1: i32) -> (i32, i32, i32) {
    %c0_i32 = arith.constant 0 : i32
    %c0_i32_0 = arith.constant 0 : i32
    return %arg0, %arg1, %c0_i32 : i32, i32, i32
  }
  func.func @transform_1(%arg0: i32, %arg1: i32) -> (i32, i32) {
    %c0_i32 = arith.constant 0 : i32
    %c0_i32_0 = arith.constant 0 : i32
    %c0_i32_1 = arith.constant 0 : i32
    return %c0_i32, %c0_i32_0 : i32, i32
  }
  func.func @transform_2(%arg0: i32, %arg1: i32) -> (i32, i32) {
    %c0_i32 = arith.constant 0 : i32
    %c0_i32_0 = arith.constant 0 : i32
    %c0_i32_1 = arith.constant 0 : i32
    return %c0_i32, %c0_i32_0 : i32, i32
  }
  func.func @transform_3(%arg0: i32, %arg1: i32) -> (i32, i32, i32) {
    %c0_i32 = arith.constant 0 : i32
    %c0_i32_0 = arith.constant 0 : i32
    return %arg0, %arg1, %c0_i32 : i32, i32, i32
  }
  func.func @transform_4(%arg0: i32, %arg1: i32) -> (i32, i32, i32) {
    %c0_i32 = arith.constant 0 : i32
    %c0_i32_0 = arith.constant 0 : i32
    %c0_i32_1 = arith.constant 0 : i32
    return %arg0, %c0_i32, %c0_i32_0 : i32, i32, i32
  }
  func.func @transform_5(%arg0: i32, %arg1: i32) -> (i32, i32, i32) {
    %c0_i32 = arith.constant 0 : i32
    %c0_i32_0 = arith.constant 0 : i32
    %c0_i32_1 = arith.constant 0 : i32
    return %arg0, %c0_i32, %c0_i32_0 : i32, i32, i32
  }
}

module attributes {stable_mosaic.version = 11 : i64} {
  func.func @gemm_stats_kernel(%arg0: i32, %arg1: i32, %arg2: memref<1x64x8xbf16, #tpu.memory_space<vmem>>, %arg3: memref<8x8xbf16, #tpu.memory_space<vmem>>, %arg4: memref<1x8xf32, #tpu.memory_space<vmem>>, %arg5: memref<1x64x8xf32, #tpu.memory_space<vmem>>, %arg6: memref<1x1x8xf32, #tpu.memory_space<vmem>>, %arg7: memref<1x1x8xf32, #tpu.memory_space<vmem>>) attributes {dimension_semantics = [#tpu.dimension_semantics<parallel>, #tpu.dimension_semantics<arbitrary>], iteration_bounds = array<i64: 2, 1>, scalar_prefetch = 0 : i64, scratch_operands = 0 : i64, tpu.core_type = #tpu.core_type<tc>, window_params = [{transform_indices = @transform_0, window_bounds = array<i64: 1, 64, 8>}, {pipeline_mode = #tpu.pipeline_mode<synchronous>, transform_indices = @transform_1, window_bounds = array<i64: 8, 8>}, {pipeline_mode = #tpu.pipeline_mode<synchronous>, transform_indices = @transform_2, window_bounds = array<i64: 1, 8>}, {transform_indices = @transform_3, window_bounds = array<i64: 1, 64, 8>}, {transform_indices = @transform_4, window_bounds = array<i64: 1, 1, 8>}, {transform_indices = @transform_5, window_bounds = array<i64: 1, 1, 8>}]} {
    %c0_i32 = arith.constant 0 : i32
    %0 = arith.cmpi eq, %arg1, %c0_i32 : i32
    %1 = arith.extui %0 : i1 to i32
    %c0_i32_0 = arith.constant 0 : i32
    %2 = arith.cmpi ne, %1, %c0_i32_0 : i32
    scf.if %2 {
      %cst_24 = arith.constant 0.000000e+00 : f32
      %26 = vector.broadcast %cst_24 : f32 to vector<1x1x8xf32>
      %c0_25 = arith.constant 0 : index
      %c0_26 = arith.constant 0 : index
      %c0_27 = arith.constant 0 : index
      %27 = vector.load %arg6[%c0_25, %c0_26, %c0_27] : memref<1x1x8xf32, #tpu.memory_space<vmem>>, vector<1x1x8xf32>
      tpu.vector_store %arg6[%c0_25, %c0_26, %c0_27], %26 {strides = array<i32>} : memref<1x1x8xf32, #tpu.memory_space<vmem>>, vector<1x1x8xf32>,
      %cst_28 = arith.constant 0.000000e+00 : f32
      %28 = vector.broadcast %cst_28 : f32 to vector<1x1x8xf32>
      %c0_29 = arith.constant 0 : index
      %c0_30 = arith.constant 0 : index
      %c0_31 = arith.constant 0 : index
      %29 = vector.load %arg7[%c0_29, %c0_30, %c0_31] : memref<1x1x8xf32, #tpu.memory_space<vmem>>, vector<1x1x8xf32>
      tpu.vector_store %arg7[%c0_29, %c0_30, %c0_31], %28 {strides = array<i32>} : memref<1x1x8xf32, #tpu.memory_space<vmem>>, vector<1x1x8xf32>,
    } else {
    }
    %c0 = arith.constant 0 : index
    %c0_1 = arith.constant 0 : index
    %c0_2 = arith.constant 0 : index
    %3 = vector.load %arg2[%c0, %c0_1, %c0_2] : memref<1x64x8xbf16, #tpu.memory_space<vmem>>, vector<1x64x8xbf16>
    %4 = vector.shape_cast %3 : vector<1x64x8xbf16> to vector<64x8xbf16>
    %c0_3 = arith.constant 0 : index
    %c0_4 = arith.constant 0 : index
    %5 = vector.load %arg3[%c0_3, %c0_4] : memref<8x8xbf16, #tpu.memory_space<vmem>>, vector<8x8xbf16>
    %cst = arith.constant dense<0.000000e+00> : vector<64x8xf32>
    %6 = tpu.matmul %4, %5, %cst {dimension_numbers = #tpu.dot_dimension_numbers<[1], [0], [0], [1], [0, 0, 1, 1], [], []>} : vector<64x8xbf16>, vector<8x8xbf16>, vector<64x8xf32> -> vector<64x8xf32>
    %c0_5 = arith.constant 0 : index
    %c0_6 = arith.constant 0 : index
    %7 = vector.load %arg4[%c0_5, %c0_6] : memref<1x8xf32, #tpu.memory_space<vmem>>, vector<1x8xf32>
    %8 = vector.broadcast %7 : vector<1x8xf32> to vector<64x8xf32>
    %9 = arith.addf %6, %8 : vector<64x8xf32>
    %c0_7 = arith.constant 0 : index
    %c0_8 = arith.constant 0 : index
    %c0_9 = arith.constant 0 : index
    %10 = vector.load %arg5[%c0_7, %c0_8, %c0_9] : memref<1x64x8xf32, #tpu.memory_space<vmem>>, vector<1x64x8xf32>
    %11 = vector.shape_cast %10 : vector<1x64x8xf32> to vector<64x8xf32>
    %12 = vector.shape_cast %9 : vector<64x8xf32> to vector<1x64x8xf32>
    tpu.vector_store %arg5[%c0_7, %c0_8, %c0_9], %12 {strides = array<i32>} : memref<1x64x8xf32, #tpu.memory_space<vmem>>, vector<1x64x8xf32>,
    %c0_10 = arith.constant 0 : index
    %c0_11 = arith.constant 0 : index
    %c0_12 = arith.constant 0 : index
    %13 = vector.load %arg6[%c0_10, %c0_11, %c0_12] : memref<1x1x8xf32, #tpu.memory_space<vmem>>, vector<1x1x8xf32>
    %cst_13 = arith.constant dense<0.000000e+00> : vector<8xf32>
    %14 = vector.multi_reduction <add>, %9, %cst_13 [0] : vector<64x8xf32> to vector<8xf32>
    %15 = vector.shape_cast %14 : vector<8xf32> to vector<1x8xf32>
    %16 = vector.shape_cast %15 : vector<1x8xf32> to vector<1x1x8xf32>
    %17 = arith.addf %13, %16 : vector<1x1x8xf32>
    %c0_14 = arith.constant 0 : index
    %c0_15 = arith.constant 0 : index
    %c0_16 = arith.constant 0 : index
    %18 = vector.load %arg6[%c0_14, %c0_15, %c0_16] : memref<1x1x8xf32, #tpu.memory_space<vmem>>, vector<1x1x8xf32>
    tpu.vector_store %arg6[%c0_14, %c0_15, %c0_16], %17 {strides = array<i32>} : memref<1x1x8xf32, #tpu.memory_space<vmem>>, vector<1x1x8xf32>,
    %c0_17 = arith.constant 0 : index
    %c0_18 = arith.constant 0 : index
    %c0_19 = arith.constant 0 : index
    %19 = vector.load %arg7[%c0_17, %c0_18, %c0_19] : memref<1x1x8xf32, #tpu.memory_space<vmem>>, vector<1x1x8xf32>
    %20 = arith.mulf %9, %9 : vector<64x8xf32>
    %cst_20 = arith.constant dense<0.000000e+00> : vector<8xf32>
    %21 = vector.multi_reduction <add>, %20, %cst_20 [0] : vector<64x8xf32> to vector<8xf32>
    %22 = vector.shape_cast %21 : vector<8xf32> to vector<1x8xf32>
    %23 = vector.shape_cast %22 : vector<1x8xf32> to vector<1x1x8xf32>
    %24 = arith.addf %19, %23 : vector<1x1x8xf32>
    %c0_21 = arith.constant 0 : index
    %c0_22 = arith.constant 0 : index
    %c0_23 = arith.constant 0 : index
    %25 = vector.load %arg7[%c0_21, %c0_22, %c0_23] : memref<1x1x8xf32, #tpu.memory_space<vmem>>, vector<1x1x8xf32>
    tpu.vector_store %arg7[%c0_21, %c0_22, %c0_23], %24 {strides = array<i32>} : memref<1x1x8xf32, #tpu.memory_space<vmem>>, vector<1x1x8xf32>,
    return
  }
  func.func @transform_0(%arg0: i32, %arg1: i32) -> (i32, i32, i32) {
    %c0_i32 = arith.constant 0 : i32
    %c0_i32_0 = arith.constant 0 : i32
    return %arg0, %arg1, %c0_i32 : i32, i32, i32
  }
  func.func @transform_1(%arg0: i32, %arg1: i32) -> (i32, i32) {
    %c0_i32 = arith.constant 0 : i32
    %c0_i32_0 = arith.constant 0 : i32
    %c0_i32_1 = arith.constant 0 : i32
    return %c0_i32, %c0_i32_0 : i32, i32
  }
  func.func @transform_2(%arg0: i32, %arg1: i32) -> (i32, i32) {
    %c0_i32 = arith.constant 0 : i32
    %c0_i32_0 = arith.constant 0 : i32
    %c0_i32_1 = arith.constant 0 : i32
    return %c0_i32, %c0_i32_0 : i32, i32
  }
  func.func @transform_3(%arg0: i32, %arg1: i32) -> (i32, i32, i32) {
    %c0_i32 = arith.constant 0 : i32
    %c0_i32_0 = arith.constant 0 : i32
    return %arg0, %arg1, %c0_i32 : i32, i32, i32
  }
  func.func @transform_4(%arg0: i32, %arg1: i32) -> (i32, i32, i32) {
    %c0_i32 = arith.constant 0 : i32
    %c0_i32_0 = arith.constant 0 : i32
    %c0_i32_1 = arith.constant 0 : i32
    return %arg0, %c0_i32, %c0_i32_0 : i32, i32, i32
  }
  func.func @transform_5(%arg0: i32, %arg1: i32) -> (i32, i32, i32) {
    %c0_i32 = arith.constant 0 : i32
    %c0_i32_0 = arith.constant 0 : i32
    %c0_i32_1 = arith.constant 0 : i32
    return %arg0, %c0_i32, %c0_i32_0 : i32, i32, i32
  }
}

module attributes {stable_mosaic.version = 11 : i64} {
  func.func @gemm_bias_kernel(%arg0: i32, %arg1: i32, %arg2: memref<1x512x216xbf16, #tpu.memory_space<vmem>>, %arg3: memref<216x4xbf16, #tpu.memory_space<vmem>>, %arg4: memref<1x4xf32, #tpu.memory_space<vmem>>, %arg5: memref<1x512x4xf32, #tpu.memory_space<vmem>>) attributes {dimension_semantics = [#tpu.dimension_semantics<parallel>, #tpu.dimension_semantics<parallel>], iteration_bounds = array<i64: 2, 1>, scalar_prefetch = 0 : i64, scratch_operands = 0 : i64, tpu.core_type = #tpu.core_type<tc>, window_params = [{transform_indices = @transform_0, window_bounds = array<i64: 1, 512, 216>}, {pipeline_mode = #tpu.pipeline_mode<synchronous>, transform_indices = @transform_1, window_bounds = array<i64: 216, 4>}, {pipeline_mode = #tpu.pipeline_mode<synchronous>, transform_indices = @transform_2, window_bounds = array<i64: 1, 4>}, {transform_indices = @transform_3, window_bounds = array<i64: 1, 512, 4>}]} {
    %c0 = arith.constant 0 : index
    %c0_0 = arith.constant 0 : index
    %c0_1 = arith.constant 0 : index
    %0 = vector.load %arg2[%c0, %c0_0, %c0_1] : memref<1x512x216xbf16, #tpu.memory_space<vmem>>, vector<1x512x216xbf16>
    %1 = vector.shape_cast %0 : vector<1x512x216xbf16> to vector<512x216xbf16>
    %c0_2 = arith.constant 0 : index
    %c0_3 = arith.constant 0 : index
    %2 = vector.load %arg3[%c0_2, %c0_3] : memref<216x4xbf16, #tpu.memory_space<vmem>>, vector<216x4xbf16>
    %cst = arith.constant dense<0.000000e+00> : vector<512x4xf32>
    %3 = tpu.matmul %1, %2, %cst {dimension_numbers = #tpu.dot_dimension_numbers<[1], [0], [0], [1], [0, 0, 1, 1], [], []>} : vector<512x216xbf16>, vector<216x4xbf16>, vector<512x4xf32> -> vector<512x4xf32>
    %c0_4 = arith.constant 0 : index
    %c0_5 = arith.constant 0 : index
    %4 = vector.load %arg4[%c0_4, %c0_5] : memref<1x4xf32, #tpu.memory_space<vmem>>, vector<1x4xf32>
    %5 = vector.broadcast %4 : vector<1x4xf32> to vector<512x4xf32>
    %6 = arith.addf %3, %5 : vector<512x4xf32>
    %c0_6 = arith.constant 0 : index
    %c0_7 = arith.constant 0 : index
    %c0_8 = arith.constant 0 : index
    %7 = vector.load %arg5[%c0_6, %c0_7, %c0_8] : memref<1x512x4xf32, #tpu.memory_space<vmem>>, vector<1x512x4xf32>
    %8 = vector.shape_cast %7 : vector<1x512x4xf32> to vector<512x4xf32>
    %9 = vector.shape_cast %6 : vector<512x4xf32> to vector<1x512x4xf32>
    tpu.vector_store %arg5[%c0_6, %c0_7, %c0_8], %9 {strides = array<i32>} : memref<1x512x4xf32, #tpu.memory_space<vmem>>, vector<1x512x4xf32>,
    return
  }
  func.func @transform_0(%arg0: i32, %arg1: i32) -> (i32, i32, i32) {
    %c0_i32 = arith.constant 0 : i32
    %c0_i32_0 = arith.constant 0 : i32
    return %arg0, %arg1, %c0_i32 : i32, i32, i32
  }
  func.func @transform_1(%arg0: i32, %arg1: i32) -> (i32, i32) {
    %c0_i32 = arith.constant 0 : i32
    %c0_i32_0 = arith.constant 0 : i32
    %c0_i32_1 = arith.constant 0 : i32
    return %c0_i32, %c0_i32_0 : i32, i32
  }
  func.func @transform_2(%arg0: i32, %arg1: i32) -> (i32, i32) {
    %c0_i32 = arith.constant 0 : i32
    %c0_i32_0 = arith.constant 0 : i32
    %c0_i32_1 = arith.constant 0 : i32
    return %c0_i32, %c0_i32_0 : i32, i32
  }
  func.func @transform_3(%arg0: i32, %arg1: i32) -> (i32, i32, i32) {
    %c0_i32 = arith.constant 0 : i32
    %c0_i32_0 = arith.constant 0 : i32
    return %arg0, %arg1, %c0_i32 : i32, i32, i32
  }
}

</mosaic_0001>

<bundles_post_ra>
// kernel: infovae_forward.38
= control target key start
LH: loop header
LB: loop body
LE: loop exit
PB: predicated region body
PF: predicated region fallthrough
CT: control target
= control target key end

     0   :  { %s833_s18 = smov 0   ;;  %s835_s19 = smov 0   ;;  %s960_s0 = inlined_call_operand.vmem [shape: bf16[2,64,108], index: 0, kind: input, shape index: {}]   ;;  %s961_s1 = inlined_call_operand.vmem [shape: bf16[108,8], index: 1, kind: input, shape index: {}]   ;;  %s962_s2 = inlined_call_operand.vmem [shape: f32[1,8], index: 2, kind: input, shape index: {}]   ;;  %s963_s3 = inlined_call_operand.vmem [shape: f32[2,64,8], index: 3, kind: output, shape index: {0}]   ;;  %s964_s4 = inlined_call_operand.vmem [shape: f32[2,1,8], index: 4, kind: output, shape index: {1}]   ;;  %s965_s5 = inlined_call_operand.vmem [shape: f32[2,1,8], index: 5, kind: output, shape index: {2}]  }
   0x1   :  { %s837_s20 = smov 0  }
   0x2 LB: > { %s28_s21 = sadd.s32 1, %s796_s19  ;;  %p668_p0 = scmp.ge.s32.totalorder %s800_s20, 1  ;;  %s800_s20 = sphi %s837_s20, %s16_s20   ;;  %s796_s19 = sphi %s835_s19, %s967_s19   ;;  %s792_s18 = sphi %s833_s18, %s966_s18  }
   0x3   : > { %p30_p1 = scmp.ge.s32.totalorder %s28_s21, 2  ;;  %p213_p2 = scmp.lt.s32.totalorder %s800_s20, 3 }
   0x5   : > { %s969_s21 = smov (%p30_p1, %s28_s21), 0  ;;  %p214_p3 = pnand %p668_p0, %p213_p2 }
   0x6   : > { %v767_v0 = vld [vmem:[%s961_s1] sm:$0xff] (!%p214_p3)   ;;  %v768_v1 = vld [vmem:[%s961_s1 + $0x8] sm:$0xff] (!%p214_p3)   ;;  %p256_p4 = scmp.lt.s32.totalorder (!%p214_p3), %s792_s18, 1  ;;  %v769_v2 = vld [vmem:[%s961_s1 + $0x10] sm:$0xff] (!%p214_p3)   ;;  %vm379_vm0 = vcmask (!%p214_p3), 883712   ;;  %vm392_vm1 = vcmask (!%p214_p3), 1045504  }
   0x7   : > { %217 = sbr.rel (%p214_p3) target bundleno = 284 (0x11c), region = 32  ;;  %704 = vmatprep.subr.bf16.mxu0 (!%p214_p3), %v767_v0  ;;  %726 = vmatprep.subr.bf16.mxu1 (!%p214_p3), %v767_v0  ;;  %v770_v4 = vld [vmem:[%s961_s1 + $0x18] sm:$0xff] (!%p214_p3)   ;;  %v771_v6 = vld [vmem:[%s961_s1 + $0x20] sm:$0xff] (!%p214_p3)   ;;  %v772_v7 = vld [vmem:[%s961_s1 + $0x28] sm:$0xff] (!%p214_p3)   ;;  %vm286_vm2 = vcmask (!%p214_p3), 57344   ;;  %v802_v12 = vmov (!%p214_p3), 0.0  }
   0x8   : > { %705 = vmatpush3.bf16.msra.mxu0 (!%p214_p3), %v767_v0  ;;  %733 = vmatpush3.bf16.msra.mxu1 (!%p214_p3), %v767_v0  ;;  %v773_v8 = vld [vmem:[%s961_s1 + $0x30] sm:$0x3f] (!%p214_p3)   ;;  %v673_v13 = vld [vmem:[%s962_s2] ss:$0 sm:$0xff] (!%p214_p3)  ;;  %vm461_vm3 = vcmask (!%p214_p3), 64512  }
   0x9   : > { %706 = vmatprep.subr.bf16.mxu0 (!%p214_p3), %v768_v1  ;;  %727 = vmatprep.subr.bf16.mxu1 (!%p214_p3), %v768_v1  ;;  %v394_v9 = vsel (!%p214_p3), %vm392_vm1, %v773_v8, 0 }
   0xc   : > { %707 = vmatpush3.bf16.msra.mxu0 (!%p214_p3), %v768_v1  ;;  %734 = vmatpush3.bf16.msra.mxu1 (!%p214_p3), %v768_v1 }
   0xd   : > { %708 = vmatprep.subr.bf16.mxu0 (!%p214_p3), %v769_v2  ;;  %728 = vmatprep.subr.bf16.mxu1 (!%p214_p3), %v769_v2 }
   0xe   : > { %s971_s18 = smov (!%p256_p4, %s792_s18), 1 }
   0xf   : > { %s691_s28 = sshll.u32 %s971_s18, 5  ;;  %s892_s17 = scalar_lea.vmem %s964_s4, %s971_s18 }
  0x10   : > { %s866_s6 = scalar_lea.vmem %s960_s0, %s691_s28  ;;  %709 = vmatpush3.bf16.msra.mxu0 %v769_v2  ;;  %735 = vmatpush3.bf16.msra.mxu1 %v769_v2  ;;  %s898_s24 = scalar_lea.vmem %s965_s5, %s971_s18  ;;  %287 = vst.msk [vmem:[%s892_s17] sm:$0x1] %vm286_vm2, %v802_v12 }
  0x11   : > { %v774_v3 = vld [vmem:[%s866_s6] sm:$0xff]   ;;  %v776_v5 = vld [vmem:[%s866_s6 + $0x10] sm:$0xff]   ;;  %710 = vmatprep.subr.bf16.mxu0 %v770_v4  ;;  %729 = vmatprep.subr.bf16.mxu1 %v770_v4  ;;  %v775_v10 = vld [vmem:[%s866_s6 + $0x8] sm:$0xff]   ;;  %288 = vst.msk [vmem:[%s898_s24] sm:$0x1] %vm286_vm2, %v802_v12  ;;  %s692_s25 = sshll.u32 %s971_s18, 6 }
  0x12   : > { %718 = vmatprep.mubr.msk.bf16.mxu0 %vm379_vm0, %v774_v3  ;;  %722 = vmatprep.mubr.msk.bf16.mxu1 %vm379_vm0, %v776_v5  ;;  %v777_v11 = vld [vmem:[%s866_s6 + $0x18] sm:$0xff]   ;;  %s911_s30 = scalar_lea.vmem %s963_s3, %s692_s25 }
  0x14   : > { %711 = vmatpush3.bf16.msra.mxu0 %v770_v4  ;;  %736 = vmatpush3.bf16.msra.mxu1 %v770_v4 }
  0x15   : > { %712 = vmatprep.subr.bf16.mxu0 %v771_v6  ;;  %730 = vmatprep.subr.bf16.mxu1 %v771_v6 }
  0x18   : > { %713 = vmatpush3.bf16.msra.mxu0 %v771_v6  ;;  %737 = vmatpush3.bf16.msra.mxu1 %v771_v6 }
  0x19   : > { %714 = vmatprep.subr.bf16.mxu0 %v772_v7  ;;  %731 = vmatprep.subr.bf16.mxu1 %v772_v7 }
  0x1c   : > { %715 = vmatpush3.bf16.msra.mxu0 %v772_v7  ;;  %738 = vmatpush3.bf16.msra.mxu1 %v772_v7 }
  0x1d   : > { %740 = vmatprep.subr.msk.bf16.mxu0 %vm392_vm1, %v773_v8  ;;  %741 = vmatprep.subr.msk.bf16.mxu1 %vm392_vm1, %v773_v8 }
  0x20   : > { %717 = vmatpush3.bf16.msra.mxu0 %v394_v9  ;;  %739 = vmatpush3.bf16.msra.mxu1 %v394_v9 }
  0x23   : > { %719 = vmatmul.mubr.msk.bf16.vlgmr.msra.gmra.mrb[0].mxu0 %vm379_vm0, %v775_v10  ;;  %723 = vmatmul.mubr.msk.bf16.vlgmr.msra.gmra.mrb[0].mxu1 %vm379_vm0, %v777_v11 }
  0xf6   : > { %v720_v14 = vpop.f32.mrb[0].mxu0  ;;  %v724_v15 = vpop.f32.mrb[0].mxu1 }
  0xf7   : > { %v439_v16 = vadd.f32 %v720_v14, %v673_v13  ;;  %v430_v17 = vpop.f32.mrb[1].mxu0  ;;  %v455_v18 = vadd.f32 %v724_v15, %v673_v13  ;;  %v446_v19 = vpop.f32.mrb[1].mxu1 }
  0xf8   : > { %v431_v20 = vadd.f32 %v673_v13, %v430_v17  ;;  %v721_v21 = vpop.f32.mrb[2].mxu0  ;;  %v447_v22 = vadd.f32 %v673_v13, %v446_v19  ;;  %v725_v23 = vpop.f32.mrb[2].mxu1 }
  0xf9   : > { %464 = vst.msk [vmem:[%s911_s30 + $0x10] sm:$0xff] %vm461_vm3, %v439_v16  ;;  %v442_v24 = vadd.f32 %v721_v21, %v673_v13  ;;  %v433_v25 = vpop.f32.mrb[3].mxu0  ;;  %468 = vst.msk [vmem:[%s911_s30 + $0x30] sm:$0xff] %vm461_vm3, %v455_v18  ;;  %v449_v26 = vpop.f32.mrb[3].mxu1  ;;  %v498_v29 = vmul.f32 %v439_v16, %v439_v16  ;;  %v474_v33 = vsel %vm461_vm3, %v439_v16, 0.0  ;;  %v458_v36 = vadd.f32 %v725_v23, %v673_v13 }
  0xfa   : > { %462 = vst.msk [vmem:[%s911_s30] sm:$0xff] %vm461_vm3, %v431_v20  ;;  %v496_v27 = vmul.f32 %v431_v20, %v431_v20  ;;  %v434_v28 = vadd.f32 %v673_v13, %v433_v25  ;;  %466 = vst.msk [vmem:[%s911_s30 + $0x20] sm:$0xff] %vm461_vm3, %v447_v22  ;;  %v471_v30 = vsel %vm461_vm3, %v431_v20, 0.0  ;;  %v500_v39 = vmul.f32 %v447_v22, %v447_v22  ;;  %v495_v16 = vld [vmem:[%s898_s24] sm:$0x1] }
  0xfb   : > { %465 = vst.msk [vmem:[%s911_s30 + $0x18] sm:$0xff] %vm461_vm3, %v442_v24  ;;  %v499_v34 = vmul.f32 %v442_v24, %v442_v24  ;;  %v450_v40 = vadd.f32 %v673_v13, %v449_v26  ;;  %469 = vst.msk [vmem:[%s911_s30 + $0x38] sm:$0xff] %vm461_vm3, %v458_v36  ;;  %v507_v43 = vsel %vm461_vm3, %v498_v29, 0.0  ;;  %v476_v44 = vsel %vm461_vm3, %v442_v24, 0.0  ;;  %v470_v13 = vld [vmem:[%s892_s17] sm:$0x1] }
  0xfc   : > { %463 = vst.msk [vmem:[%s911_s30 + $0x8] sm:$0xff] %vm461_vm3, %v434_v28  ;;  %v472_v31 = vsel %vm461_vm3, %v434_v28, 0.0  ;;  %v497_v32 = vmul.f32 %v434_v28, %v434_v28  ;;  %v504_v37 = vsel %vm461_vm3, %v496_v27, 0.0  ;;  %v478_v45 = vsel %vm461_vm3, %v447_v22, 0.0 }
  0xfd   : > { %v473_v35 = vadd.f32 %v472_v31, %v471_v30  ;;  %467 = vst.msk [vmem:[%s911_s30 + $0x28] sm:$0xff] %vm461_vm3, %v450_v40  ;;  %v509_v48 = vsel %vm461_vm3, %v499_v34, 0.0  ;;  %v511_v49 = vsel %vm461_vm3, %v500_v39, 0.0  ;;  %v501_v50 = vmul.f32 %v450_v40, %v450_v40 }
  0xfe   : > { %v505_v38 = vsel %vm461_vm3, %v497_v32, 0.0  ;;  %v502_v53 = vmul.f32 %v455_v18, %v455_v18  ;;  %v480_v54 = vsel %vm461_vm3, %v450_v40, 0.0  ;;  %v482_v57 = vsel %vm461_vm3, %v455_v18, 0.0 }
  0xff   : > { %v475_v41 = vadd.f32 %v474_v33, %v473_v35  ;;  %v506_v42 = vadd.f32 %v505_v38, %v504_v37  ;;  %v503_v58 = vmul.f32 %v458_v36, %v458_v36  ;;  %v513_v59 = vsel %vm461_vm3, %v501_v50, 0.0 }
 0x100   : > { %v515_v62 = vsel %vm461_vm3, %v502_v53, 0.0  ;;  %v484_v63 = vsel %vm461_vm3, %v458_v36, 0.0 }
 0x101   : > { %v508_v46 = vadd.f32 %v507_v43, %v506_v42  ;;  %v477_v47 = vadd.f32 %v476_v44, %v475_v41  ;;  %v517_v2 = vsel %vm461_vm3, %v503_v58, 0.0 }
 0x103   : > { %v479_v51 = vadd.f32 %v478_v45, %v477_v47  ;;  %v510_v52 = vadd.f32 %v509_v48, %v508_v46 }
 0x105   : > { %v512_v55 = vadd.f32 %v511_v49, %v510_v52  ;;  %v481_v56 = vadd.f32 %v480_v54, %v479_v51 }
 0x107   : > { %v483_v60 = vadd.f32 %v482_v57, %v481_v56  ;;  %v514_v61 = vadd.f32 %v513_v59, %v512_v55 }
 0x109   : > { %v485_v0 = vadd.f32 %v484_v63, %v483_v60  ;;  %v516_v1 = vadd.f32 %v515_v62, %v514_v61 }
 0x10b   : > { %v486_v3 = vrot.slane %v485_v0, 4  ;;  %v518_v4 = vadd.f32 %v517_v2, %v516_v1 }
 0x10d   : > { %v487_v5 = vadd.f32 %v486_v3, %v485_v0  ;;  %v519_v6 = vrot.slane %v518_v4, 4 }
 0x10f   : > { %v488_v7 = vrot.slane %v487_v5, 2  ;;  %v520_v8 = vadd.f32 %v519_v6, %v518_v4 }
 0x111   : > { %v489_v9 = vadd.f32 %v488_v7, %v487_v5  ;;  %v521_v10 = vrot.slane %v520_v8, 2 }
 0x113   : > { %v490_v11 = vrot.slane %v489_v9, 1  ;;  %v522_v12 = vadd.f32 %v521_v10, %v520_v8 }
 0x115   : > { %v491_v14 = vadd.f32 %v490_v11, %v489_v9  ;;  %v523_v15 = vrot.slane %v522_v12, 1 }
 0x117   : > { %v492_v17 = vadd.f32 %v491_v14, %v470_v13  ;;  %v524_v18 = vadd.f32 %v523_v15, %v522_v12 }
 0x119   : > { %494 = vst.msk [vmem:[%s892_s17] sm:$0x1] %vm286_vm2, %v492_v17  ;;  %v525_v19 = vadd.f32 %v524_v18, %v495_v16 }
 0x11b   : > { %526 = vst.msk [vmem:[%s898_s24] sm:$0x1] %vm286_vm2, %v525_v19 }
 0x11c PF: > { %s16_s20 = sadd.s32 1, %s800_s20   ;;  %s966_s18 = smov %s796_s19 }
 0x11d   : > { %p13_p5 = scmp.ge.s32.totalorder %s16_s20, 4   ;;  %s967_s19 = smov %s969_s21 }
 0x11f   :  { %15 = sbr.rel (!%p13_p5) target bundleno = 2 (0x2), region = 90 }

// kernel: infovae_forward.39
= control target key start
LH: loop header
LB: loop body
LE: loop exit
PB: predicated region body
PF: predicated region fallthrough
CT: control target
= control target key end

     0   :  { %s545_s12 = smov 0   ;;  %s547_s13 = smov 0   ;;  %s608_s0 = inlined_call_operand.vmem [shape: f32[2,64,8], index: 0, kind: input, shape index: {}]   ;;  %s609_s1 = inlined_call_operand.vmem [shape: f32[2,1,8], index: 1, kind: input, shape index: {}]   ;;  %s610_s2 = inlined_call_operand.vmem [shape: f32[2,1,8], index: 2, kind: input, shape index: {}]   ;;  %s611_s3 = inlined_call_operand.vmem [shape: bf16[2,64,8], index: 3, kind: output, shape index: {}]  }
   0x1   :  { %s549_s14 = smov 0  }
   0x2 LB: > { %s25_s15 = sadd.s32 1, %s519_s13  ;;  %p450_p0 = scmp.ge.s32.totalorder %s523_s14, 1  ;;  %s523_s14 = sphi %s549_s14, %s13_s14   ;;  %s519_s13 = sphi %s547_s13, %s613_s13   ;;  %s515_s12 = sphi %s545_s12, %s612_s12  }
   0x3   : > { %p27_p1 = scmp.ge.s32.totalorder %s25_s15, 2  ;;  %p174_p2 = scmp.lt.s32.totalorder %s523_s14, 3 }
   0x5   : > { %s615_s15 = smov (%p27_p1, %s25_s15), 0  ;;  %p175_p3 = pnand %p450_p0, %p174_p2 }
   0x6   : > { %p213_p4 = scmp.lt.s32.totalorder (!%p175_p3), %s515_s12, 1  ;;  %vm332_vm0 = vcmask (!%p175_p3), 60416  }
   0x7   : > { %178 = sbr.rel (%p175_p3) target bundleno = 36 (0x24), region = 32 }
   0xe   : > { %s617_s12 = smov (!%p213_p4, %s515_s12), 1 }
   0xf   : > { %s467_s16 = sshll.u32 %s617_s12, 6  ;;  %s224_s19 = scalar_lea.vmem %s609_s1, %s617_s12 }
  0x10   : > { %s220_s22 = scalar_lea.vmem %s608_s0, %s467_s16  ;;  %s227_s25 = scalar_lea.vmem %s610_s2, %s617_s12  ;;  %v455_v0 = vld [vmem:[%s224_s19] ss:$0 sm:$0xff] }
  0x11   : > { %v238_v1 = vld [vmem:[%s220_s22] sm:$0xff]  ;;  %v239_v3 = vld [vmem:[%s220_s22 + $0x8] sm:$0xff]  ;;  %v240_v6 = vld [vmem:[%s220_s22 + $0x10] sm:$0xff]  ;;  %s468_s26 = sshll.u32 %s617_s12, 5 }
  0x12   : > { %v456_v2 = vld [vmem:[%s227_s25] ss:$0 sm:$0xff]  ;;  %v253_v4 = vmul.f32 %v455_v0, %v238_v1  ;;  %v254_v5 = vmul.f32 %v455_v0, %v239_v3  ;;  %v241_v7 = vld [vmem:[%s220_s22 + $0x18] sm:$0xff]  ;;  %v255_v9 = vmul.f32 %v455_v0, %v240_v6  ;;  %v243_v12 = vld [vmem:[%s220_s22 + $0x28] sm:$0xff]  ;;  %s581_s29 = scalar_lea.vmem %s611_s3, %s468_s26 }
  0x13   : > { %v242_v8 = vld [vmem:[%s220_s22 + $0x20] sm:$0xff]  ;;  %v256_v10 = vmul.f32 %v455_v0, %v241_v7  ;;  %v244_v13 = vld [vmem:[%s220_s22 + $0x30] sm:$0xff]  ;;  %v245_v14 = vld [vmem:[%s220_s22 + $0x38] sm:$0xff]  ;;  %v258_v17 = vmul.f32 %v455_v0, %v243_v12 }
  0x14   : > { %v257_v11 = vmul.f32 %v455_v0, %v242_v8  ;;  %v268_v15 = vadd.f32 %v456_v2, %v253_v4  ;;  %v269_v16 = vadd.f32 %v456_v2, %v254_v5  ;;  %v259_v18 = vmul.f32 %v455_v0, %v244_v13 }
  0x15   : > { %v270_v19 = vadd.f32 %v456_v2, %v255_v9  ;;  %v271_v20 = vadd.f32 %v456_v2, %v256_v10  ;;  %v260_v22 = vmul.f32 %v455_v0, %v245_v14  ;;  %v273_v37 = vadd.f32 %v456_v2, %v258_v17 }
  0x16   : > { %v272_v21 = vadd.f32 %v456_v2, %v257_v11  ;;  %vm276_vm1 = vcmp.ge.f32.partialorder %v268_v15, 0.0  ;;  %v284_v23 = vmul.f32 0.01, %v268_v15  ;;  %vm277_vm2 = vcmp.ge.f32.partialorder %v269_v16, 0.0 }
  0x17   : > { %v285_v24 = vmul.f32 0.01, %v269_v16  ;;  %vm278_vm3 = vcmp.ge.f32.partialorder %v270_v19, 0.0  ;;  %v286_v25 = vmul.f32 0.01, %v270_v19  ;;  %vm279_vm4 = vcmp.ge.f32.partialorder %v271_v20, 0.0 }
  0x18   : > { %v287_v26 = vmul.f32 0.01, %v271_v20  ;;  %v292_v27 = vsel %vm276_vm1, %v268_v15, %v284_v23  ;;  %vm280_vm5 = vcmp.ge.f32.partialorder %v272_v21, 0.0  ;;  %v288_v29 = vmul.f32 0.01, %v272_v21 }
  0x19   : > { %v293_v28 = vsel %vm277_vm2, %v269_v16, %v285_v24  ;;  %v469_v30 = vpack.c.bf16 %v292_v27, %v292_v27  ;;  %v294_v32 = vsel %vm278_vm3, %v270_v19, %v286_v25  ;;  %v274_v39 = vadd.f32 %v456_v2, %v259_v18 }
  0x1a   : > { %v470_v31 = vpack.c.bf16 %v293_v28, %v293_v28  ;;  %v295_v33 = vsel %vm279_vm4, %v271_v20, %v287_v26  ;;  %v471_v34 = vpack.c.bf16 %v294_v32, %v294_v32  ;;  %v296_v36 = vsel %vm280_vm5, %v272_v21, %v288_v29 }
  0x1b   : > { %v472_v35 = vpack.c.bf16 %v295_v33, %v295_v33  ;;  %333 = vst.msk [vmem:[%s581_s29] sm:$0xf] %vm332_vm0, %v469_v30  ;;  %v473_v38 = vpack.c.bf16 %v296_v36, %v296_v36  ;;  %v275_v40 = vadd.f32 %v456_v2, %v260_v22  ;;  %vm281_vm6 = vcmp.ge.f32.partialorder %v273_v37, 0.0 }
  0x1c   : > { %334 = vst.msk [vmem:[%s581_s29 + $0x4] sm:$0xf] %vm332_vm0, %v470_v31  ;;  %335 = vst.msk [vmem:[%s581_s29 + $0x8] sm:$0xf] %vm332_vm0, %v471_v34  ;;  %v289_v41 = vmul.f32 0.01, %v273_v37 }
  0x1d   : > { %336 = vst.msk [vmem:[%s581_s29 + $0xc] sm:$0xf] %vm332_vm0, %v472_v35  ;;  %337 = vst.msk [vmem:[%s581_s29 + $0x10] sm:$0xf] %vm332_vm0, %v473_v38  ;;  %vm282_vm7 = vcmp.ge.f32.partialorder %v274_v39, 0.0  ;;  %vm283_vm8 = vcmp.ge.f32.partialorder %v275_v40, 0.0 }
  0x1e   : > { %v290_v42 = vmul.f32 0.01, %v274_v39  ;;  %v291_v43 = vmul.f32 0.01, %v275_v40  ;;  %v297_v44 = vsel %vm281_vm6, %v273_v37, %v289_v41 }
  0x1f   : > { %v474_v45 = vpack.c.bf16 %v297_v44, %v297_v44 }
  0x20   : > { %v298_v46 = vsel %vm282_vm7, %v274_v39, %v290_v42  ;;  %v299_v47 = vsel %vm283_vm8, %v275_v40, %v291_v43 }
  0x21   : > { %v475_v48 = vpack.c.bf16 %v298_v46, %v298_v46  ;;  %v476_v49 = vpack.c.bf16 %v299_v47, %v299_v47  ;;  %338 = vst.msk [vmem:[%s581_s29 + $0x14] sm:$0xf] %vm332_vm0, %v474_v45 }
  0x23   : > { %339 = vst.msk [vmem:[%s581_s29 + $0x18] sm:$0xf] %vm332_vm0, %v475_v48  ;;  %340 = vst.msk [vmem:[%s581_s29 + $0x1c] sm:$0xf] %vm332_vm0, %v476_v49 }
  0x24 PF: > { %s13_s14 = sadd.s32 1, %s523_s14   ;;  %s612_s12 = smov %s519_s13 }
  0x25   : > { %p10_p5 = scmp.ge.s32.totalorder %s13_s14, 4   ;;  %s613_s13 = smov %s615_s15 }
  0x27   :  { %12 = sbr.rel (!%p10_p5) target bundleno = 2 (0x2), region = 68 }

// kernel: infovae_forward.40
= control target key start
LH: loop header
LB: loop body
LE: loop exit
PB: predicated region body
PF: predicated region fallthrough
CT: control target
= control target key end

     0   :  { %s733_s18 = smov 0   ;;  %s735_s19 = smov 0   ;;  %s840_s0 = inlined_call_operand.vmem [shape: bf16[2,8,216], index: 0, kind: input, shape index: {}]   ;;  %s841_s1 = inlined_call_operand.vmem [shape: bf16[216,16], index: 1, kind: input, shape index: {}]   ;;  %s842_s2 = inlined_call_operand.vmem [shape: f32[1,16], index: 2, kind: input, shape index: {}]   ;;  %s843_s3 = inlined_call_operand.vmem [shape: f32[2,8,16], index: 3, kind: output, shape index: {0}]   ;;  %s844_s4 = inlined_call_operand.vmem [shape: f32[2,1,16], index: 4, kind: output, shape index: {1}]   ;;  %s845_s5 = inlined_call_operand.vmem [shape: f32[2,1,16], index: 5, kind: output, shape index: {2}]  }
   0x1   :  { %s737_s20 = smov 0  }
   0x2 LB: > { %s28_s21 = sadd.s32 1, %s695_s19  ;;  %p610_p0 = scmp.ge.s32.totalorder %s699_s20, 1  ;;  %s699_s20 = sphi %s737_s20, %s16_s20   ;;  %s695_s19 = sphi %s735_s19, %s847_s19   ;;  %s691_s18 = sphi %s733_s18, %s846_s18  }
   0x3   : > { %p30_p1 = scmp.ge.s32.totalorder %s28_s21, 2  ;;  %p212_p2 = scmp.lt.s32.totalorder %s699_s20, 3 }
   0x5   : > { %s849_s21 = smov (%p30_p1, %s28_s21), 0  ;;  %p213_p3 = pnand %p610_p0, %p212_p2 }
   0x6   : > { %v661_v0 = vld [vmem:[%s841_s1] sm:$0xff] (!%p213_p3)   ;;  %v701_v1 = vmov (!%p213_p3), 0   ;;  %v662_v2 = vld [vmem:[%s841_s1 + $0x8] sm:$0xff] (!%p213_p3)   ;;  %p252_p4 = scmp.lt.s32.totalorder (!%p213_p3), %s691_s18, 1  ;;  %vm279_vm0 = vcmask (!%p213_p3), 122880   ;;  %v663_v3 = vld [vmem:[%s841_s1 + $0x10] sm:$0xff] (!%p213_p3)  }
   0x7   : > { %216 = sbr.rel (%p213_p3) target bundleno = 295 (0x127), region = 32  ;;  %412 = vmatprep.subr.bf16.mxu0 (!%p213_p3), %v701_v1  ;;  %v702_v4 = vmov (!%p213_p3), 0.0   ;;  %v664_v5 = vld [vmem:[%s841_s1 + $0x18] sm:$0xff] (!%p213_p3)   ;;  %vm404_vm1 = vcmask (!%p213_p3), 719872   ;;  %v665_v7 = vld [vmem:[%s841_s1 + $0x20] sm:$0xff] (!%p213_p3)   ;;  %v666_v9 = vld [vmem:[%s841_s1 + $0x28] sm:$0xff] (!%p213_p3)  }
   0x8   : > { %413 = vmatpush1.bf16.msra.mxu0 (!%p213_p3), %v661_v0  ;;  %v667_v10 = vld [vmem:[%s841_s1 + $0x30] sm:$0xff] (!%p213_p3)   ;;  %v668_v11 = vld [vmem:[%s841_s1 + $0x38] sm:$0xff] (!%p213_p3)   ;;  %v669_v12 = vld [vmem:[%s841_s1 + $0x40] sm:$0xff] (!%p213_p3)   ;;  %vm408_vm2 = vcmask (!%p213_p3), 1043456   ;;  %vm452_vm3 = vcmask (!%p213_p3), 130048  }
   0x9   : > { %414 = vmatprep.subr.bf16.mxu0 (!%p213_p3), %v701_v1  ;;  %v670_v13 = vld [vmem:[%s841_s1 + $0x48] sm:$0xff] (!%p213_p3)   ;;  %v671_v14 = vld [vmem:[%s841_s1 + $0x50] sm:$0xff] (!%p213_p3)   ;;  %v672_v15 = vld [vmem:[%s841_s1 + $0x58] sm:$0xff] (!%p213_p3)  }
   0xa   : > { %v673_v16 = vld [vmem:[%s841_s1 + $0x60] sm:$0xff] (!%p213_p3)   ;;  %v674_v17 = vld [vmem:[%s841_s1 + $0x68] ss:$0 sps:$4 sm:$0xff] (!%p213_p3)  }
   0xb   : > { %v410_v18 = vsel (!%p213_p3), %vm408_vm2, %v674_v17, 0  ;;  %v614_v20 = vld [vmem:[%s842_s2] ss:$0 sm:$0xff] (!%p213_p3) }
   0xc   : > { %415 = vmatpush1.bf16.msra.mxu0 (!%p213_p3), %v662_v2 }
   0xd   : > { %416 = vmatprep.subr.bf16.mxu0 (!%p213_p3), %v701_v1 }
   0xe   : > { %s851_s18 = smov (!%p252_p4, %s691_s18), 1 }
   0xf   : > { %s766_s30 = scalar_lea.vmem %s844_s4, %s851_s18  ;;  %s634_s6 = sshll.u32 %s851_s18, 3 }
  0x10   : > { %280 = vst.msk [vmem:[%s766_s30] sm:$0x1] %vm279_vm0, %v702_v4  ;;  %s775_s9 = scalar_lea.vmem %s845_s5, %s851_s18  ;;  %417 = vmatpush1.bf16.msra.mxu0 %v663_v3  ;;  %s260_s14 = scalar_lea.vmem %s840_s0, %s634_s6 }
  0x11   : > { %281 = vst.msk [vmem:[%s775_s9] sm:$0x1] %vm279_vm0, %v702_v4  ;;  %418 = vmatprep.subr.bf16.mxu0 %v701_v1  ;;  %v282_v6 = vld [vmem:[%s260_s14] sm:$0xff]  ;;  %s267_s25 = scalar_lea.vmem %s843_s3, %s634_s6 }
  0x12   : > { %v616_v8 = vcombine.high %v282_v6, %v282_v6  ;;  %v615_v19 = vcombine.low %v282_v6, %v282_v6 }
  0x14   : > { %419 = vmatpush1.bf16.msra.mxu0 %v664_v5  ;;  %631 = vmatprep.mubr.msk.bf16.mxu0 %vm404_vm1, %v616_v8 }
  0x15   : > { %420 = vmatprep.subr.bf16.mxu0 %v701_v1 }
  0x17   : > { %v454_v38 = vld [vmem:[%s766_s30] sm:$0x1] }
  0x18   : > { %421 = vmatpush1.bf16.msra.mxu0 %v665_v7  ;;  %v465_v41 = vld [vmem:[%s775_s9] sm:$0x1] }
  0x19   : > { %422 = vmatprep.subr.bf16.mxu0 %v701_v1 }
  0x1c   : > { %423 = vmatpush1.bf16.msra.mxu0 %v666_v9 }
  0x1d   : > { %424 = vmatprep.subr.bf16.mxu0 %v701_v1 }
  0x20   : > { %425 = vmatpush1.bf16.msra.mxu0 %v667_v10 }
  0x21   : > { %426 = vmatprep.subr.bf16.mxu0 %v701_v1 }
  0x24   : > { %427 = vmatpush1.bf16.msra.mxu0 %v668_v11 }
  0x25   : > { %428 = vmatprep.subr.bf16.mxu0 %v701_v1 }
  0x28   : > { %429 = vmatpush1.bf16.msra.mxu0 %v669_v12 }
  0x29   : > { %430 = vmatprep.subr.bf16.mxu0 %v701_v1 }
  0x2c   : > { %431 = vmatpush1.bf16.msra.mxu0 %v670_v13 }
  0x2d   : > { %432 = vmatprep.subr.bf16.mxu0 %v701_v1 }
  0x30   : > { %433 = vmatpush1.bf16.msra.mxu0 %v671_v14 }
  0x31   : > { %434 = vmatprep.subr.bf16.mxu0 %v701_v1 }
  0x34   : > { %435 = vmatpush1.bf16.msra.mxu0 %v672_v15 }
  0x35   : > { %436 = vmatprep.subr.bf16.mxu0 %v701_v1 }
  0x38   : > { %437 = vmatpush1.bf16.msra.mxu0 %v673_v16 }
  0x39   : > { %438 = vmatprep.subr.bf16.mxu0 %v701_v1 }
  0x3c   : > { %439 = vmatpush1.bf16.msra.mxu0 %v410_v18 }
  0x3f   : > { %445 = vmatmul.mubr.bf16.vlgmr.msra.gmra.mrb[0].mxu0 %v615_v19 }
 0x112   : > { %v446_v21 = vpop.f32.mrb[0].mxu0 }
 0x113   : > { %v447_v22 = vadd.f32 %v614_v20, %v446_v21  ;;  %v448_v23 = vpop.f32.mrb[1].mxu0 }
 0x114   : > { %v449_v24 = vpop.f32.mrb[2].mxu0 }
 0x115   : > { %453 = vst.msk [vmem:[%s267_s25] sm:$0xff] %vm452_vm3, %v447_v22  ;;  %v455_v25 = vsel %vm452_vm3, %v447_v22, 0.0  ;;  %v466_v26 = vmul.f32 %v447_v22, %v447_v22  ;;  %v450_v27 = vpop.f32.mrb[3].mxu0 }
 0x116   : > { %v456_v28 = vrot.slane %v455_v25, 4 }
 0x117   : > { %v467_v29 = vsel %vm452_vm3, %v466_v26, 0.0 }
 0x118   : > { %v457_v30 = vadd.f32 %v456_v28, %v455_v25  ;;  %v468_v31 = vrot.slane %v467_v29, 4 }
 0x11a   : > { %v458_v32 = vrot.slane %v457_v30, 2  ;;  %v469_v33 = vadd.f32 %v468_v31, %v467_v29 }
 0x11c   : > { %v459_v34 = vadd.f32 %v458_v32, %v457_v30  ;;  %v470_v35 = vrot.slane %v469_v33, 2 }
 0x11e   : > { %v460_v36 = vrot.slane %v459_v34, 1  ;;  %v471_v37 = vadd.f32 %v470_v35, %v469_v33 }
 0x120   : > { %v461_v39 = vadd.f32 %v460_v36, %v459_v34  ;;  %v472_v40 = vrot.slane %v471_v37, 1 }
 0x122   : > { %v462_v42 = vadd.f32 %v461_v39, %v454_v38  ;;  %v473_v43 = vadd.f32 %v472_v40, %v471_v37 }
 0x124   : > { %464 = vst.msk [vmem:[%s766_s30] sm:$0x1] %vm279_vm0, %v462_v42  ;;  %v474_v44 = vadd.f32 %v473_v43, %v465_v41 }
 0x126   : > { %475 = vst.msk [vmem:[%s775_s9] sm:$0x1] %vm279_vm0, %v474_v44 }
 0x127 PF: > { %s16_s20 = sadd.s32 1, %s699_s20   ;;  %s846_s18 = smov %s695_s19 }
 0x128   : > { %p13_p5 = scmp.ge.s32.totalorder %s16_s20, 4   ;;  %s847_s19 = smov %s849_s21 }
 0x12a   :  { %15 = sbr.rel (!%p13_p5) target bundleno = 2 (0x2), region = 90 }

// kernel: infovae_forward.41
= control target key start
LH: loop header
LB: loop body
LE: loop exit
PB: predicated region body
PF: predicated region fallthrough
CT: control target
= control target key end

     0   :  { %s419_s12 = smov 0   ;;  %s421_s13 = smov 0   ;;  %s455_s0 = inlined_call_operand.vmem [shape: f32[2,8,16], index: 0, kind: input, shape index: {}]   ;;  %s456_s1 = inlined_call_operand.vmem [shape: f32[2,1,16], index: 1, kind: input, shape index: {}]   ;;  %s457_s2 = inlined_call_operand.vmem [shape: f32[2,1,16], index: 2, kind: input, shape index: {}]   ;;  %s458_s3 = inlined_call_operand.vmem [shape: bf16[2,8,16], index: 3, kind: output, shape index: {}]  }
   0x1   :  { %s423_s14 = smov 0  }
   0x2 LB: > { %s25_s15 = sadd.s32 1, %s393_s13  ;;  %p344_p0 = scmp.ge.s32.totalorder %s397_s14, 1  ;;  %s397_s14 = sphi %s423_s14, %s13_s14   ;;  %s393_s13 = sphi %s421_s13, %s460_s13   ;;  %s389_s12 = sphi %s419_s12, %s459_s12  }
   0x3   : > { %p27_p1 = scmp.ge.s32.totalorder %s25_s15, 2  ;;  %p171_p2 = scmp.lt.s32.totalorder %s397_s14, 3 }
   0x5   : > { %s462_s15 = smov (%p27_p1, %s25_s15), 0  ;;  %p172_p3 = pnand %p344_p0, %p171_p2 }
   0x6   : > { %p205_p4 = scmp.lt.s32.totalorder (!%p172_p3), %s389_s12, 1  ;;  %vm246_vm1 = vcmask (!%p172_p3), 125952  }
   0x7   : > { %175 = sbr.rel (%p172_p3) target bundleno = 28 (0x1c), region = 32 }
   0xe   : > { %s464_s12 = smov (!%p205_p4, %s389_s12), 1 }
   0xf   : > { %s345_s16 = sshll.u32 %s464_s12, 3  ;;  %s214_s19 = scalar_lea.vmem %s456_s1, %s464_s12 }
  0x10   : > { %s211_s22 = scalar_lea.vmem %s455_s0, %s345_s16  ;;  %s217_s25 = scalar_lea.vmem %s457_s2, %s464_s12  ;;  %v347_v0 = vld [vmem:[%s214_s19] ss:$0 sm:$0xff] }
  0x11   : > { %v225_v1 = vld [vmem:[%s211_s22] sm:$0xff]  ;;  %s346_s26 = sshll.u32 %s464_s12, 2 }
  0x12   : > { %v348_v2 = vld [vmem:[%s217_s25] ss:$0 sm:$0xff]  ;;  %v233_v3 = vmul.f32 %v347_v0, %v225_v1  ;;  %s224_s29 = scalar_lea.vmem %s458_s3, %s346_s26 }
  0x14   : > { %v241_v4 = vadd.f32 %v348_v2, %v233_v3 }
  0x16   : > { %vm242_vm0 = vcmp.ge.f32.partialorder %v241_v4, 0.0  ;;  %v243_v5 = vmul.f32 0.01, %v241_v4 }
  0x18   : > { %v244_v6 = vsel %vm242_vm0, %v241_v4, %v243_v5 }
  0x19   : > { %v245_v7 = vpack.c.bf16 %v244_v6, %v244_v6 }
  0x1b   : > { %247 = vst.msk [vmem:[%s224_s29] sm:$0xf] %vm246_vm1, %v245_v7 }
  0x1c PF: > { %s13_s14 = sadd.s32 1, %s397_s14   ;;  %s459_s12 = smov %s393_s13 }
  0x1d   : > { %p10_p5 = scmp.ge.s32.totalorder %s13_s14, 4   ;;  %s460_s13 = smov %s462_s15 }
  0x1f   :  { %12 = sbr.rel (!%p10_p5) target bundleno = 2 (0x2), region = 68 }

// kernel: infovae_forward.42
= control target key start
LH: loop header
LB: loop body
LE: loop exit
PB: predicated region body
PF: predicated region fallthrough
CT: control target
= control target key end

     0   :  { %17 = vsyncpa [#allocation3], 0  ;;  %v551_v1 = vmov 0.0   ;;  %vm552_vm0 = vmmov 0   ;;  %s727_s0 = inlined_call_operand.vmem [shape: bf16[2,128], index: 0, kind: input, shape index: {}]   ;;  %s728_s1 = inlined_call_operand.vmem [shape: bf16[128,8], index: 1, kind: input, shape index: {}]   ;;  %s729_s2 = inlined_call_operand.vmem [shape: f32[1,8], index: 2, kind: input, shape index: {}]   ;;  %s730_s3 = inlined_call_operand.vmem [shape: bf16[128,8], index: 3, kind: input, shape index: {}]   ;;  %s731_s4 = inlined_call_operand.vmem [shape: f32[1,8], index: 4, kind: input, shape index: {}]   ;;  %s732_s5 = inlined_call_operand.vmem [shape: f32[2,8], index: 5, kind: input, shape index: {}]   ;;  %s733_s6 = inlined_call_operand.vmem [shape: bf16[8,128], index: 6, kind: input, shape index: {}]   ;;  %s734_s7 = inlined_call_operand.vmem [shape: f32[1,128], index: 7, kind: input, shape index: {}]   ;;  %s735_s8 = inlined_call_operand.hbm [shape: f32[2,8], index: 8, kind: output, shape index: {0}]   ;;  %s736_s9 = inlined_call_operand.hbm [shape: f32[2,8], index: 9, kind: output, shape index: {1}]   ;;  %s737_s10 = inlined_call_operand.hbm [shape: f32[2,8], index: 10, kind: output, shape index: {2}]   ;;  %s738_s11 = inlined_call_operand.vmem [shape: f32[2,128], index: 11, kind: output, shape index: {3}]  }
   0x1   :  { %v463_v0 = vld [vmem:[%s730_s3] sm:$0xff]   ;;  %432 = vmatprep.subr.bf16.mxu1 %v551_v1  ;;  %412 = vmatprep.subr.bf16.mxu0 %v551_v1  ;;  %v464_v2 = vld [vmem:[%s730_s3 + $0x8] sm:$0xff]   ;;  %v465_v4 = vld [vmem:[%s730_s3 + $0x10] sm:$0xff]  }
   0x2   :  { %433 = vmatpush3.bf16.msra.mxu1 %v463_v0  ;;  %448 = vmatprep.mubr.msk.bf16.mxu1 %vm552_vm0, %v551_v1  ;;  %v467_v3 = vld [vmem:[%s728_s1] sm:$0xff]   ;;  %v469_v5 = vld [vmem:[%s728_s1 + $0x8] sm:$0xff]   ;;  %v466_v6 = vld [vmem:[%s730_s3 + $0x18] sm:$0xff]  }
   0x3   :  { %434 = vmatprep.subr.bf16.mxu1 %v551_v1  ;;  %428 = vmatprep.mubr.msk.bf16.mxu0 %vm552_vm0, %v551_v1  ;;  %v471_v7 = vld [vmem:[%s728_s1 + $0x10] sm:$0xff]   ;;  %v468_v8 = vld [vmem:[%s730_s3 + $0x20] sm:$0xff]   ;;  %v473_v9 = vld [vmem:[%s728_s1 + $0x18] sm:$0xff]  }
   0x4   :  { %413 = vmatpush3.bf16.msra.mxu0 %v467_v3 }
   0x5   :  { %414 = vmatprep.subr.bf16.mxu0 %v551_v1 }
   0x6   :  { %435 = vmatpush3.bf16.msra.mxu1 %v464_v2 }
   0x7   :  { %436 = vmatprep.subr.bf16.mxu1 %v551_v1 }
   0x8   :  { %415 = vmatpush3.bf16.msra.mxu0 %v469_v5 }
   0x9   :  { %416 = vmatprep.subr.bf16.mxu0 %v551_v1 }
   0xa   :  { %437 = vmatpush3.bf16.msra.mxu1 %v465_v4 }
   0xb   :  { %438 = vmatprep.subr.bf16.mxu1 %v551_v1 }
   0xc   :  { %417 = vmatpush3.bf16.msra.mxu0 %v471_v7 }
   0xd   :  { %418 = vmatprep.subr.bf16.mxu0 %v551_v1 }
   0xe   :  { %439 = vmatpush3.bf16.msra.mxu1 %v466_v6 }
   0xf   :  { %440 = vmatprep.subr.bf16.mxu1 %v551_v1 }
  0x10   :  { %18 = vsyncpa [#allocation5], 0  ;;  %v470_v10 = vld [vmem:[%s730_s3 + $0x28] sm:$0xff]   ;;  %419 = vmatpush3.bf16.msra.mxu0 %v473_v9  ;;  %v475_v11 = vld [vmem:[%s728_s1 + $0x20] sm:$0xff]   ;;  %vm278_vm1 = vcmask 1043456   ;;  %vm322_vm2 = vcmask 58368  }
  0x11   :  { %420 = vmatprep.subr.bf16.mxu0 %v551_v1  ;;  %v472_v12 = vld [vmem:[%s730_s3 + $0x30] sm:$0xff]   ;;  %v476_v13 = vld [vmem:[%s728_s1 + $0x28] sm:$0xff]   ;;  %v474_v14 = vld [vmem:[%s730_s3 + $0x38] sm:$0xff]   ;;  %vm274_vm3 = vcmask 64512   ;;  %s554_s17 = smov [#allocation2]  }
  0x12   :  { %441 = vmatpush3.bf16.msra.mxu1 %v468_v8  ;;  %v477_v15 = vld [vmem:[%s728_s1 + $0x30] sm:$0xff]   ;;  %v36_v16 = vld [vmem:[%s727_s0] sm:$0x1]  ;;  %v478_v17 = vld [vmem:[%s728_s1 + $0x38] sm:$0xff]   ;;  %s333_s18 = sshll.u32 %s554_s17, 4  ;;  %s334_s18 = int_to_ptr.vmem [resolvable:$true] %s333_s18 }
  0x13   :  { %442 = vmatprep.subr.bf16.mxu1 %v551_v1  ;;  %v266_v18 = vld [vmem:[%s733_s6] sm:$0xf] }
  0x14   :  { %421 = vmatpush3.bf16.msra.mxu0 %v475_v11  ;;  %v280_v19 = vsel %vm278_vm1, %v266_v18, 0  ;;  %v381_v20 = vld [vmem:[%s731_s4] ss:$0 sm:$0xff] }
  0x15   :  { %422 = vmatprep.subr.bf16.mxu0 %v551_v1  ;;  %v372_v25 = vld [vmem:[%s729_s2] ss:$0 sm:$0xff]  ;;  %s553_s2 = smov [#allocation4]  }
  0x16   :  { %443 = vmatpush3.bf16.msra.mxu1 %v470_v10  ;;  %v259_v34 = vld [vmem:[%s732_s5] sm:$0x3]  ;;  %s343_s16 = sshll.u32 %s553_s2, 4  ;;  %s344_s16 = int_to_ptr.vmem [resolvable:$true] %s343_s16 }
  0x17   :  { %444 = vmatprep.subr.bf16.mxu1 %v551_v1  ;;  %s481_s19 = scalar_lea.vmem %s344_s16, 32  ;;  %p486_p1 = scmp.lt.s32.totalorder %s344_s16, %s344_s16 }
  0x18   :  { %423 = vmatpush3.bf16.msra.mxu0 %v476_v13  ;;  %p482_p0 = scmp.ne.s32.totalorder %s344_s16, %s481_s19  ;;  %p487_p2 = scmp.lt.s32.totalorder %s481_s19, %s481_s19 }
  0x19   :  { %424 = vmatprep.subr.bf16.mxu0 %v551_v1 }
  0x1a   :  { %445 = vmatpush3.bf16.msra.mxu1 %v472_v12  ;;  %p488_p3 = por %p487_p2, %p486_p1 }
  0x1b   :  { %446 = vmatprep.subr.bf16.mxu1 %v551_v1 }
  0x1c   :  { %425 = vmatpush3.bf16.msra.mxu0 %v477_v15  ;;  %p489_p4 = pnand %p488_p3, %p482_p0 }
  0x1d   :  { %426 = vmatprep.subr.bf16.mxu0 %v551_v1 }
  0x1e   :  { %447 = vmatpush3.bf16.msra.mxu1 %v474_v14 }
  0x20   :  { %427 = vmatpush3.bf16.msra.mxu0 %v478_v17 }
  0x21   :  { %449 = vmatmul.mubr.bf16.vlgmr.msra.gmra.mrb[0].mxu1 %v36_v16  ;;  %452 = vmatprep.subr.bf16.mxu0 %v551_v1 }
  0x23   :  { %429 = vmatmul.mubr.bf16.vlgmr.msra.gmra.mrb[0].mxu0 %v36_v16 }
  0x24   :  { %454 = vmatprep.mubr.msk.bf16.mxu0 %vm552_vm0, %v551_v1  ;;  %453 = vmatpush3.bf16.msra.mxu0 %v280_v19 }
  0xf4   :  { %v253_v21 = vpop.f32.mrb[0].mxu1 }
  0xf5   :  { %v254_v22 = vadd.f32 %v381_v20, %v253_v21  ;;  %v450_v23 = vpop.f32.mrb[1].mxu1 }
  0xf6   :  { %v256_v24 = vpop.f32.mrb[2].mxu1  ;;  %v142_v28 = vpop.f32.mrb[0].mxu0 }
  0xf7   :  { %v260_v26 = vmul.f32 0.5, %v254_v22  ;;  %v451_v27 = vpop.f32.mrb[3].mxu1  ;;  %324 = vst.msk [vmem:[#allocation4] sm:$0x3] %vm322_vm2, %v254_v22  ;;  %v143_v30 = vadd.f32 %v372_v25, %v142_v28  ;;  %v430_v31 = vpop.f32.mrb[1].mxu0 }
  0xf8   :  { %v145_v32 = vpop.f32.mrb[2].mxu0 }
  0xf9   :  { %v261_v29 = vmul.f32 1.442695, %v260_v26  ;;  %v431_v33 = vpop.f32.mrb[3].mxu0  ;;  %323 = vst.msk [vmem:[#allocation2] sm:$0x3] %vm322_vm2, %v143_v30 }
  0xfb   :  { %479 = vpow2.f32 %v261_v29 }
 0x105   :  { %v480_v35 = vpop.eup %479 }
 0x106   :  { %v263_v36 = vmul.f32 %v480_v35, %v259_v34 }
 0x108   :  { %v264_v37 = vadd.f32 %v263_v36, %v143_v30 }
 0x10a   :  { %v265_v38 = vpack.c.bf16 %v264_v37, %v264_v37  ;;  %325 = vst.msk [vmem:[#allocation6] sm:$0x3] %vm322_vm2, %v264_v37 }
 0x10c   :  { %455 = vmatmul.mubr.msk.bf16.vlgmr.msra.gmra.mrb[4].mxu0 %vm274_vm3, %v265_v38 }
 0x10d   :  { %492 = shalt.err (!%p489_p4)
}
 0x10e   :  { %s493_s21 = scalar_lea.hbm %s736_s9, 32 }
 0x10f   :  { %p494_p5 = scmp.ne.s32.totalorder %s736_s9, %s493_s21  ;;  %p497_p6 = scmp.lt.u32.totalorder %s493_s21, %s736_s9 }
 0x111   :  { %p499_p7 = pnand %p497_p6, %p494_p5 }
 0x113   :  { %502 = shalt.err (!%p499_p7)
}
 0x114   :  { %346 = dma.vmem_to_hbm [thread:$0]  %s344_s16, 32, %s736_s9, [#allocation5]  }
 0x115   :  { %s503_s28 = scalar_lea.vmem %s334_s18, 32  ;;  %p508_p9 = scmp.lt.s32.totalorder %s334_s18, %s334_s18 }
 0x116   :  { %p504_p8 = scmp.ne.s32.totalorder %s334_s18, %s503_s28  ;;  %p509_p10 = scmp.lt.s32.totalorder %s503_s28, %s503_s28 }
 0x118   :  { %p510_p11 = por %p509_p10, %p508_p9 }
 0x11a   :  { %p511_p12 = pnand %p510_p11, %p504_p8 }
 0x11c   :  { %514 = shalt.err (!%p511_p12)
}
 0x11d   :  { %s515_s12 = scalar_lea.hbm %s735_s8, 32 }
 0x11e   :  { %p516_p13 = scmp.ne.s32.totalorder %s735_s8, %s515_s12  ;;  %p519_p0 = scmp.lt.u32.totalorder %s515_s12, %s735_s8 }
 0x120   :  { %p521_p1 = pnand %p519_p0, %p516_p13 }
 0x122   :  { %524 = shalt.err (!%p521_p1)
}
 0x123   :  { %336 = dma.vmem_to_hbm [thread:$0]  %s334_s18, 32, %s735_s8, [#allocation3]  }
 0x124   :  { %s555_s15 = smov [#allocation6]  }
 0x125   :  { %s353_s4 = sshll.u32 %s555_s15, 4  ;;  %s354_s4 = int_to_ptr.vmem [resolvable:$true] %s353_s4 }
 0x126   :  { %s525_s6 = scalar_lea.vmem %s354_s4, 32  ;;  %p530_p3 = scmp.lt.s32.totalorder %s354_s4, %s354_s4 }
 0x127   :  { %p526_p2 = scmp.ne.s32.totalorder %s354_s4, %s525_s6  ;;  %p531_p4 = scmp.lt.s32.totalorder %s525_s6, %s525_s6 }
 0x129   :  { %p532_p5 = por %p531_p4, %p530_p3 }
 0x12b   :  { %p533_p6 = pnand %p532_p5, %p526_p2 }
 0x12d   :  { %536 = shalt.err (!%p533_p6)
}
 0x12e   :  { %s537_s17 = scalar_lea.hbm %s737_s10, 32 }
 0x12f   :  { %p538_p7 = scmp.ne.s32.totalorder %s737_s10, %s537_s17  ;;  %p541_p8 = scmp.lt.u32.totalorder %s537_s17, %s737_s10 }
 0x131   :  { %p543_p9 = pnand %p541_p8, %p538_p7 }
 0x133   :  { %546 = shalt.err (!%p543_p9)
}
 0x134   :  { %356 = dma.vmem_to_hbm [thread:$0]  %s354_s4, 32, %s737_s10, [#allocation5]   ;;  %v390_v39 = vld [vmem:[%s734_s7] ss:$0 sm:$0xff] }
 0x1df   :  { %v316_v40 = vpop.f32.mrb[4].mxu0 }
 0x1e0   :  { %v317_v41 = vadd.f32 %v390_v39, %v316_v40  ;;  %v456_v42 = vpop.f32.mrb[5].mxu0 }
 0x1e1   :  { %v319_v43 = vpop.f32.mrb[6].mxu0 }
 0x1e2   :  { %326 = vst [vmem:[%s738_s11] sm:$0x3] %v317_v41  ;;  %v457_v44 = vpop.f32.mrb[7].mxu0 }
 0x1e3   :  { %547 = dma.done.wait [#allocation3], 32  }
 0x1e4   :  { %548 = vsyncadd [#allocation3], 4294967264 }
 0x1e5   :  { %549 = dma.done.wait [#allocation5], 64  }
 0x1e6   :  { %550 = vsyncadd [#allocation5], 4294967232 }
 0x1e7   :  { %370 = vsyncpa [#allocation3], 1 }
 0x1e8   :  { %371 = vsyncpa [#allocation5], 1 }

// kernel: infovae_forward.44
= control target key start
LH: loop header
LB: loop body
LE: loop exit
PB: predicated region body
PF: predicated region fallthrough
CT: control target
= control target key end

     0   :  { %s600_s18 = smov 0   ;;  %s602_s19 = smov 0   ;;  %s662_s0 = inlined_call_operand.vmem [shape: bf16[2,8,32], index: 0, kind: input, shape index: {}]   ;;  %s663_s1 = inlined_call_operand.vmem [shape: bf16[32,8], index: 1, kind: input, shape index: {}]   ;;  %s664_s2 = inlined_call_operand.vmem [shape: f32[1,8], index: 2, kind: input, shape index: {}]   ;;  %s665_s3 = inlined_call_operand.vmem [shape: f32[2,8,8], index: 3, kind: output, shape index: {0}]   ;;  %s666_s4 = inlined_call_operand.vmem [shape: f32[2,1,8], index: 4, kind: output, shape index: {1}]   ;;  %s667_s5 = inlined_call_operand.vmem [shape: f32[2,1,8], index: 5, kind: output, shape index: {2}]  }
   0x1   :  { %s604_s20 = smov 0  }
   0x2 LB: > { %s28_s21 = sadd.s32 1, %s562_s19  ;;  %p496_p0 = scmp.ge.s32.totalorder %s566_s20, 1  ;;  %s566_s20 = sphi %s604_s20, %s16_s20   ;;  %s562_s19 = sphi %s602_s19, %s669_s19   ;;  %s558_s18 = sphi %s600_s18, %s668_s18  }
   0x3   : > { %p30_p1 = scmp.ge.s32.totalorder %s28_s21, 2  ;;  %p210_p2 = scmp.lt.s32.totalorder %s566_s20, 3 }
   0x5   : > { %s671_s21 = smov (%p30_p1, %s28_s21), 0  ;;  %p211_p3 = pnand %p496_p0, %p210_p2 }
   0x6   : > { %p248_p4 = scmp.lt.s32.totalorder (!%p211_p3), %s558_s18, 1  ;;  %v542_v0 = vld [vmem:[%s663_s1] sm:$0xff] (!%p211_p3)   ;;  %v568_v1 = vmov (!%p211_p3), 0.0   ;;  %vm273_vm0 = vcmask (!%p211_p3), 57344   ;;  %v543_v2 = vld [vmem:[%s663_s1 + $0x8] sm:$0xff] (!%p211_p3)   ;;  %vm569_vm1 = vmmov (!%p211_p3), 0  }
   0x7   : > { %214 = sbr.rel (%p211_p3) target bundleno = 251 (0xfb), region = 32  ;;  %508 = vmatprep.subr.bf16.mxu0 (!%p211_p3), %v568_v1  ;;  %512 = vmatprep.mubr.msk.bf16.mxu0 (!%p211_p3), %vm569_vm1, %v568_v1  ;;  %vm300_vm2 = vcmask (!%p211_p3), 261120   ;;  %v499_v4 = vld [vmem:[%s664_s2] ss:$0 sm:$0xff] (!%p211_p3)  ;;  %vm344_vm3 = vcmask (!%p211_p3), 64512  }
   0x8   : > { %509 = vmatpush3.bf16.msra.mxu0 (!%p211_p3), %v542_v0 }
   0x9   : > { %510 = vmatprep.subr.bf16.mxu0 (!%p211_p3), %v568_v1 }
   0xc   : > { %511 = vmatpush3.bf16.msra.mxu0 (!%p211_p3), %v543_v2 }
   0xe   : > { %s673_s18 = smov (!%p248_p4, %s558_s18), 1 }
   0xf   : > { %s627_s28 = scalar_lea.vmem %s666_s4, %s673_s18  ;;  %s632_s6 = scalar_lea.vmem %s667_s5, %s673_s18 }
  0x10   : > { %274 = vst.msk [vmem:[%s627_s28] sm:$0x1] %vm273_vm0, %v568_v1  ;;  %275 = vst.msk [vmem:[%s632_s6] sm:$0x1] %vm273_vm0, %v568_v1  ;;  %s497_s7 = sshll.u32 %s673_s18, 2  ;;  %s498_s11 = sshll.u32 %s673_s18, 3 }
  0x11   : > { %s254_s10 = scalar_lea.vmem %s662_s0, %s497_s7  ;;  %s261_s16 = scalar_lea.vmem %s665_s3, %s498_s11 }
  0x12   : > { %v276_v3 = vld [vmem:[%s254_s10] sm:$0xf] }
  0x13   : > { %513 = vmatmul.mubr.msk.bf16.vlgmr.msra.gmra.mrb[0].mxu0 %vm300_vm2, %v276_v3 }
  0x17   : > { %v346_v22 = vld [vmem:[%s627_s28] sm:$0x1] }
  0x18   : > { %v357_v25 = vld [vmem:[%s632_s6] sm:$0x1] }
  0xe6   : > { %v338_v5 = vpop.f32.mrb[0].mxu0 }
  0xe7   : > { %v339_v6 = vadd.f32 %v499_v4, %v338_v5  ;;  %v514_v7 = vpop.f32.mrb[1].mxu0 }
  0xe8   : > { %v341_v8 = vpop.f32.mrb[2].mxu0 }
  0xe9   : > { %345 = vst.msk [vmem:[%s261_s16] sm:$0xff] %vm344_vm3, %v339_v6  ;;  %v347_v9 = vsel %vm344_vm3, %v339_v6, 0.0  ;;  %v358_v10 = vmul.f32 %v339_v6, %v339_v6  ;;  %v515_v11 = vpop.f32.mrb[3].mxu0 }
  0xea   : > { %v348_v12 = vrot.slane %v347_v9, 4 }
  0xeb   : > { %v359_v13 = vsel %vm344_vm3, %v358_v10, 0.0 }
  0xec   : > { %v349_v14 = vadd.f32 %v348_v12, %v347_v9  ;;  %v360_v15 = vrot.slane %v359_v13, 4 }
  0xee   : > { %v350_v16 = vrot.slane %v349_v14, 2  ;;  %v361_v17 = vadd.f32 %v360_v15, %v359_v13 }
  0xf0   : > { %v351_v18 = vadd.f32 %v350_v16, %v349_v14  ;;  %v362_v19 = vrot.slane %v361_v17, 2 }
  0xf2   : > { %v352_v20 = vrot.slane %v351_v18, 1  ;;  %v363_v21 = vadd.f32 %v362_v19, %v361_v17 }
  0xf4   : > { %v353_v23 = vadd.f32 %v352_v20, %v351_v18  ;;  %v364_v24 = vrot.slane %v363_v21, 1 }
  0xf6   : > { %v354_v26 = vadd.f32 %v353_v23, %v346_v22  ;;  %v365_v27 = vadd.f32 %v364_v24, %v363_v21 }
  0xf8   : > { %356 = vst.msk [vmem:[%s627_s28] sm:$0x1] %vm273_vm0, %v354_v26  ;;  %v366_v28 = vadd.f32 %v365_v27, %v357_v25 }
  0xfa   : > { %367 = vst.msk [vmem:[%s632_s6] sm:$0x1] %vm273_vm0, %v366_v28 }
  0xfb PF: > { %s16_s20 = sadd.s32 1, %s566_s20   ;;  %s668_s18 = smov %s562_s19 }
  0xfc   : > { %p13_p5 = scmp.ge.s32.totalorder %s16_s20, 4   ;;  %s669_s19 = smov %s671_s21 }
  0xfe   :  { %15 = sbr.rel (!%p13_p5) target bundleno = 2 (0x2), region = 90 }

// kernel: infovae_forward.46
= control target key start
LH: loop header
LB: loop body
LE: loop exit
PB: predicated region body
PF: predicated region fallthrough
CT: control target
= control target key end

     0   :  { %s626_s18 = smov 0   ;;  %s628_s19 = smov 0   ;;  %s694_s0 = inlined_call_operand.vmem [shape: bf16[2,8,64], index: 0, kind: input, shape index: {}]   ;;  %s695_s1 = inlined_call_operand.vmem [shape: bf16[64,8], index: 1, kind: input, shape index: {}]   ;;  %s696_s2 = inlined_call_operand.vmem [shape: f32[1,8], index: 2, kind: input, shape index: {}]   ;;  %s697_s3 = inlined_call_operand.vmem [shape: f32[2,8,8], index: 3, kind: output, shape index: {0}]   ;;  %s698_s4 = inlined_call_operand.vmem [shape: f32[2,1,8], index: 4, kind: output, shape index: {1}]   ;;  %s699_s5 = inlined_call_operand.vmem [shape: f32[2,1,8], index: 5, kind: output, shape index: {2}]  }
   0x1   :  { %s630_s20 = smov 0  }
   0x2 LB: > { %s28_s21 = sadd.s32 1, %s588_s19  ;;  %p512_p0 = scmp.ge.s32.totalorder %s592_s20, 1  ;;  %s592_s20 = sphi %s630_s20, %s16_s20   ;;  %s588_s19 = sphi %s628_s19, %s701_s19   ;;  %s584_s18 = sphi %s626_s18, %s700_s18  }
   0x3   : > { %p30_p1 = scmp.ge.s32.totalorder %s28_s21, 2  ;;  %p210_p2 = scmp.lt.s32.totalorder %s592_s20, 3 }
   0x5   : > { %s703_s21 = smov (%p30_p1, %s28_s21), 0  ;;  %p211_p3 = pnand %p512_p0, %p210_p2 }
   0x6   : > { %v566_v0 = vld [vmem:[%s695_s1] sm:$0xff] (!%p211_p3)   ;;  %v594_v1 = vmov (!%p211_p3), 0.0   ;;  %v567_v2 = vld [vmem:[%s695_s1 + $0x8] sm:$0xff] (!%p211_p3)   ;;  %vm595_vm0 = vmmov (!%p211_p3), 0   ;;  %p248_p4 = scmp.lt.s32.totalorder (!%p211_p3), %s584_s18, 1  ;;  %v568_v3 = vld [vmem:[%s695_s1 + $0x10] sm:$0xff] (!%p211_p3)  }
   0x7   : > { %214 = sbr.rel (%p211_p3) target bundleno = 255 (0xff), region = 32  ;;  %528 = vmatprep.subr.bf16.mxu0 (!%p211_p3), %v594_v1  ;;  %536 = vmatprep.mubr.msk.bf16.mxu0 (!%p211_p3), %vm595_vm0, %v594_v1  ;;  %vm273_vm1 = vcmask (!%p211_p3), 57344   ;;  %v569_v4 = vld [vmem:[%s695_s1 + $0x18] sm:$0xff] (!%p211_p3)   ;;  %vm316_vm2 = vcmask (!%p211_p3), 523264   ;;  %v515_v6 = vld [vmem:[%s696_s2] ss:$0 sm:$0xff] (!%p211_p3) }
   0x8   : > { %529 = vmatpush3.bf16.msra.mxu0 (!%p211_p3), %v566_v0  ;;  %vm360_vm3 = vcmask (!%p211_p3), 64512  }
   0x9   : > { %530 = vmatprep.subr.bf16.mxu0 (!%p211_p3), %v594_v1 }
   0xc   : > { %531 = vmatpush3.bf16.msra.mxu0 (!%p211_p3), %v567_v2 }
   0xd   : > { %532 = vmatprep.subr.bf16.mxu0 (!%p211_p3), %v594_v1 }
   0xe   : > { %s705_s18 = smov (!%p248_p4, %s584_s18), 1 }
   0xf   : > { %s513_s28 = sshll.u32 %s705_s18, 2  ;;  %s656_s6 = scalar_lea.vmem %s698_s4, %s705_s18 }
  0x10   : > { %s661_s9 = scalar_lea.vmem %s699_s5, %s705_s18  ;;  %274 = vst.msk [vmem:[%s656_s6] sm:$0x1] %vm273_vm1, %v594_v1  ;;  %533 = vmatpush3.bf16.msra.mxu0 %v568_v3  ;;  %s254_s14 = scalar_lea.vmem %s694_s0, %s513_s28 }
  0x11   : > { %275 = vst.msk [vmem:[%s661_s9] sm:$0x1] %vm273_vm1, %v594_v1  ;;  %534 = vmatprep.subr.bf16.mxu0 %v594_v1  ;;  %v276_v5 = vld [vmem:[%s254_s14] sm:$0xf]  ;;  %s514_s15 = sshll.u32 %s705_s18, 3 }
  0x12   : > { %s261_s24 = scalar_lea.vmem %s697_s3, %s514_s15 }
  0x14   : > { %535 = vmatpush3.bf16.msra.mxu0 %v569_v4 }
  0x17   : > { %537 = vmatmul.mubr.msk.bf16.vlgmr.msra.gmra.mrb[0].mxu0 %vm316_vm2, %v276_v5  ;;  %v362_v24 = vld [vmem:[%s656_s6] sm:$0x1] }
  0x18   : > { %v373_v27 = vld [vmem:[%s661_s9] sm:$0x1] }
  0xea   : > { %v354_v7 = vpop.f32.mrb[0].mxu0 }
  0xeb   : > { %v355_v8 = vadd.f32 %v515_v6, %v354_v7  ;;  %v538_v9 = vpop.f32.mrb[1].mxu0 }
  0xec   : > { %v357_v10 = vpop.f32.mrb[2].mxu0 }
  0xed   : > { %361 = vst.msk [vmem:[%s261_s24] sm:$0xff] %vm360_vm3, %v355_v8  ;;  %v363_v11 = vsel %vm360_vm3, %v355_v8, 0.0  ;;  %v374_v12 = vmul.f32 %v355_v8, %v355_v8  ;;  %v539_v13 = vpop.f32.mrb[3].mxu0 }
  0xee   : > { %v364_v14 = vrot.slane %v363_v11, 4 }
  0xef   : > { %v375_v15 = vsel %vm360_vm3, %v374_v12, 0.0 }
  0xf0   : > { %v365_v16 = vadd.f32 %v364_v14, %v363_v11  ;;  %v376_v17 = vrot.slane %v375_v15, 4 }
  0xf2   : > { %v366_v18 = vrot.slane %v365_v16, 2  ;;  %v377_v19 = vadd.f32 %v376_v17, %v375_v15 }
  0xf4   : > { %v367_v20 = vadd.f32 %v366_v18, %v365_v16  ;;  %v378_v21 = vrot.slane %v377_v19, 2 }
  0xf6   : > { %v368_v22 = vrot.slane %v367_v20, 1  ;;  %v379_v23 = vadd.f32 %v378_v21, %v377_v19 }
  0xf8   : > { %v369_v25 = vadd.f32 %v368_v22, %v367_v20  ;;  %v380_v26 = vrot.slane %v379_v23, 1 }
  0xfa   : > { %v370_v28 = vadd.f32 %v369_v25, %v362_v24  ;;  %v381_v29 = vadd.f32 %v380_v26, %v379_v23 }
  0xfc   : > { %372 = vst.msk [vmem:[%s656_s6] sm:$0x1] %vm273_vm1, %v370_v28  ;;  %v382_v30 = vadd.f32 %v381_v29, %v373_v27 }
  0xfe   : > { %383 = vst.msk [vmem:[%s661_s9] sm:$0x1] %vm273_vm1, %v382_v30 }
  0xff PF: > { %s16_s20 = sadd.s32 1, %s592_s20   ;;  %s700_s18 = smov %s588_s19 }
 0x100   : > { %p13_p5 = scmp.ge.s32.totalorder %s16_s20, 4   ;;  %s701_s19 = smov %s703_s21 }
 0x102   :  { %15 = sbr.rel (!%p13_p5) target bundleno = 2 (0x2), region = 90 }

// kernel: infovae_forward.50
= control target key start
LH: loop header
LB: loop body
LE: loop exit
PB: predicated region body
PF: predicated region fallthrough
CT: control target
= control target key end

     0   :  { %s673_s18 = smov 0   ;;  %s675_s19 = smov 0   ;;  %s759_s0 = inlined_call_operand.vmem [shape: bf16[2,8,128], index: 0, kind: input, shape index: {}]   ;;  %s760_s1 = inlined_call_operand.vmem [shape: bf16[128,8], index: 1, kind: input, shape index: {}]   ;;  %s761_s2 = inlined_call_operand.vmem [shape: f32[1,8], index: 2, kind: input, shape index: {}]   ;;  %s762_s3 = inlined_call_operand.vmem [shape: f32[2,8,8], index: 3, kind: output, shape index: {0}]   ;;  %s763_s4 = inlined_call_operand.vmem [shape: f32[2,1,8], index: 4, kind: output, shape index: {1}]   ;;  %s764_s5 = inlined_call_operand.vmem [shape: f32[2,1,8], index: 5, kind: output, shape index: {2}]  }
   0x1   :  { %s677_s20 = smov 0  }
   0x2 LB: > { %s28_s21 = sadd.s32 1, %s635_s19  ;;  %p540_p0 = scmp.ge.s32.totalorder %s639_s20, 1  ;;  %s639_s20 = sphi %s677_s20, %s16_s20   ;;  %s635_s19 = sphi %s675_s19, %s766_s19   ;;  %s631_s18 = sphi %s673_s18, %s765_s18  }
   0x3   : > { %p30_p1 = scmp.ge.s32.totalorder %s28_s21, 2  ;;  %p210_p2 = scmp.lt.s32.totalorder %s639_s20, 3 }
   0x5   : > { %s768_s21 = smov (%p30_p1, %s28_s21), 0  ;;  %p211_p3 = pnand %p540_p0, %p210_p2 }
   0x6   : > { %v609_v0 = vld [vmem:[%s760_s1] sm:$0xff] (!%p211_p3)   ;;  %v641_v1 = vmov (!%p211_p3), 0.0   ;;  %v610_v2 = vld [vmem:[%s760_s1 + $0x8] sm:$0xff] (!%p211_p3)   ;;  %vm642_vm0 = vmmov (!%p211_p3), 0   ;;  %p248_p4 = scmp.lt.s32.totalorder (!%p211_p3), %s631_s18, 1  ;;  %vm273_vm1 = vcmask (!%p211_p3), 57344  }
   0x7   : > { %214 = sbr.rel (%p211_p3) target bundleno = 271 (0x10f), region = 32  ;;  %563 = vmatprep.subr.bf16.mxu0 (!%p211_p3), %v641_v1  ;;  %579 = vmatprep.mubr.msk.bf16.mxu0 (!%p211_p3), %vm642_vm0, %v641_v1  ;;  %v611_v3 = vld [vmem:[%s760_s1 + $0x10] sm:$0xff] (!%p211_p3)   ;;  %v612_v4 = vld [vmem:[%s760_s1 + $0x18] sm:$0xff] (!%p211_p3)   ;;  %v613_v5 = vld [vmem:[%s760_s1 + $0x20] sm:$0xff] (!%p211_p3)   ;;  %vm388_vm2 = vcmask (!%p211_p3), 64512  }
   0x8   : > { %564 = vmatpush3.bf16.msra.mxu0 (!%p211_p3), %v609_v0  ;;  %v614_v6 = vld [vmem:[%s760_s1 + $0x28] sm:$0xff] (!%p211_p3)   ;;  %v615_v7 = vld [vmem:[%s760_s1 + $0x30] sm:$0xff] (!%p211_p3)   ;;  %v616_v8 = vld [vmem:[%s760_s1 + $0x38] sm:$0xff] (!%p211_p3)  }
   0x9   : > { %565 = vmatprep.subr.bf16.mxu0 (!%p211_p3), %v641_v1  ;;  %v543_v10 = vld [vmem:[%s761_s2] ss:$0 sm:$0xff] (!%p211_p3) }
   0xc   : > { %566 = vmatpush3.bf16.msra.mxu0 (!%p211_p3), %v610_v2 }
   0xd   : > { %567 = vmatprep.subr.bf16.mxu0 (!%p211_p3), %v641_v1 }
   0xe   : > { %s770_s18 = smov (!%p248_p4, %s631_s18), 1 }
   0xf   : > { %s706_s30 = scalar_lea.vmem %s763_s4, %s770_s18  ;;  %s714_s8 = scalar_lea.vmem %s764_s5, %s770_s18 }
  0x10   : > { %274 = vst.msk [vmem:[%s706_s30] sm:$0x1] %vm273_vm1, %v641_v1  ;;  %275 = vst.msk [vmem:[%s714_s8] sm:$0x1] %vm273_vm1, %v641_v1  ;;  %568 = vmatpush3.bf16.msra.mxu0 %v611_v3  ;;  %s541_s17 = sshll.u32 %s770_s18, 2  ;;  %s542_s27 = sshll.u32 %s770_s18, 3 }
  0x11   : > { %569 = vmatprep.subr.bf16.mxu0 %v641_v1  ;;  %s254_s26 = scalar_lea.vmem %s759_s0, %s541_s17  ;;  %s261_s9 = scalar_lea.vmem %s762_s3, %s542_s27 }
  0x12   : > { %v276_v9 = vld [vmem:[%s254_s26] sm:$0xf] }
  0x14   : > { %570 = vmatpush3.bf16.msra.mxu0 %v612_v4 }
  0x15   : > { %571 = vmatprep.subr.bf16.mxu0 %v641_v1 }
  0x17   : > { %v390_v28 = vld [vmem:[%s706_s30] sm:$0x1] }
  0x18   : > { %572 = vmatpush3.bf16.msra.mxu0 %v613_v5  ;;  %v401_v31 = vld [vmem:[%s714_s8] sm:$0x1] }
  0x19   : > { %573 = vmatprep.subr.bf16.mxu0 %v641_v1 }
  0x1c   : > { %574 = vmatpush3.bf16.msra.mxu0 %v614_v6 }
  0x1d   : > { %575 = vmatprep.subr.bf16.mxu0 %v641_v1 }
  0x20   : > { %576 = vmatpush3.bf16.msra.mxu0 %v615_v7 }
  0x21   : > { %577 = vmatprep.subr.bf16.mxu0 %v641_v1 }
  0x24   : > { %578 = vmatpush3.bf16.msra.mxu0 %v616_v8 }
  0x27   : > { %580 = vmatmul.mubr.bf16.vlgmr.msra.gmra.mrb[0].mxu0 %v276_v9 }
  0xfa   : > { %v382_v11 = vpop.f32.mrb[0].mxu0 }
  0xfb   : > { %v383_v12 = vadd.f32 %v543_v10, %v382_v11  ;;  %v581_v13 = vpop.f32.mrb[1].mxu0 }
  0xfc   : > { %v385_v14 = vpop.f32.mrb[2].mxu0 }
  0xfd   : > { %389 = vst.msk [vmem:[%s261_s9] sm:$0xff] %vm388_vm2, %v383_v12  ;;  %v391_v15 = vsel %vm388_vm2, %v383_v12, 0.0  ;;  %v402_v16 = vmul.f32 %v383_v12, %v383_v12  ;;  %v582_v17 = vpop.f32.mrb[3].mxu0 }
  0xfe   : > { %v392_v18 = vrot.slane %v391_v15, 4 }
  0xff   : > { %v403_v19 = vsel %vm388_vm2, %v402_v16, 0.0 }
 0x100   : > { %v393_v20 = vadd.f32 %v392_v18, %v391_v15  ;;  %v404_v21 = vrot.slane %v403_v19, 4 }
 0x102   : > { %v394_v22 = vrot.slane %v393_v20, 2  ;;  %v405_v23 = vadd.f32 %v404_v21, %v403_v19 }
 0x104   : > { %v395_v24 = vadd.f32 %v394_v22, %v393_v20  ;;  %v406_v25 = vrot.slane %v405_v23, 2 }
 0x106   : > { %v396_v26 = vrot.slane %v395_v24, 1  ;;  %v407_v27 = vadd.f32 %v406_v25, %v405_v23 }
 0x108   : > { %v397_v29 = vadd.f32 %v396_v26, %v395_v24  ;;  %v408_v30 = vrot.slane %v407_v27, 1 }
 0x10a   : > { %v398_v32 = vadd.f32 %v397_v29, %v390_v28  ;;  %v409_v33 = vadd.f32 %v408_v30, %v407_v27 }
 0x10c   : > { %400 = vst.msk [vmem:[%s706_s30] sm:$0x1] %vm273_vm1, %v398_v32  ;;  %v410_v34 = vadd.f32 %v409_v33, %v401_v31 }
 0x10e   : > { %411 = vst.msk [vmem:[%s714_s8] sm:$0x1] %vm273_vm1, %v410_v34 }
 0x10f PF: > { %s16_s20 = sadd.s32 1, %s639_s20   ;;  %s765_s18 = smov %s635_s19 }
 0x110   : > { %p13_p5 = scmp.ge.s32.totalorder %s16_s20, 4   ;;  %s766_s19 = smov %s768_s21 }
 0x112   :  { %15 = sbr.rel (!%p13_p5) target bundleno = 2 (0x2), region = 90 }

// kernel: infovae_forward.43
= control target key start
LH: loop header
LB: loop body
LE: loop exit
PB: predicated region body
PF: predicated region fallthrough
CT: control target
= control target key end

     0   :  { %s587_s18 = smov 0   ;;  %s589_s19 = smov 0   ;;  %s646_s0 = inlined_call_operand.vmem [shape: bf16[2,8,16], index: 0, kind: input, shape index: {}]   ;;  %s647_s1 = inlined_call_operand.vmem [shape: bf16[16,8], index: 1, kind: input, shape index: {}]   ;;  %s648_s2 = inlined_call_operand.vmem [shape: f32[1,8], index: 2, kind: input, shape index: {}]   ;;  %s649_s3 = inlined_call_operand.vmem [shape: f32[2,8,8], index: 3, kind: output, shape index: {0}]   ;;  %s650_s4 = inlined_call_operand.vmem [shape: f32[2,1,8], index: 4, kind: output, shape index: {1}]   ;;  %s651_s5 = inlined_call_operand.vmem [shape: f32[2,1,8], index: 5, kind: output, shape index: {2}]  }
   0x1   :  { %s591_s20 = smov 0  }
   0x2 LB: > { %s28_s21 = sadd.s32 1, %s549_s19  ;;  %p488_p0 = scmp.ge.s32.totalorder %s553_s20, 1  ;;  %s553_s20 = sphi %s591_s20, %s16_s20   ;;  %s549_s19 = sphi %s589_s19, %s653_s19   ;;  %s545_s18 = sphi %s587_s18, %s652_s18  }
   0x3   : > { %p30_p1 = scmp.ge.s32.totalorder %s28_s21, 2  ;;  %p210_p2 = scmp.lt.s32.totalorder %s553_s20, 3 }
   0x5   : > { %s655_s21 = smov (%p30_p1, %s28_s21), 0  ;;  %p211_p3 = pnand %p488_p0, %p210_p2 }
   0x6   : > { %p248_p4 = scmp.lt.s32.totalorder (!%p211_p3), %s545_s18, 1  ;;  %v530_v0 = vld [vmem:[%s647_s1] sm:$0xff] (!%p211_p3)   ;;  %v555_v1 = vmov (!%p211_p3), 0.0   ;;  %vm273_vm0 = vcmask (!%p211_p3), 57344   ;;  %vm556_vm1 = vmmov (!%p211_p3), 0   ;;  %vm292_vm2 = vcmask (!%p211_p3), 130048  }
   0x7   : > { %214 = sbr.rel (%p211_p3) target bundleno = 251 (0xfb), region = 32  ;;  %498 = vmatprep.subr.bf16.mxu0 (!%p211_p3), %v555_v1  ;;  %500 = vmatprep.mubr.msk.bf16.mxu0 (!%p211_p3), %vm556_vm1, %v555_v1  ;;  %v491_v3 = vld [vmem:[%s648_s2] ss:$0 sm:$0xff] (!%p211_p3)  ;;  %vm336_vm3 = vcmask (!%p211_p3), 64512  }
   0x8   : > { %499 = vmatpush3.bf16.msra.mxu0 (!%p211_p3), %v530_v0 }
   0xe   : > { %s657_s18 = smov (!%p248_p4, %s545_s18), 1 }
   0xf   : > { %s611_s26 = scalar_lea.vmem %s650_s4, %s657_s18  ;;  %s616_s29 = scalar_lea.vmem %s651_s5, %s657_s18 }
  0x10   : > { %274 = vst.msk [vmem:[%s611_s26] sm:$0x1] %vm273_vm0, %v555_v1  ;;  %275 = vst.msk [vmem:[%s616_s29] sm:$0x1] %vm273_vm0, %v555_v1  ;;  %s489_s30 = sshll.u32 %s657_s18, 2  ;;  %s490_s9 = sshll.u32 %s657_s18, 3 }
  0x11   : > { %s254_s8 = scalar_lea.vmem %s646_s0, %s489_s30  ;;  %s261_s14 = scalar_lea.vmem %s649_s3, %s490_s9 }
  0x12   : > { %v276_v2 = vld [vmem:[%s254_s8] sm:$0xf] }
  0x13   : > { %501 = vmatmul.mubr.msk.bf16.vlgmr.msra.gmra.mrb[0].mxu0 %vm292_vm2, %v276_v2 }
  0x17   : > { %v338_v21 = vld [vmem:[%s611_s26] sm:$0x1] }
  0x18   : > { %v349_v24 = vld [vmem:[%s616_s29] sm:$0x1] }
  0xe6   : > { %v330_v4 = vpop.f32.mrb[0].mxu0 }
  0xe7   : > { %v331_v5 = vadd.f32 %v491_v3, %v330_v4  ;;  %v502_v6 = vpop.f32.mrb[1].mxu0 }
  0xe8   : > { %v333_v7 = vpop.f32.mrb[2].mxu0 }
  0xe9   : > { %337 = vst.msk [vmem:[%s261_s14] sm:$0xff] %vm336_vm3, %v331_v5  ;;  %v339_v8 = vsel %vm336_vm3, %v331_v5, 0.0  ;;  %v350_v9 = vmul.f32 %v331_v5, %v331_v5  ;;  %v503_v10 = vpop.f32.mrb[3].mxu0 }
  0xea   : > { %v340_v11 = vrot.slane %v339_v8, 4 }
  0xeb   : > { %v351_v12 = vsel %vm336_vm3, %v350_v9, 0.0 }
  0xec   : > { %v341_v13 = vadd.f32 %v340_v11, %v339_v8  ;;  %v352_v14 = vrot.slane %v351_v12, 4 }
  0xee   : > { %v342_v15 = vrot.slane %v341_v13, 2  ;;  %v353_v16 = vadd.f32 %v352_v14, %v351_v12 }
  0xf0   : > { %v343_v17 = vadd.f32 %v342_v15, %v341_v13  ;;  %v354_v18 = vrot.slane %v353_v16, 2 }
  0xf2   : > { %v344_v19 = vrot.slane %v343_v17, 1  ;;  %v355_v20 = vadd.f32 %v354_v18, %v353_v16 }
  0xf4   : > { %v345_v22 = vadd.f32 %v344_v19, %v343_v17  ;;  %v356_v23 = vrot.slane %v355_v20, 1 }
  0xf6   : > { %v346_v25 = vadd.f32 %v345_v22, %v338_v21  ;;  %v357_v26 = vadd.f32 %v356_v23, %v355_v20 }
  0xf8   : > { %348 = vst.msk [vmem:[%s611_s26] sm:$0x1] %vm273_vm0, %v346_v25  ;;  %v358_v27 = vadd.f32 %v357_v26, %v349_v24 }
  0xfa   : > { %359 = vst.msk [vmem:[%s616_s29] sm:$0x1] %vm273_vm0, %v358_v27 }
  0xfb PF: > { %s16_s20 = sadd.s32 1, %s553_s20   ;;  %s652_s18 = smov %s549_s19 }
  0xfc   : > { %p13_p5 = scmp.ge.s32.totalorder %s16_s20, 4   ;;  %s653_s19 = smov %s655_s21 }
  0xfe   :  { %15 = sbr.rel (!%p13_p5) target bundleno = 2 (0x2), region = 90 }

// kernel: infovae_forward.51
= control target key start
LH: loop header
LB: loop body
LE: loop exit
PB: predicated region body
PF: predicated region fallthrough
CT: control target
= control target key end

     0   :  { %s419_s12 = smov 0   ;;  %s421_s13 = smov 0   ;;  %s455_s0 = inlined_call_operand.vmem [shape: f32[2,8,8], index: 0, kind: input, shape index: {}]   ;;  %s456_s1 = inlined_call_operand.vmem [shape: f32[2,1,8], index: 1, kind: input, shape index: {}]   ;;  %s457_s2 = inlined_call_operand.vmem [shape: f32[2,1,8], index: 2, kind: input, shape index: {}]   ;;  %s458_s3 = inlined_call_operand.vmem [shape: bf16[2,8,8], index: 3, kind: output, shape index: {}]  }
   0x1   :  { %s423_s14 = smov 0  }
   0x2 LB: > { %s25_s15 = sadd.s32 1, %s393_s13  ;;  %p344_p0 = scmp.ge.s32.totalorder %s397_s14, 1  ;;  %s397_s14 = sphi %s423_s14, %s13_s14   ;;  %s393_s13 = sphi %s421_s13, %s460_s13   ;;  %s389_s12 = sphi %s419_s12, %s459_s12  }
   0x3   : > { %p27_p1 = scmp.ge.s32.totalorder %s25_s15, 2  ;;  %p171_p2 = scmp.lt.s32.totalorder %s397_s14, 3 }
   0x5   : > { %s462_s15 = smov (%p27_p1, %s25_s15), 0  ;;  %p172_p3 = pnand %p344_p0, %p171_p2 }
   0x6   : > { %p205_p4 = scmp.lt.s32.totalorder (!%p172_p3), %s389_s12, 1  ;;  %vm246_vm1 = vcmask (!%p172_p3), 60416  }
   0x7   : > { %175 = sbr.rel (%p172_p3) target bundleno = 28 (0x1c), region = 32 }
   0xe   : > { %s464_s12 = smov (!%p205_p4, %s389_s12), 1 }
   0xf   : > { %s345_s16 = sshll.u32 %s464_s12, 3  ;;  %s214_s19 = scalar_lea.vmem %s456_s1, %s464_s12 }
  0x10   : > { %s211_s22 = scalar_lea.vmem %s455_s0, %s345_s16  ;;  %s217_s25 = scalar_lea.vmem %s457_s2, %s464_s12  ;;  %v347_v0 = vld [vmem:[%s214_s19] ss:$0 sm:$0xff] }
  0x11   : > { %v225_v1 = vld [vmem:[%s211_s22] sm:$0xff]  ;;  %s346_s26 = sshll.u32 %s464_s12, 2 }
  0x12   : > { %v348_v2 = vld [vmem:[%s217_s25] ss:$0 sm:$0xff]  ;;  %v233_v3 = vmul.f32 %v347_v0, %v225_v1  ;;  %s224_s29 = scalar_lea.vmem %s458_s3, %s346_s26 }
  0x14   : > { %v241_v4 = vadd.f32 %v348_v2, %v233_v3 }
  0x16   : > { %vm242_vm0 = vcmp.ge.f32.partialorder %v241_v4, 0.0  ;;  %v243_v5 = vmul.f32 0.01, %v241_v4 }
  0x18   : > { %v244_v6 = vsel %vm242_vm0, %v241_v4, %v243_v5 }
  0x19   : > { %v245_v7 = vpack.c.bf16 %v244_v6, %v244_v6 }
  0x1b   : > { %247 = vst.msk [vmem:[%s224_s29] sm:$0xf] %vm246_vm1, %v245_v7 }
  0x1c PF: > { %s13_s14 = sadd.s32 1, %s397_s14   ;;  %s459_s12 = smov %s393_s13 }
  0x1d   : > { %p10_p5 = scmp.ge.s32.totalorder %s13_s14, 4   ;;  %s460_s13 = smov %s462_s15 }
  0x1f   :  { %12 = sbr.rel (!%p10_p5) target bundleno = 2 (0x2), region = 68 }

// kernel: infovae_forward.60
= control target key start
LH: loop header
LB: loop body
LE: loop exit
PB: predicated region body
PF: predicated region fallthrough
CT: control target
= control target key end

     0   :  { %s738_s18 = smov 0   ;;  %s740_s19 = smov 0   ;;  %s831_s0 = inlined_call_operand.vmem [shape: bf16[2,64,16], index: 0, kind: input, shape index: {}]   ;;  %s832_s1 = inlined_call_operand.vmem [shape: bf16[16,8], index: 1, kind: input, shape index: {}]   ;;  %s833_s2 = inlined_call_operand.vmem [shape: f32[1,8], index: 2, kind: input, shape index: {}]   ;;  %s834_s3 = inlined_call_operand.vmem [shape: f32[2,64,8], index: 3, kind: output, shape index: {0}]   ;;  %s835_s4 = inlined_call_operand.vmem [shape: f32[2,1,8], index: 4, kind: output, shape index: {1}]   ;;  %s836_s5 = inlined_call_operand.vmem [shape: f32[2,1,8], index: 5, kind: output, shape index: {2}]  }
   0x1   :  { %s742_s20 = smov 0  }
   0x2 LB: > { %s28_s21 = sadd.s32 1, %s701_s19  ;;  %p617_p0 = scmp.ge.s32.totalorder %s705_s20, 1  ;;  %s705_s20 = sphi %s742_s20, %s16_s20   ;;  %s701_s19 = sphi %s740_s19, %s838_s19   ;;  %s697_s18 = sphi %s738_s18, %s837_s18  }
   0x3   : > { %p30_p1 = scmp.ge.s32.totalorder %s28_s21, 2  ;;  %p213_p2 = scmp.lt.s32.totalorder %s705_s20, 3 }
   0x5   : > { %s840_s21 = smov (%p30_p1, %s28_s21), 0  ;;  %p214_p3 = pnand %p617_p0, %p213_p2 }
   0x6   : > { %v678_v0 = vld [vmem:[%s832_s1] sm:$0xff] (!%p214_p3)   ;;  %p256_p4 = scmp.lt.s32.totalorder (!%p214_p3), %s697_s18, 1  ;;  %vm332_vm0 = vcmask (!%p214_p3), 130048   ;;  %vm286_vm1 = vcmask (!%p214_p3), 57344   ;;  %v707_v5 = vmov (!%p214_p3), 0.0   ;;  %vm410_vm2 = vcmask (!%p214_p3), 64512  }
   0x7   : > { %217 = sbr.rel (%p214_p3) target bundleno = 268 (0x10c), region = 32  ;;  %641 = vmatprep.subr.bf16.mxu0 (!%p214_p3), %v678_v0  ;;  %651 = vmatprep.subr.bf16.mxu1 (!%p214_p3), %v678_v0  ;;  %v622_v6 = vld [vmem:[%s833_s2] ss:$0 sm:$0xff] (!%p214_p3) }
   0x8   : > { %642 = vmatpush3.bf16.msra.mxu0 (!%p214_p3), %v678_v0  ;;  %652 = vmatpush3.bf16.msra.mxu1 (!%p214_p3), %v678_v0 }
   0xe   : > { %s842_s18 = smov (!%p256_p4, %s697_s18), 1 }
   0xf   : > { %s634_s24 = sshll.u32 %s842_s18, 5  ;;  %s765_s30 = scalar_lea.vmem %s835_s4, %s842_s18 }
  0x10   : > { %s263_s27 = scalar_lea.vmem %s831_s0, %s634_s24  ;;  %s770_s8 = scalar_lea.vmem %s836_s5, %s842_s18  ;;  %287 = vst.msk [vmem:[%s765_s30] sm:$0x1] %vm286_vm1, %v707_v5 }
  0x11   : > { %v679_v1 = vld [vmem:[%s263_s27] sm:$0xff]   ;;  %v680_v2 = vld [vmem:[%s263_s27 + $0x8] sm:$0xff]   ;;  %v681_v3 = vld [vmem:[%s263_s27 + $0x10] sm:$0xff]   ;;  %288 = vst.msk [vmem:[%s770_s8] sm:$0x1] %vm286_vm1, %v707_v5  ;;  %s635_s9 = sshll.u32 %s842_s18, 6 }
  0x12   : > { %643 = vmatprep.mubr.msk.bf16.mxu0 %vm332_vm0, %v679_v1  ;;  %v682_v4 = vld [vmem:[%s263_s27 + $0x18] sm:$0xff]   ;;  %647 = vmatprep.mubr.msk.bf16.mxu1 %vm332_vm0, %v681_v3  ;;  %s782_s14 = scalar_lea.vmem %s834_s3, %s635_s9 }
  0x13   : > { %644 = vmatmul.mubr.msk.bf16.vlgmr.msra.gmra.mrb[0].mxu0 %vm332_vm0, %v680_v2  ;;  %648 = vmatmul.mubr.msk.bf16.vlgmr.msra.gmra.mrb[0].mxu1 %vm332_vm0, %v682_v4 }
  0xe6   : > { %v645_v7 = vpop.f32.mrb[0].mxu0  ;;  %v649_v12 = vpop.f32.mrb[0].mxu1 }
  0xe7   : > { %v388_v8 = vadd.f32 %v645_v7, %v622_v6  ;;  %v379_v9 = vpop.f32.mrb[1].mxu0  ;;  %v404_v15 = vadd.f32 %v649_v12, %v622_v6  ;;  %v395_v16 = vpop.f32.mrb[1].mxu1 }
  0xe8   : > { %v380_v10 = vadd.f32 %v622_v6, %v379_v9  ;;  %v646_v11 = vpop.f32.mrb[2].mxu0  ;;  %v396_v19 = vadd.f32 %v622_v6, %v395_v16  ;;  %v650_v20 = vpop.f32.mrb[2].mxu1  ;;  %v444_v9 = vld [vmem:[%s770_s8] sm:$0x1] }
  0xe9   : > { %413 = vst.msk [vmem:[%s782_s14 + $0x10] sm:$0xff] %vm410_vm2, %v388_v8  ;;  %v391_v13 = vadd.f32 %v646_v11, %v622_v6  ;;  %v382_v14 = vpop.f32.mrb[3].mxu0  ;;  %417 = vst.msk [vmem:[%s782_s14 + $0x30] sm:$0xff] %vm410_vm2, %v404_v15  ;;  %v398_v21 = vpop.f32.mrb[3].mxu1  ;;  %v447_v22 = vmul.f32 %v388_v8, %v388_v8  ;;  %v423_v26 = vsel %vm410_vm2, %v388_v8, 0.0  ;;  %v407_v32 = vadd.f32 %v650_v20, %v622_v6 }
  0xea   : > { %411 = vst.msk [vmem:[%s782_s14] sm:$0xff] %vm410_vm2, %v380_v10  ;;  %v445_v17 = vmul.f32 %v380_v10, %v380_v10  ;;  %v383_v18 = vadd.f32 %v622_v6, %v382_v14  ;;  %v420_v23 = vsel %vm410_vm2, %v380_v10, 0.0  ;;  %415 = vst.msk [vmem:[%s782_s14 + $0x20] sm:$0xff] %vm410_vm2, %v396_v19  ;;  %v449_v31 = vmul.f32 %v396_v19, %v396_v19 }
  0xeb   : > { %414 = vst.msk [vmem:[%s782_s14 + $0x18] sm:$0xff] %vm410_vm2, %v391_v13  ;;  %v448_v28 = vmul.f32 %v391_v13, %v391_v13  ;;  %v399_v33 = vadd.f32 %v622_v6, %v398_v21  ;;  %v456_v36 = vsel %vm410_vm2, %v447_v22, 0.0  ;;  %v425_v37 = vsel %vm410_vm2, %v391_v13, 0.0  ;;  %418 = vst.msk [vmem:[%s782_s14 + $0x38] sm:$0xff] %vm410_vm2, %v407_v32  ;;  %v419_v6 = vld [vmem:[%s765_s30] sm:$0x1] }
  0xec   : > { %412 = vst.msk [vmem:[%s782_s14 + $0x8] sm:$0xff] %vm410_vm2, %v383_v18  ;;  %v421_v24 = vsel %vm410_vm2, %v383_v18, 0.0  ;;  %v446_v25 = vmul.f32 %v383_v18, %v383_v18  ;;  %v453_v27 = vsel %vm410_vm2, %v445_v17, 0.0  ;;  %v427_v38 = vsel %vm410_vm2, %v396_v19, 0.0 }
  0xed   : > { %v422_v29 = vadd.f32 %v421_v24, %v420_v23  ;;  %416 = vst.msk [vmem:[%s782_s14 + $0x28] sm:$0xff] %vm410_vm2, %v399_v33  ;;  %v458_v41 = vsel %vm410_vm2, %v448_v28, 0.0  ;;  %v460_v42 = vsel %vm410_vm2, %v449_v31, 0.0  ;;  %v450_v43 = vmul.f32 %v399_v33, %v399_v33 }
  0xee   : > { %v454_v30 = vsel %vm410_vm2, %v446_v25, 0.0  ;;  %v451_v46 = vmul.f32 %v404_v15, %v404_v15  ;;  %v429_v47 = vsel %vm410_vm2, %v399_v33, 0.0  ;;  %v431_v50 = vsel %vm410_vm2, %v404_v15, 0.0 }
  0xef   : > { %v424_v34 = vadd.f32 %v423_v26, %v422_v29  ;;  %v455_v35 = vadd.f32 %v454_v30, %v453_v27  ;;  %v452_v51 = vmul.f32 %v407_v32, %v407_v32  ;;  %v462_v52 = vsel %vm410_vm2, %v450_v43, 0.0 }
  0xf0   : > { %v464_v55 = vsel %vm410_vm2, %v451_v46, 0.0  ;;  %v433_v56 = vsel %vm410_vm2, %v407_v32, 0.0 }
  0xf1   : > { %v457_v39 = vadd.f32 %v456_v36, %v455_v35  ;;  %v426_v40 = vadd.f32 %v425_v37, %v424_v34  ;;  %v466_v59 = vsel %vm410_vm2, %v452_v51, 0.0 }
  0xf3   : > { %v428_v44 = vadd.f32 %v427_v38, %v426_v40  ;;  %v459_v45 = vadd.f32 %v458_v41, %v457_v39 }
  0xf5   : > { %v461_v48 = vadd.f32 %v460_v42, %v459_v45  ;;  %v430_v49 = vadd.f32 %v429_v47, %v428_v44 }
  0xf7   : > { %v432_v53 = vadd.f32 %v431_v50, %v430_v49  ;;  %v463_v54 = vadd.f32 %v462_v52, %v461_v48 }
  0xf9   : > { %v434_v57 = vadd.f32 %v433_v56, %v432_v53  ;;  %v465_v58 = vadd.f32 %v464_v55, %v463_v54 }
  0xfb   : > { %v435_v60 = vrot.slane %v434_v57, 4  ;;  %v467_v61 = vadd.f32 %v466_v59, %v465_v58 }
  0xfd   : > { %v436_v62 = vadd.f32 %v435_v60, %v434_v57  ;;  %v468_v63 = vrot.slane %v467_v61, 4 }
  0xff   : > { %v437_v0 = vrot.slane %v436_v62, 2  ;;  %v469_v1 = vadd.f32 %v468_v63, %v467_v61 }
 0x101   : > { %v438_v2 = vadd.f32 %v437_v0, %v436_v62  ;;  %v470_v3 = vrot.slane %v469_v1, 2 }
 0x103   : > { %v439_v4 = vrot.slane %v438_v2, 1  ;;  %v471_v5 = vadd.f32 %v470_v3, %v469_v1 }
 0x105   : > { %v440_v7 = vadd.f32 %v439_v4, %v438_v2  ;;  %v472_v8 = vrot.slane %v471_v5, 1 }
 0x107   : > { %v441_v10 = vadd.f32 %v440_v7, %v419_v6  ;;  %v473_v11 = vadd.f32 %v472_v8, %v471_v5 }
 0x109   : > { %443 = vst.msk [vmem:[%s765_s30] sm:$0x1] %vm286_vm1, %v441_v10  ;;  %v474_v12 = vadd.f32 %v473_v11, %v444_v9 }
 0x10b   : > { %475 = vst.msk [vmem:[%s770_s8] sm:$0x1] %vm286_vm1, %v474_v12 }
 0x10c PF: > { %s16_s20 = sadd.s32 1, %s705_s20   ;;  %s837_s18 = smov %s701_s19 }
 0x10d   : > { %p13_p5 = scmp.ge.s32.totalorder %s16_s20, 4   ;;  %s838_s19 = smov %s840_s21 }
 0x10f   :  { %15 = sbr.rel (!%p13_p5) target bundleno = 2 (0x2), region = 90 }

// kernel: infovae_forward.62
= control target key start
LH: loop header
LB: loop body
LE: loop exit
PB: predicated region body
PF: predicated region fallthrough
CT: control target
= control target key end

     0   :  { %s753_s18 = smov 0   ;;  %s755_s19 = smov 0   ;;  %s849_s0 = inlined_call_operand.vmem [shape: bf16[2,64,32], index: 0, kind: input, shape index: {}]   ;;  %s850_s1 = inlined_call_operand.vmem [shape: bf16[32,8], index: 1, kind: input, shape index: {}]   ;;  %s851_s2 = inlined_call_operand.vmem [shape: f32[1,8], index: 2, kind: input, shape index: {}]   ;;  %s852_s3 = inlined_call_operand.vmem [shape: f32[2,64,8], index: 3, kind: output, shape index: {0}]   ;;  %s853_s4 = inlined_call_operand.vmem [shape: f32[2,1,8], index: 4, kind: output, shape index: {1}]   ;;  %s854_s5 = inlined_call_operand.vmem [shape: f32[2,1,8], index: 5, kind: output, shape index: {2}]  }
   0x1   :  { %s757_s20 = smov 0  }
   0x2 LB: > { %s28_s21 = sadd.s32 1, %s716_s19  ;;  %p625_p0 = scmp.ge.s32.totalorder %s720_s20, 1  ;;  %s720_s20 = sphi %s757_s20, %s16_s20   ;;  %s716_s19 = sphi %s755_s19, %s856_s19   ;;  %s712_s18 = sphi %s753_s18, %s855_s18  }
   0x3   : > { %p30_p1 = scmp.ge.s32.totalorder %s28_s21, 2  ;;  %p213_p2 = scmp.lt.s32.totalorder %s720_s20, 3 }
   0x5   : > { %s858_s21 = smov (%p30_p1, %s28_s21), 0  ;;  %p214_p3 = pnand %p625_p0, %p213_p2 }
   0x6   : > { %v692_v0 = vld [vmem:[%s850_s1] sm:$0xff] (!%p214_p3)   ;;  %p256_p4 = scmp.lt.s32.totalorder (!%p214_p3), %s712_s18, 1  ;;  %v693_v1 = vld [vmem:[%s850_s1 + $0x8] sm:$0xff] (!%p214_p3)   ;;  %vm340_vm0 = vcmask (!%p214_p3), 261120   ;;  %vm286_vm1 = vcmask (!%p214_p3), 57344   ;;  %v722_v6 = vmov (!%p214_p3), 0.0  }
   0x7   : > { %217 = sbr.rel (%p214_p3) target bundleno = 268 (0x10c), region = 32  ;;  %651 = vmatprep.subr.bf16.mxu0 (!%p214_p3), %v692_v0  ;;  %663 = vmatprep.subr.bf16.mxu1 (!%p214_p3), %v692_v0  ;;  %v630_v7 = vld [vmem:[%s851_s2] ss:$0 sm:$0xff] (!%p214_p3)  ;;  %vm418_vm2 = vcmask (!%p214_p3), 64512  }
   0x8   : > { %652 = vmatpush3.bf16.msra.mxu0 (!%p214_p3), %v692_v0  ;;  %665 = vmatpush3.bf16.msra.mxu1 (!%p214_p3), %v692_v0 }
   0x9   : > { %653 = vmatprep.subr.bf16.mxu0 (!%p214_p3), %v693_v1  ;;  %664 = vmatprep.subr.bf16.mxu1 (!%p214_p3), %v693_v1 }
   0xc   : > { %654 = vmatpush3.bf16.msra.mxu0 (!%p214_p3), %v693_v1  ;;  %666 = vmatpush3.bf16.msra.mxu1 (!%p214_p3), %v693_v1 }
   0xe   : > { %s860_s18 = smov (!%p256_p4, %s712_s18), 1 }
   0xf   : > { %s643_s26 = sshll.u32 %s860_s18, 5  ;;  %s783_s7 = scalar_lea.vmem %s853_s4, %s860_s18 }
  0x10   : > { %s263_s29 = scalar_lea.vmem %s849_s0, %s643_s26  ;;  %s788_s10 = scalar_lea.vmem %s854_s5, %s860_s18  ;;  %287 = vst.msk [vmem:[%s783_s7] sm:$0x1] %vm286_vm1, %v722_v6 }
  0x11   : > { %v694_v2 = vld [vmem:[%s263_s29] sm:$0xff]   ;;  %v695_v3 = vld [vmem:[%s263_s29 + $0x8] sm:$0xff]   ;;  %v696_v4 = vld [vmem:[%s263_s29 + $0x10] sm:$0xff]   ;;  %288 = vst.msk [vmem:[%s788_s10] sm:$0x1] %vm286_vm1, %v722_v6  ;;  %s644_s11 = sshll.u32 %s860_s18, 6 }
  0x12   : > { %655 = vmatprep.mubr.msk.bf16.mxu0 %vm340_vm0, %v694_v2  ;;  %v697_v5 = vld [vmem:[%s263_s29 + $0x18] sm:$0xff]   ;;  %659 = vmatprep.mubr.msk.bf16.mxu1 %vm340_vm0, %v696_v4  ;;  %s800_s16 = scalar_lea.vmem %s852_s3, %s644_s11 }
  0x13   : > { %656 = vmatmul.mubr.msk.bf16.vlgmr.msra.gmra.mrb[0].mxu0 %vm340_vm0, %v695_v3  ;;  %660 = vmatmul.mubr.msk.bf16.vlgmr.msra.gmra.mrb[0].mxu1 %vm340_vm0, %v697_v5 }
  0xe6   : > { %v657_v8 = vpop.f32.mrb[0].mxu0  ;;  %v661_v11 = vpop.f32.mrb[0].mxu1 }
  0xe7   : > { %v396_v9 = vadd.f32 %v657_v8, %v630_v7  ;;  %v387_v10 = vpop.f32.mrb[1].mxu0  ;;  %v412_v14 = vadd.f32 %v661_v11, %v630_v7  ;;  %v403_v15 = vpop.f32.mrb[1].mxu1 }
  0xe8   : > { %v388_v12 = vadd.f32 %v630_v7, %v387_v10  ;;  %v658_v13 = vpop.f32.mrb[2].mxu0  ;;  %v404_v18 = vadd.f32 %v630_v7, %v403_v15  ;;  %v662_v19 = vpop.f32.mrb[2].mxu1  ;;  %v452_v10 = vld [vmem:[%s788_s10] sm:$0x1] }
  0xe9   : > { %421 = vst.msk [vmem:[%s800_s16 + $0x10] sm:$0xff] %vm418_vm2, %v396_v9  ;;  %v399_v16 = vadd.f32 %v658_v13, %v630_v7  ;;  %v390_v17 = vpop.f32.mrb[3].mxu0  ;;  %425 = vst.msk [vmem:[%s800_s16 + $0x30] sm:$0xff] %vm418_vm2, %v412_v14  ;;  %v406_v22 = vpop.f32.mrb[3].mxu1  ;;  %v455_v23 = vmul.f32 %v396_v9, %v396_v9  ;;  %v431_v27 = vsel %vm418_vm2, %v396_v9, 0.0  ;;  %v415_v33 = vadd.f32 %v662_v19, %v630_v7 }
  0xea   : > { %419 = vst.msk [vmem:[%s800_s16] sm:$0xff] %vm418_vm2, %v388_v12  ;;  %v453_v20 = vmul.f32 %v388_v12, %v388_v12  ;;  %v391_v21 = vadd.f32 %v630_v7, %v390_v17  ;;  %423 = vst.msk [vmem:[%s800_s16 + $0x20] sm:$0xff] %vm418_vm2, %v404_v18  ;;  %v428_v24 = vsel %vm418_vm2, %v388_v12, 0.0  ;;  %v457_v32 = vmul.f32 %v404_v18, %v404_v18 }
  0xeb   : > { %422 = vst.msk [vmem:[%s800_s16 + $0x18] sm:$0xff] %vm418_vm2, %v399_v16  ;;  %v456_v29 = vmul.f32 %v399_v16, %v399_v16  ;;  %v407_v34 = vadd.f32 %v630_v7, %v406_v22  ;;  %v464_v37 = vsel %vm418_vm2, %v455_v23, 0.0  ;;  %v433_v38 = vsel %vm418_vm2, %v399_v16, 0.0  ;;  %426 = vst.msk [vmem:[%s800_s16 + $0x38] sm:$0xff] %vm418_vm2, %v415_v33  ;;  %v427_v7 = vld [vmem:[%s783_s7] sm:$0x1] }
  0xec   : > { %420 = vst.msk [vmem:[%s800_s16 + $0x8] sm:$0xff] %vm418_vm2, %v391_v21  ;;  %v429_v25 = vsel %vm418_vm2, %v391_v21, 0.0  ;;  %v454_v26 = vmul.f32 %v391_v21, %v391_v21  ;;  %v461_v28 = vsel %vm418_vm2, %v453_v20, 0.0  ;;  %v435_v39 = vsel %vm418_vm2, %v404_v18, 0.0 }
  0xed   : > { %v430_v30 = vadd.f32 %v429_v25, %v428_v24  ;;  %424 = vst.msk [vmem:[%s800_s16 + $0x28] sm:$0xff] %vm418_vm2, %v407_v34  ;;  %v466_v42 = vsel %vm418_vm2, %v456_v29, 0.0  ;;  %v468_v43 = vsel %vm418_vm2, %v457_v32, 0.0  ;;  %v458_v44 = vmul.f32 %v407_v34, %v407_v34 }
  0xee   : > { %v462_v31 = vsel %vm418_vm2, %v454_v26, 0.0  ;;  %v459_v47 = vmul.f32 %v412_v14, %v412_v14  ;;  %v437_v48 = vsel %vm418_vm2, %v407_v34, 0.0  ;;  %v439_v51 = vsel %vm418_vm2, %v412_v14, 0.0 }
  0xef   : > { %v432_v35 = vadd.f32 %v431_v27, %v430_v30  ;;  %v463_v36 = vadd.f32 %v462_v31, %v461_v28  ;;  %v460_v52 = vmul.f32 %v415_v33, %v415_v33  ;;  %v470_v53 = vsel %vm418_vm2, %v458_v44, 0.0 }
  0xf0   : > { %v472_v56 = vsel %vm418_vm2, %v459_v47, 0.0  ;;  %v441_v57 = vsel %vm418_vm2, %v415_v33, 0.0 }
  0xf1   : > { %v465_v40 = vadd.f32 %v464_v37, %v463_v36  ;;  %v434_v41 = vadd.f32 %v433_v38, %v432_v35  ;;  %v474_v60 = vsel %vm418_vm2, %v460_v52, 0.0 }
  0xf3   : > { %v436_v45 = vadd.f32 %v435_v39, %v434_v41  ;;  %v467_v46 = vadd.f32 %v466_v42, %v465_v40 }
  0xf5   : > { %v469_v49 = vadd.f32 %v468_v43, %v467_v46  ;;  %v438_v50 = vadd.f32 %v437_v48, %v436_v45 }
  0xf7   : > { %v440_v54 = vadd.f32 %v439_v51, %v438_v50  ;;  %v471_v55 = vadd.f32 %v470_v53, %v469_v49 }
  0xf9   : > { %v442_v58 = vadd.f32 %v441_v57, %v440_v54  ;;  %v473_v59 = vadd.f32 %v472_v56, %v471_v55 }
  0xfb   : > { %v443_v61 = vrot.slane %v442_v58, 4  ;;  %v475_v62 = vadd.f32 %v474_v60, %v473_v59 }
  0xfd   : > { %v444_v63 = vadd.f32 %v443_v61, %v442_v58  ;;  %v476_v0 = vrot.slane %v475_v62, 4 }
  0xff   : > { %v445_v1 = vrot.slane %v444_v63, 2  ;;  %v477_v2 = vadd.f32 %v476_v0, %v475_v62 }
 0x101   : > { %v446_v3 = vadd.f32 %v445_v1, %v444_v63  ;;  %v478_v4 = vrot.slane %v477_v2, 2 }
 0x103   : > { %v447_v5 = vrot.slane %v446_v3, 1  ;;  %v479_v6 = vadd.f32 %v478_v4, %v477_v2 }
 0x105   : > { %v448_v8 = vadd.f32 %v447_v5, %v446_v3  ;;  %v480_v9 = vrot.slane %v479_v6, 1 }
 0x107   : > { %v449_v11 = vadd.f32 %v448_v8, %v427_v7  ;;  %v481_v12 = vadd.f32 %v480_v9, %v479_v6 }
 0x109   : > { %451 = vst.msk [vmem:[%s783_s7] sm:$0x1] %vm286_vm1, %v449_v11  ;;  %v482_v13 = vadd.f32 %v481_v12, %v452_v10 }
 0x10b   : > { %483 = vst.msk [vmem:[%s788_s10] sm:$0x1] %vm286_vm1, %v482_v13 }
 0x10c PF: > { %s16_s20 = sadd.s32 1, %s720_s20   ;;  %s855_s18 = smov %s716_s19 }
 0x10d   : > { %p13_p5 = scmp.ge.s32.totalorder %s16_s20, 4   ;;  %s856_s19 = smov %s858_s21 }
 0x10f   :  { %15 = sbr.rel (!%p13_p5) target bundleno = 2 (0x2), region = 90 }

// kernel: infovae_forward.66
= control target key start
LH: loop header
LB: loop body
LE: loop exit
PB: predicated region body
PF: predicated region fallthrough
CT: control target
= control target key end

     0   :  { %s783_s18 = smov 0   ;;  %s785_s19 = smov 0   ;;  %s895_s0 = inlined_call_operand.vmem [shape: bf16[2,64,64], index: 0, kind: input, shape index: {}]   ;;  %s896_s1 = inlined_call_operand.vmem [shape: bf16[64,8], index: 1, kind: input, shape index: {}]   ;;  %s897_s2 = inlined_call_operand.vmem [shape: f32[1,8], index: 2, kind: input, shape index: {}]   ;;  %s898_s3 = inlined_call_operand.vmem [shape: f32[2,64,8], index: 3, kind: output, shape index: {0}]   ;;  %s899_s4 = inlined_call_operand.vmem [shape: f32[2,1,8], index: 4, kind: output, shape index: {1}]   ;;  %s900_s5 = inlined_call_operand.vmem [shape: f32[2,1,8], index: 5, kind: output, shape index: {2}]  }
   0x1   :  { %s787_s20 = smov 0  }
   0x2 LB: > { %s28_s21 = sadd.s32 1, %s746_s19  ;;  %p641_p0 = scmp.ge.s32.totalorder %s750_s20, 1  ;;  %s750_s20 = sphi %s787_s20, %s16_s20   ;;  %s746_s19 = sphi %s785_s19, %s902_s19   ;;  %s742_s18 = sphi %s783_s18, %s901_s18  }
   0x3   : > { %p30_p1 = scmp.ge.s32.totalorder %s28_s21, 2  ;;  %p213_p2 = scmp.lt.s32.totalorder %s750_s20, 3 }
   0x5   : > { %s904_s21 = smov (%p30_p1, %s28_s21), 0  ;;  %p214_p3 = pnand %p641_p0, %p213_p2 }
   0x6   : > { %v720_v0 = vld [vmem:[%s896_s1] sm:$0xff] (!%p214_p3)   ;;  %p256_p4 = scmp.lt.s32.totalorder (!%p214_p3), %s742_s18, 1  ;;  %v721_v1 = vld [vmem:[%s896_s1 + $0x8] sm:$0xff] (!%p214_p3)   ;;  %v722_v2 = vld [vmem:[%s896_s1 + $0x10] sm:$0xff] (!%p214_p3)   ;;  %vm356_vm0 = vcmask (!%p214_p3), 523264   ;;  %vm286_vm1 = vcmask (!%p214_p3), 57344  }
   0x7   : > { %217 = sbr.rel (%p214_p3) target bundleno = 272 (0x110), region = 32  ;;  %671 = vmatprep.subr.bf16.mxu0 (!%p214_p3), %v720_v0  ;;  %687 = vmatprep.subr.bf16.mxu1 (!%p214_p3), %v720_v0  ;;  %v723_v4 = vld [vmem:[%s896_s1 + $0x18] sm:$0xff] (!%p214_p3)   ;;  %v752_v8 = vmov (!%p214_p3), 0.0   ;;  %v646_v9 = vld [vmem:[%s897_s2] ss:$0 sm:$0xff] (!%p214_p3)  ;;  %vm434_vm2 = vcmask (!%p214_p3), 64512  }
   0x8   : > { %672 = vmatpush3.bf16.msra.mxu0 (!%p214_p3), %v720_v0  ;;  %691 = vmatpush3.bf16.msra.mxu1 (!%p214_p3), %v720_v0 }
   0x9   : > { %673 = vmatprep.subr.bf16.mxu0 (!%p214_p3), %v721_v1  ;;  %688 = vmatprep.subr.bf16.mxu1 (!%p214_p3), %v721_v1 }
   0xc   : > { %674 = vmatpush3.bf16.msra.mxu0 (!%p214_p3), %v721_v1  ;;  %692 = vmatpush3.bf16.msra.mxu1 (!%p214_p3), %v721_v1 }
   0xd   : > { %675 = vmatprep.subr.bf16.mxu0 (!%p214_p3), %v722_v2  ;;  %689 = vmatprep.subr.bf16.mxu1 (!%p214_p3), %v722_v2 }
   0xe   : > { %s906_s18 = smov (!%p256_p4, %s742_s18), 1 }
   0xf   : > { %s661_s28 = sshll.u32 %s906_s18, 5  ;;  %s827_s11 = scalar_lea.vmem %s899_s4, %s906_s18 }
  0x10   : > { %s263_s6 = scalar_lea.vmem %s895_s0, %s661_s28  ;;  %676 = vmatpush3.bf16.msra.mxu0 %v722_v2  ;;  %693 = vmatpush3.bf16.msra.mxu1 %v722_v2  ;;  %s833_s14 = scalar_lea.vmem %s900_s5, %s906_s18  ;;  %287 = vst.msk [vmem:[%s827_s11] sm:$0x1] %vm286_vm1, %v752_v8 }
  0x11   : > { %v724_v3 = vld [vmem:[%s263_s6] sm:$0xff]   ;;  %v726_v5 = vld [vmem:[%s263_s6 + $0x10] sm:$0xff]   ;;  %677 = vmatprep.subr.bf16.mxu0 %v723_v4  ;;  %690 = vmatprep.subr.bf16.mxu1 %v723_v4  ;;  %v725_v6 = vld [vmem:[%s263_s6 + $0x8] sm:$0xff]   ;;  %288 = vst.msk [vmem:[%s833_s14] sm:$0x1] %vm286_vm1, %v752_v8  ;;  %s662_s15 = sshll.u32 %s906_s18, 6 }
  0x12   : > { %679 = vmatprep.mubr.msk.bf16.mxu0 %vm356_vm0, %v724_v3  ;;  %683 = vmatprep.mubr.msk.bf16.mxu1 %vm356_vm0, %v726_v5  ;;  %v727_v7 = vld [vmem:[%s263_s6 + $0x18] sm:$0xff]   ;;  %s846_s24 = scalar_lea.vmem %s898_s3, %s662_s15 }
  0x14   : > { %678 = vmatpush3.bf16.msra.mxu0 %v723_v4  ;;  %694 = vmatpush3.bf16.msra.mxu1 %v723_v4 }
  0x17   : > { %680 = vmatmul.mubr.msk.bf16.vlgmr.msra.gmra.mrb[0].mxu0 %vm356_vm0, %v725_v6  ;;  %684 = vmatmul.mubr.msk.bf16.vlgmr.msra.gmra.mrb[0].mxu1 %vm356_vm0, %v727_v7 }
  0xea   : > { %v681_v10 = vpop.f32.mrb[0].mxu0  ;;  %v685_v11 = vpop.f32.mrb[0].mxu1 }
  0xeb   : > { %v412_v12 = vadd.f32 %v681_v10, %v646_v9  ;;  %v403_v13 = vpop.f32.mrb[1].mxu0  ;;  %v428_v14 = vadd.f32 %v685_v11, %v646_v9  ;;  %v419_v15 = vpop.f32.mrb[1].mxu1 }
  0xec   : > { %v404_v16 = vadd.f32 %v646_v9, %v403_v13  ;;  %v682_v17 = vpop.f32.mrb[2].mxu0  ;;  %v420_v18 = vadd.f32 %v646_v9, %v419_v15  ;;  %v686_v19 = vpop.f32.mrb[2].mxu1 }
  0xed   : > { %437 = vst.msk [vmem:[%s846_s24 + $0x10] sm:$0xff] %vm434_vm2, %v412_v12  ;;  %v415_v20 = vadd.f32 %v682_v17, %v646_v9  ;;  %v406_v21 = vpop.f32.mrb[3].mxu0  ;;  %441 = vst.msk [vmem:[%s846_s24 + $0x30] sm:$0xff] %vm434_vm2, %v428_v14  ;;  %v422_v22 = vpop.f32.mrb[3].mxu1  ;;  %v471_v25 = vmul.f32 %v412_v12, %v412_v12  ;;  %v447_v29 = vsel %vm434_vm2, %v412_v12, 0.0  ;;  %v431_v32 = vadd.f32 %v686_v19, %v646_v9 }
  0xee   : > { %435 = vst.msk [vmem:[%s846_s24] sm:$0xff] %vm434_vm2, %v404_v16  ;;  %v469_v23 = vmul.f32 %v404_v16, %v404_v16  ;;  %v407_v24 = vadd.f32 %v646_v9, %v406_v21  ;;  %439 = vst.msk [vmem:[%s846_s24 + $0x20] sm:$0xff] %vm434_vm2, %v420_v18  ;;  %v444_v26 = vsel %vm434_vm2, %v404_v16, 0.0  ;;  %v473_v35 = vmul.f32 %v420_v18, %v420_v18  ;;  %v468_v12 = vld [vmem:[%s833_s14] sm:$0x1] }
  0xef   : > { %438 = vst.msk [vmem:[%s846_s24 + $0x18] sm:$0xff] %vm434_vm2, %v415_v20  ;;  %v472_v30 = vmul.f32 %v415_v20, %v415_v20  ;;  %v423_v36 = vadd.f32 %v646_v9, %v422_v22  ;;  %442 = vst.msk [vmem:[%s846_s24 + $0x38] sm:$0xff] %vm434_vm2, %v431_v32  ;;  %v480_v39 = vsel %vm434_vm2, %v471_v25, 0.0  ;;  %v449_v40 = vsel %vm434_vm2, %v415_v20, 0.0  ;;  %v443_v9 = vld [vmem:[%s827_s11] sm:$0x1] }
  0xf0   : > { %436 = vst.msk [vmem:[%s846_s24 + $0x8] sm:$0xff] %vm434_vm2, %v407_v24  ;;  %v445_v27 = vsel %vm434_vm2, %v407_v24, 0.0  ;;  %v470_v28 = vmul.f32 %v407_v24, %v407_v24  ;;  %v477_v33 = vsel %vm434_vm2, %v469_v23, 0.0  ;;  %v451_v41 = vsel %vm434_vm2, %v420_v18, 0.0 }
  0xf1   : > { %v446_v31 = vadd.f32 %v445_v27, %v444_v26  ;;  %440 = vst.msk [vmem:[%s846_s24 + $0x28] sm:$0xff] %vm434_vm2, %v423_v36  ;;  %v482_v44 = vsel %vm434_vm2, %v472_v30, 0.0  ;;  %v484_v45 = vsel %vm434_vm2, %v473_v35, 0.0  ;;  %v474_v46 = vmul.f32 %v423_v36, %v423_v36 }
  0xf2   : > { %v478_v34 = vsel %vm434_vm2, %v470_v28, 0.0  ;;  %v475_v49 = vmul.f32 %v428_v14, %v428_v14  ;;  %v453_v50 = vsel %vm434_vm2, %v423_v36, 0.0  ;;  %v455_v53 = vsel %vm434_vm2, %v428_v14, 0.0 }
  0xf3   : > { %v448_v37 = vadd.f32 %v447_v29, %v446_v31  ;;  %v479_v38 = vadd.f32 %v478_v34, %v477_v33  ;;  %v476_v54 = vmul.f32 %v431_v32, %v431_v32  ;;  %v486_v55 = vsel %vm434_vm2, %v474_v46, 0.0 }
  0xf4   : > { %v488_v58 = vsel %vm434_vm2, %v475_v49, 0.0  ;;  %v457_v59 = vsel %vm434_vm2, %v431_v32, 0.0 }
  0xf5   : > { %v481_v42 = vadd.f32 %v480_v39, %v479_v38  ;;  %v450_v43 = vadd.f32 %v449_v40, %v448_v37  ;;  %v490_v62 = vsel %vm434_vm2, %v476_v54, 0.0 }
  0xf7   : > { %v452_v47 = vadd.f32 %v451_v41, %v450_v43  ;;  %v483_v48 = vadd.f32 %v482_v44, %v481_v42 }
  0xf9   : > { %v485_v51 = vadd.f32 %v484_v45, %v483_v48  ;;  %v454_v52 = vadd.f32 %v453_v50, %v452_v47 }
  0xfb   : > { %v456_v56 = vadd.f32 %v455_v53, %v454_v52  ;;  %v487_v57 = vadd.f32 %v486_v55, %v485_v51 }
  0xfd   : > { %v458_v60 = vadd.f32 %v457_v59, %v456_v56  ;;  %v489_v61 = vadd.f32 %v488_v58, %v487_v57 }
  0xff   : > { %v459_v63 = vrot.slane %v458_v60, 4  ;;  %v491_v0 = vadd.f32 %v490_v62, %v489_v61 }
 0x101   : > { %v460_v1 = vadd.f32 %v459_v63, %v458_v60  ;;  %v492_v2 = vrot.slane %v491_v0, 4 }
 0x103   : > { %v461_v3 = vrot.slane %v460_v1, 2  ;;  %v493_v4 = vadd.f32 %v492_v2, %v491_v0 }
 0x105   : > { %v462_v5 = vadd.f32 %v461_v3, %v460_v1  ;;  %v494_v6 = vrot.slane %v493_v4, 2 }
 0x107   : > { %v463_v7 = vrot.slane %v462_v5, 1  ;;  %v495_v8 = vadd.f32 %v494_v6, %v493_v4 }
 0x109   : > { %v464_v10 = vadd.f32 %v463_v7, %v462_v5  ;;  %v496_v11 = vrot.slane %v495_v8, 1 }
 0x10b   : > { %v465_v13 = vadd.f32 %v464_v10, %v443_v9  ;;  %v497_v14 = vadd.f32 %v496_v11, %v495_v8 }
 0x10d   : > { %467 = vst.msk [vmem:[%s827_s11] sm:$0x1] %vm286_vm1, %v465_v13  ;;  %v498_v15 = vadd.f32 %v497_v14, %v468_v12 }
 0x10f   : > { %499 = vst.msk [vmem:[%s833_s14] sm:$0x1] %vm286_vm1, %v498_v15 }
 0x110 PF: > { %s16_s20 = sadd.s32 1, %s750_s20   ;;  %s901_s18 = smov %s746_s19 }
 0x111   : > { %p13_p5 = scmp.ge.s32.totalorder %s16_s20, 4   ;;  %s902_s19 = smov %s904_s21 }
 0x113   :  { %15 = sbr.rel (!%p13_p5) target bundleno = 2 (0x2), region = 90 }

// kernel: infovae_forward.59
= control target key start
LH: loop header
LB: loop body
LE: loop exit
PB: predicated region body
PF: predicated region fallthrough
CT: control target
= control target key end

     0   :  { %s734_s18 = smov 0   ;;  %s736_s19 = smov 0   ;;  %s831_s0 = inlined_call_operand.vmem [shape: bf16[2,64,8], index: 0, kind: input, shape index: {}]   ;;  %s832_s1 = inlined_call_operand.vmem [shape: bf16[8,8], index: 1, kind: input, shape index: {}]   ;;  %s833_s2 = inlined_call_operand.vmem [shape: f32[1,8], index: 2, kind: input, shape index: {}]   ;;  %s834_s3 = inlined_call_operand.vmem [shape: f32[2,64,8], index: 3, kind: output, shape index: {0}]   ;;  %s835_s4 = inlined_call_operand.vmem [shape: f32[2,1,8], index: 4, kind: output, shape index: {1}]   ;;  %s836_s5 = inlined_call_operand.vmem [shape: f32[2,1,8], index: 5, kind: output, shape index: {2}]  }
   0x1   :  { %s738_s20 = smov 0  }
   0x2 LB: > { %s28_s21 = sadd.s32 1, %s697_s19  ;;  %p613_p0 = scmp.ge.s32.totalorder %s701_s20, 1  ;;  %s701_s20 = sphi %s738_s20, %s16_s20   ;;  %s697_s19 = sphi %s736_s19, %s838_s19   ;;  %s693_s18 = sphi %s734_s18, %s837_s18  }
   0x3   : > { %p30_p1 = scmp.ge.s32.totalorder %s28_s21, 2  ;;  %p213_p2 = scmp.lt.s32.totalorder %s701_s20, 3 }
   0x5   : > { %s840_s21 = smov (%p30_p1, %s28_s21), 0  ;;  %p214_p3 = pnand %p613_p0, %p213_p2 }
   0x6   : > { %v297_v0 = vld [vmem:[%s832_s1] sm:$0xf] (!%p214_p3)  ;;  %vm338_vm0 = vcmask (!%p214_p3), 1043456   ;;  %p256_p4 = scmp.lt.s32.totalorder (!%p214_p3), %s693_s18, 1  ;;  %vm325_vm1 = vcmask (!%p214_p3), 64512   ;;  %vm286_vm2 = vcmask (!%p214_p3), 57344  }
   0x7   : > { %217 = sbr.rel (%p214_p3) target bundleno = 268 (0x10c), region = 32  ;;  %648 = vmatprep.subr.msk.bf16.mxu0 (!%p214_p3), %vm338_vm0, %v297_v0  ;;  %v340_v1 = vsel (!%p214_p3), %vm338_vm0, %v297_v0, 0  ;;  %649 = vmatprep.subr.msk.bf16.mxu1 (!%p214_p3), %vm338_vm0, %v297_v0  ;;  %v703_v6 = vmov (!%p214_p3), 0.0   ;;  %v618_v7 = vld [vmem:[%s833_s2] ss:$0 sm:$0xff] (!%p214_p3) }
   0x8   : > { %637 = vmatpush3.bf16.msra.mxu0 (!%p214_p3), %v340_v1  ;;  %647 = vmatpush3.bf16.msra.mxu1 (!%p214_p3), %v340_v1 }
   0xe   : > { %s842_s18 = smov (!%p256_p4, %s693_s18), 1 }
   0xf   : > { %s629_s24 = sshll.u32 %s842_s18, 5  ;;  %s765_s30 = scalar_lea.vmem %s835_s4, %s842_s18 }
  0x10   : > { %s263_s27 = scalar_lea.vmem %s831_s0, %s629_s24  ;;  %s770_s8 = scalar_lea.vmem %s836_s5, %s842_s18  ;;  %287 = vst.msk [vmem:[%s765_s30] sm:$0x1] %vm286_vm2, %v703_v6 }
  0x11   : > { %v675_v2 = vld [vmem:[%s263_s27] sm:$0xff]   ;;  %v676_v3 = vld [vmem:[%s263_s27 + $0x8] sm:$0xff]   ;;  %v677_v4 = vld [vmem:[%s263_s27 + $0x10] sm:$0xff]   ;;  %288 = vst.msk [vmem:[%s770_s8] sm:$0x1] %vm286_vm2, %v703_v6  ;;  %s630_s9 = sshll.u32 %s842_s18, 6 }
  0x12   : > { %638 = vmatprep.mubr.msk.bf16.mxu0 %vm325_vm1, %v675_v2  ;;  %v678_v5 = vld [vmem:[%s263_s27 + $0x18] sm:$0xff]   ;;  %642 = vmatprep.mubr.msk.bf16.mxu1 %vm325_vm1, %v677_v4  ;;  %s782_s14 = scalar_lea.vmem %s834_s3, %s630_s9 }
  0x13   : > { %639 = vmatmul.mubr.msk.bf16.vlgmr.msra.gmra.mrb[0].mxu0 %vm325_vm1, %v676_v3  ;;  %643 = vmatmul.mubr.msk.bf16.vlgmr.msra.gmra.mrb[0].mxu1 %vm325_vm1, %v678_v5 }
  0xe6   : > { %v640_v8 = vpop.f32.mrb[0].mxu0  ;;  %v644_v13 = vpop.f32.mrb[0].mxu1 }
  0xe7   : > { %v385_v9 = vadd.f32 %v640_v8, %v618_v7  ;;  %v376_v10 = vpop.f32.mrb[1].mxu0  ;;  %v401_v16 = vadd.f32 %v644_v13, %v618_v7  ;;  %v392_v17 = vpop.f32.mrb[1].mxu1 }
  0xe8   : > { %v377_v11 = vadd.f32 %v618_v7, %v376_v10  ;;  %v641_v12 = vpop.f32.mrb[2].mxu0  ;;  %v393_v20 = vadd.f32 %v618_v7, %v392_v17  ;;  %v645_v21 = vpop.f32.mrb[2].mxu1  ;;  %v440_v10 = vld [vmem:[%s770_s8] sm:$0x1] }
  0xe9   : > { %409 = vst.msk [vmem:[%s782_s14 + $0x10] sm:$0xff] %vm325_vm1, %v385_v9  ;;  %v388_v14 = vadd.f32 %v641_v12, %v618_v7  ;;  %v379_v15 = vpop.f32.mrb[3].mxu0  ;;  %413 = vst.msk [vmem:[%s782_s14 + $0x30] sm:$0xff] %vm325_vm1, %v401_v16  ;;  %v395_v22 = vpop.f32.mrb[3].mxu1  ;;  %v443_v23 = vmul.f32 %v385_v9, %v385_v9  ;;  %v419_v27 = vsel %vm325_vm1, %v385_v9, 0.0  ;;  %v404_v33 = vadd.f32 %v645_v21, %v618_v7 }
  0xea   : > { %407 = vst.msk [vmem:[%s782_s14] sm:$0xff] %vm325_vm1, %v377_v11  ;;  %v441_v18 = vmul.f32 %v377_v11, %v377_v11  ;;  %v380_v19 = vadd.f32 %v618_v7, %v379_v15  ;;  %v416_v24 = vsel %vm325_vm1, %v377_v11, 0.0  ;;  %411 = vst.msk [vmem:[%s782_s14 + $0x20] sm:$0xff] %vm325_vm1, %v393_v20  ;;  %v445_v32 = vmul.f32 %v393_v20, %v393_v20 }
  0xeb   : > { %410 = vst.msk [vmem:[%s782_s14 + $0x18] sm:$0xff] %vm325_vm1, %v388_v14  ;;  %v444_v29 = vmul.f32 %v388_v14, %v388_v14  ;;  %v396_v34 = vadd.f32 %v618_v7, %v395_v22  ;;  %v452_v37 = vsel %vm325_vm1, %v443_v23, 0.0  ;;  %v421_v38 = vsel %vm325_vm1, %v388_v14, 0.0  ;;  %414 = vst.msk [vmem:[%s782_s14 + $0x38] sm:$0xff] %vm325_vm1, %v404_v33  ;;  %v415_v7 = vld [vmem:[%s765_s30] sm:$0x1] }
  0xec   : > { %408 = vst.msk [vmem:[%s782_s14 + $0x8] sm:$0xff] %vm325_vm1, %v380_v19  ;;  %v417_v25 = vsel %vm325_vm1, %v380_v19, 0.0  ;;  %v442_v26 = vmul.f32 %v380_v19, %v380_v19  ;;  %v449_v28 = vsel %vm325_vm1, %v441_v18, 0.0  ;;  %v423_v39 = vsel %vm325_vm1, %v393_v20, 0.0 }
  0xed   : > { %v418_v30 = vadd.f32 %v417_v25, %v416_v24  ;;  %412 = vst.msk [vmem:[%s782_s14 + $0x28] sm:$0xff] %vm325_vm1, %v396_v34  ;;  %v454_v42 = vsel %vm325_vm1, %v444_v29, 0.0  ;;  %v456_v43 = vsel %vm325_vm1, %v445_v32, 0.0  ;;  %v446_v44 = vmul.f32 %v396_v34, %v396_v34 }
  0xee   : > { %v450_v31 = vsel %vm325_vm1, %v442_v26, 0.0  ;;  %v447_v47 = vmul.f32 %v401_v16, %v401_v16  ;;  %v425_v48 = vsel %vm325_vm1, %v396_v34, 0.0  ;;  %v427_v51 = vsel %vm325_vm1, %v401_v16, 0.0 }
  0xef   : > { %v420_v35 = vadd.f32 %v419_v27, %v418_v30  ;;  %v451_v36 = vadd.f32 %v450_v31, %v449_v28  ;;  %v448_v52 = vmul.f32 %v404_v33, %v404_v33  ;;  %v458_v53 = vsel %vm325_vm1, %v446_v44, 0.0 }
  0xf0   : > { %v460_v56 = vsel %vm325_vm1, %v447_v47, 0.0  ;;  %v429_v57 = vsel %vm325_vm1, %v404_v33, 0.0 }
  0xf1   : > { %v453_v40 = vadd.f32 %v452_v37, %v451_v36  ;;  %v422_v41 = vadd.f32 %v421_v38, %v420_v35  ;;  %v462_v60 = vsel %vm325_vm1, %v448_v52, 0.0 }
  0xf3   : > { %v424_v45 = vadd.f32 %v423_v39, %v422_v41  ;;  %v455_v46 = vadd.f32 %v454_v42, %v453_v40 }
  0xf5   : > { %v457_v49 = vadd.f32 %v456_v43, %v455_v46  ;;  %v426_v50 = vadd.f32 %v425_v48, %v424_v45 }
  0xf7   : > { %v428_v54 = vadd.f32 %v427_v51, %v426_v50  ;;  %v459_v55 = vadd.f32 %v458_v53, %v457_v49 }
  0xf9   : > { %v430_v58 = vadd.f32 %v429_v57, %v428_v54  ;;  %v461_v59 = vadd.f32 %v460_v56, %v459_v55 }
  0xfb   : > { %v431_v61 = vrot.slane %v430_v58, 4  ;;  %v463_v62 = vadd.f32 %v462_v60, %v461_v59 }
  0xfd   : > { %v432_v63 = vadd.f32 %v431_v61, %v430_v58  ;;  %v464_v0 = vrot.slane %v463_v62, 4 }
  0xff   : > { %v433_v1 = vrot.slane %v432_v63, 2  ;;  %v465_v2 = vadd.f32 %v464_v0, %v463_v62 }
 0x101   : > { %v434_v3 = vadd.f32 %v433_v1, %v432_v63  ;;  %v466_v4 = vrot.slane %v465_v2, 2 }
 0x103   : > { %v435_v5 = vrot.slane %v434_v3, 1  ;;  %v467_v6 = vadd.f32 %v466_v4, %v465_v2 }
 0x105   : > { %v436_v8 = vadd.f32 %v435_v5, %v434_v3  ;;  %v468_v9 = vrot.slane %v467_v6, 1 }
 0x107   : > { %v437_v11 = vadd.f32 %v436_v8, %v415_v7  ;;  %v469_v12 = vadd.f32 %v468_v9, %v467_v6 }
 0x109   : > { %439 = vst.msk [vmem:[%s765_s30] sm:$0x1] %vm286_vm2, %v437_v11  ;;  %v470_v13 = vadd.f32 %v469_v12, %v440_v10 }
 0x10b   : > { %471 = vst.msk [vmem:[%s770_s8] sm:$0x1] %vm286_vm2, %v470_v13 }
 0x10c PF: > { %s16_s20 = sadd.s32 1, %s701_s20   ;;  %s837_s18 = smov %s697_s19 }
 0x10d   : > { %p13_p5 = scmp.ge.s32.totalorder %s16_s20, 4   ;;  %s838_s19 = smov %s840_s21 }
 0x10f   :  { %15 = sbr.rel (!%p13_p5) target bundleno = 2 (0x2), region = 90 }

// kernel: infovae_forward.75
= control target key start
LH: loop header
LB: loop body
LE: loop exit
PB: predicated region body
PF: predicated region fallthrough
CT: control target
= control target key end

     0   :  { %s1558_s12 = smov 0   ;;  %s1560_s13 = smov 0   ;;  %s1965_s0 = inlined_call_operand.vmem [shape: bf16[2,512,216], index: 0, kind: input, shape index: {}]   ;;  %s1966_s1 = inlined_call_operand.vmem [shape: bf16[216,4], index: 1, kind: input, shape index: {}]   ;;  %s1967_s2 = inlined_call_operand.vmem [shape: f32[1,4], index: 2, kind: input, shape index: {}]   ;;  %s1968_s3 = inlined_call_operand.vmem [shape: f32[2,512,4], index: 3, kind: output, shape index: {}]  }
   0x1   :  { %s1562_s14 = smov 0  }
   0x2 LB: > { %s25_s15 = sadd.s32 1, %s1531_s13  ;;  %p1230_p0 = scmp.ge.s32.totalorder %s1535_s14, 1  ;;  %s1535_s14 = sphi %s1562_s14, %s13_s14   ;;  %s1531_s13 = sphi %s1560_s13, %s1970_s13   ;;  %s1527_s12 = sphi %s1558_s12, %s1969_s12  }
   0x3   : > { %p27_p1 = scmp.ge.s32.totalorder %s25_s15, 2  ;;  %p159_p2 = scmp.lt.s32.totalorder %s1535_s14, 3 }
   0x5   : > { %s1972_s15 = smov (%p27_p1, %s25_s15), 0  ;;  %p160_p3 = pnand %p1230_p0, %p159_p2 }
   0x6   : > { %v1403_v0 = vld [vmem:[%s1966_s1] sm:$0xff] (!%p160_p3)   ;;  %v1537_v1 = vmov (!%p160_p3), 0   ;;  %v1404_v2 = vld [vmem:[%s1966_s1 + $0x8] sm:$0xff] (!%p160_p3)   ;;  %p193_p4 = scmp.lt.s32.totalorder (!%p160_p3), %s1527_s12, 1  ;;  %v1405_v3 = vld [vmem:[%s1966_s1 + $0x10] sm:$0xff] (!%p160_p3)   ;;  %vm681_vm0 = vcmask (!%p160_p3), 719872  }
   0x7   : > { %163 = sbr.rel (%p160_p3) target bundleno = 400 (0x190), region = 32  ;;  %782 = vmatprep.subr.bf16.mxu0 (!%p160_p3), %v1537_v1  ;;  %1350 = vmatprep.subr.bf16.mxu1 (!%p160_p3), %v1537_v1  ;;  %v1406_v4 = vld [vmem:[%s1966_s1 + $0x18] sm:$0xff] (!%p160_p3)   ;;  %v1407_v5 = vld [vmem:[%s1966_s1 + $0x20] sm:$0xff] (!%p160_p3)   ;;  %v1408_v8 = vld [vmem:[%s1966_s1 + $0x28] sm:$0xff] (!%p160_p3)   ;;  %vm778_vm1 = vcmask (!%p160_p3), 1043456   ;;  %vm1071_vm2 = vcmask (!%p160_p3), 31744  }
   0x8   : > { %783 = vmatpush1.bf16.msra.mxu0 (!%p160_p3), %v1403_v0  ;;  %1364 = vmatpush1.bf16.msra.mxu1 (!%p160_p3), %v1403_v0  ;;  %v1409_v9 = vld [vmem:[%s1966_s1 + $0x30] sm:$0xff] (!%p160_p3)   ;;  %v1410_v10 = vld [vmem:[%s1966_s1 + $0x38] sm:$0xff] (!%p160_p3)   ;;  %v1411_v11 = vld [vmem:[%s1966_s1 + $0x40] sm:$0xff] (!%p160_p3)  }
   0x9   : > { %784 = vmatprep.subr.bf16.mxu0 (!%p160_p3), %v1537_v1  ;;  %1351 = vmatprep.subr.bf16.mxu1 (!%p160_p3), %v1537_v1  ;;  %v1412_v12 = vld [vmem:[%s1966_s1 + $0x48] sm:$0xff] (!%p160_p3)   ;;  %v1413_v13 = vld [vmem:[%s1966_s1 + $0x50] sm:$0xff] (!%p160_p3)   ;;  %v1414_v14 = vld [vmem:[%s1966_s1 + $0x58] sm:$0xff] (!%p160_p3)  }
   0xa   : > { %v1415_v15 = vld [vmem:[%s1966_s1 + $0x60] sm:$0xff] (!%p160_p3)   ;;  %v1416_v16 = vld [vmem:[%s1966_s1 + $0x68] ss:$0 sps:$4 sm:$0xff] (!%p160_p3)  }
   0xb   : > { %v780_v17 = vsel (!%p160_p3), %vm778_vm1, %v1416_v16, 0  ;;  %v1755_v16 = vld [vmem:[%s1967_s2] ss:$0 sm:$0xff] (!%p160_p3) }
   0xc   : > { %785 = vmatpush1.bf16.msra.mxu0 (!%p160_p3), %v1404_v2  ;;  %1365 = vmatpush1.bf16.msra.mxu1 (!%p160_p3), %v1404_v2 }
   0xd   : > { %786 = vmatprep.subr.bf16.mxu0 (!%p160_p3), %v1537_v1  ;;  %1352 = vmatprep.subr.bf16.mxu1 (!%p160_p3), %v1537_v1 }
   0xe   : > { %s1974_s12 = smov (!%p193_p4, %s1527_s12), 1 }
   0xf   : > { %s1348_s22 = sshll.u32 %s1974_s12, 9 }
  0x10   : > { %787 = vmatpush1.bf16.msra.mxu0 %v1405_v3  ;;  %1366 = vmatpush1.bf16.msra.mxu1 %v1405_v3  ;;  %s1604_s27 = scalar_lea.vmem %s1965_s0, %s1348_s22  ;;  %s1762_s4 = scalar_lea.vmem %s1968_s3, %s1348_s22 }
  0x11   : > { %788 = vmatprep.subr.bf16.mxu0 %v1537_v1  ;;  %1353 = vmatprep.subr.bf16.mxu1 %v1537_v1  ;;  %v1419_v6 = vld [vmem:[%s1604_s27 + $0x4] ss:$8 sps:$4 sm:$0xff]   ;;  %v1417_v18 = vld [vmem:[%s1604_s27] ss:$8 sps:$4 sm:$0xff]   ;;  %v1423_v20 = vld [vmem:[%s1604_s27 + $0x14] ss:$8 sps:$4 sm:$0xff]  }
  0x12   : > { %1314 = vmatprep.mubr.msk.bf16.mxu0 %vm681_vm0, %v1419_v6  ;;  %v1422_v7 = vld [vmem:[%s1604_s27 + $0x104] ss:$8 sps:$4 sm:$0xff]   ;;  %v1420_v19 = vld [vmem:[%s1604_s27 + $0x100] ss:$8 sps:$4 sm:$0xff]   ;;  %v1425_v21 = vld [vmem:[%s1604_s27 + $0x114] ss:$8 sps:$4 sm:$0xff]  }
  0x13   : > { %1330 = vmatprep.mubr.msk.bf16.mxu1 %vm681_vm0, %v1422_v7  ;;  %v1427_v22 = vld [vmem:[%s1604_s27 + $0x10] ss:$8 sps:$4 sm:$0xff]   ;;  %v1429_v24 = vld [vmem:[%s1604_s27 + $0x24] ss:$8 sps:$4 sm:$0xff]   ;;  %v1433_v26 = vld [vmem:[%s1604_s27 + $0x20] ss:$8 sps:$4 sm:$0xff]  }
  0x14   : > { %789 = vmatpush1.bf16.msra.mxu0 %v1406_v4  ;;  %1367 = vmatpush1.bf16.msra.mxu1 %v1406_v4  ;;  %v1428_v23 = vld [vmem:[%s1604_s27 + $0x110] ss:$8 sps:$4 sm:$0xff]   ;;  %v1431_v25 = vld [vmem:[%s1604_s27 + $0x124] ss:$8 sps:$4 sm:$0xff]   ;;  %v1434_v27 = vld [vmem:[%s1604_s27 + $0x120] ss:$8 sps:$4 sm:$0xff]  }
  0x15   : > { %790 = vmatprep.subr.bf16.mxu0 %v1537_v1  ;;  %1354 = vmatprep.subr.bf16.mxu1 %v1537_v1  ;;  %v1435_v28 = vld [vmem:[%s1604_s27 + $0x34] ss:$8 sps:$4 sm:$0xff]   ;;  %v1439_v30 = vld [vmem:[%s1604_s27 + $0x30] ss:$8 sps:$4 sm:$0xff]   ;;  %v1441_v32 = vld [vmem:[%s1604_s27 + $0x44] ss:$8 sps:$4 sm:$0xff]  }
  0x16   : > { %v1437_v29 = vld [vmem:[%s1604_s27 + $0x134] ss:$8 sps:$4 sm:$0xff]   ;;  %v1440_v31 = vld [vmem:[%s1604_s27 + $0x130] ss:$8 sps:$4 sm:$0xff]   ;;  %v1443_v33 = vld [vmem:[%s1604_s27 + $0x144] ss:$8 sps:$4 sm:$0xff]  }
  0x17   : > { %v1445_v34 = vld [vmem:[%s1604_s27 + $0x40] ss:$8 sps:$4 sm:$0xff]   ;;  %v1447_v36 = vld [vmem:[%s1604_s27 + $0x54] ss:$8 sps:$4 sm:$0xff]   ;;  %v1451_v38 = vld [vmem:[%s1604_s27 + $0x50] ss:$8 sps:$4 sm:$0xff]  }
  0x18   : > { %791 = vmatpush1.bf16.msra.mxu0 %v1407_v5  ;;  %1368 = vmatpush1.bf16.msra.mxu1 %v1407_v5  ;;  %v1446_v35 = vld [vmem:[%s1604_s27 + $0x140] ss:$8 sps:$4 sm:$0xff]   ;;  %v1449_v37 = vld [vmem:[%s1604_s27 + $0x154] ss:$8 sps:$4 sm:$0xff]   ;;  %v1452_v39 = vld [vmem:[%s1604_s27 + $0x150] ss:$8 sps:$4 sm:$0xff]  }
  0x19   : > { %792 = vmatprep.subr.bf16.mxu0 %v1537_v1  ;;  %1355 = vmatprep.subr.bf16.mxu1 %v1537_v1  ;;  %v1453_v40 = vld [vmem:[%s1604_s27 + $0x64] ss:$8 sps:$4 sm:$0xff]   ;;  %v1457_v42 = vld [vmem:[%s1604_s27 + $0x60] ss:$8 sps:$4 sm:$0xff]   ;;  %v1459_v44 = vld [vmem:[%s1604_s27 + $0x74] ss:$8 sps:$4 sm:$0xff]  }
  0x1a   : > { %v1455_v41 = vld [vmem:[%s1604_s27 + $0x164] ss:$8 sps:$4 sm:$0xff]   ;;  %v1458_v43 = vld [vmem:[%s1604_s27 + $0x160] ss:$8 sps:$4 sm:$0xff]   ;;  %v1461_v45 = vld [vmem:[%s1604_s27 + $0x174] ss:$8 sps:$4 sm:$0xff]  }
  0x1b   : > { %v1463_v46 = vld [vmem:[%s1604_s27 + $0x70] ss:$8 sps:$4 sm:$0xff]   ;;  %v1465_v48 = vld [vmem:[%s1604_s27 + $0x84] ss:$8 sps:$4 sm:$0xff]   ;;  %v1469_v50 = vld [vmem:[%s1604_s27 + $0x80] ss:$8 sps:$4 sm:$0xff]  }
  0x1c   : > { %793 = vmatpush1.bf16.msra.mxu0 %v1408_v8  ;;  %1369 = vmatpush1.bf16.msra.mxu1 %v1408_v8  ;;  %v1464_v47 = vld [vmem:[%s1604_s27 + $0x170] ss:$8 sps:$4 sm:$0xff]   ;;  %v1467_v49 = vld [vmem:[%s1604_s27 + $0x184] ss:$8 sps:$4 sm:$0xff]   ;;  %v1470_v51 = vld [vmem:[%s1604_s27 + $0x180] ss:$8 sps:$4 sm:$0xff]  }
  0x1d   : > { %794 = vmatprep.subr.bf16.mxu0 %v1537_v1  ;;  %1356 = vmatprep.subr.bf16.mxu1 %v1537_v1  ;;  %v1471_v52 = vld [vmem:[%s1604_s27 + $0x94] ss:$8 sps:$4 sm:$0xff]   ;;  %v1475_v54 = vld [vmem:[%s1604_s27 + $0x90] ss:$8 sps:$4 sm:$0xff]   ;;  %v1477_v56 = vld [vmem:[%s1604_s27 + $0xa4] ss:$8 sps:$4 sm:$0xff]  }
  0x1e   : > { %v1473_v53 = vld [vmem:[%s1604_s27 + $0x194] ss:$8 sps:$4 sm:$0xff]   ;;  %v1476_v55 = vld [vmem:[%s1604_s27 + $0x190] ss:$8 sps:$4 sm:$0xff]   ;;  %v1479_v57 = vld [vmem:[%s1604_s27 + $0x1a4] ss:$8 sps:$4 sm:$0xff]  }
  0x1f   : > { %v1481_v58 = vld [vmem:[%s1604_s27 + $0xa0] ss:$8 sps:$4 sm:$0xff]   ;;  %v1483_v60 = vld [vmem:[%s1604_s27 + $0xb4] ss:$8 sps:$4 sm:$0xff]   ;;  %v1487_v62 = vld [vmem:[%s1604_s27 + $0xb0] ss:$8 sps:$4 sm:$0xff]  }
  0x20   : > { %795 = vmatpush1.bf16.msra.mxu0 %v1409_v9  ;;  %1370 = vmatpush1.bf16.msra.mxu1 %v1409_v9  ;;  %v1482_v59 = vld [vmem:[%s1604_s27 + $0x1a0] ss:$8 sps:$4 sm:$0xff]   ;;  %v1485_v61 = vld [vmem:[%s1604_s27 + $0x1b4] ss:$8 sps:$4 sm:$0xff]   ;;  %v1488_v63 = vld [vmem:[%s1604_s27 + $0x1b0] ss:$8 sps:$4 sm:$0xff]  }
  0x21   : > { %796 = vmatprep.subr.bf16.mxu0 %v1537_v1  ;;  %1357 = vmatprep.subr.bf16.mxu1 %v1537_v1  ;;  %v1489_v0 = vld [vmem:[%s1604_s27 + $0xc4] ss:$8 sps:$4 sm:$0xff]   ;;  %v1493_v2 = vld [vmem:[%s1604_s27 + $0xc0] ss:$8 sps:$4 sm:$0xff]   ;;  %v1495_v4 = vld [vmem:[%s1604_s27 + $0xd4] ss:$8 sps:$4 sm:$0xff]  }
  0x22   : > { %v1494_v3 = vld [vmem:[%s1604_s27 + $0x1c0] ss:$8 sps:$4 sm:$0xff]   ;;  %v1497_v5 = vld [vmem:[%s1604_s27 + $0x1d4] ss:$8 sps:$4 sm:$0xff]   ;;  %v1499_v6 = vld [vmem:[%s1604_s27 + $0xd0] ss:$8 sps:$4 sm:$0xff]  }
  0x23   : > { %v1500_v7 = vld [vmem:[%s1604_s27 + $0x1d0] ss:$8 sps:$4 sm:$0xff]   ;;  %v1501_v8 = vld [vmem:[%s1604_s27 + $0xe4] ss:$8 sps:$4 sm:$0xff]  }
  0x24   : > { %797 = vmatpush1.bf16.msra.mxu0 %v1410_v10  ;;  %1371 = vmatpush1.bf16.msra.mxu1 %v1410_v10  ;;  %v1503_v9 = vld [vmem:[%s1604_s27 + $0x1e4] ss:$8 sps:$4 sm:$0xff]   ;;  %v1505_v10 = vld [vmem:[%s1604_s27 + $0xe0] ss:$8 sps:$4 sm:$0xff]  }
  0x25   : > { %798 = vmatprep.subr.bf16.mxu0 %v1537_v1  ;;  %1358 = vmatprep.subr.bf16.mxu1 %v1537_v1 }
  0x28   : > { %799 = vmatpush1.bf16.msra.mxu0 %v1411_v11  ;;  %1372 = vmatpush1.bf16.msra.mxu1 %v1411_v11  ;;  %v1506_v11 = vld [vmem:[%s1604_s27 + $0x1e0] ss:$8 sps:$4 sm:$0xff]  }
  0x29   : > { %800 = vmatprep.subr.bf16.mxu0 %v1537_v1  ;;  %1359 = vmatprep.subr.bf16.mxu1 %v1537_v1 }
  0x2c   : > { %801 = vmatpush1.bf16.msra.mxu0 %v1412_v12  ;;  %1373 = vmatpush1.bf16.msra.mxu1 %v1412_v12  ;;  %v1507_v12 = vld [vmem:[%s1604_s27 + $0xf4] ss:$8 sps:$4 sm:$0xff]  }
  0x2d   : > { %802 = vmatprep.subr.bf16.mxu0 %v1537_v1  ;;  %1360 = vmatprep.subr.bf16.mxu1 %v1537_v1 }
  0x30   : > { %803 = vmatpush1.bf16.msra.mxu0 %v1413_v13  ;;  %1374 = vmatpush1.bf16.msra.mxu1 %v1413_v13  ;;  %v1509_v13 = vld [vmem:[%s1604_s27 + $0x1f4] ss:$8 sps:$4 sm:$0xff]  }
  0x31   : > { %804 = vmatprep.subr.bf16.mxu0 %v1537_v1  ;;  %1361 = vmatprep.subr.bf16.mxu1 %v1537_v1 }
  0x34   : > { %805 = vmatpush1.bf16.msra.mxu0 %v1414_v14  ;;  %1375 = vmatpush1.bf16.msra.mxu1 %v1414_v14  ;;  %v1511_v14 = vld [vmem:[%s1604_s27 + $0xf0] ss:$8 sps:$4 sm:$0xff]  }
  0x35   : > { %806 = vmatprep.subr.bf16.mxu0 %v1537_v1  ;;  %1362 = vmatprep.subr.bf16.mxu1 %v1537_v1 }
  0x38   : > { %807 = vmatpush1.bf16.msra.mxu0 %v1415_v15  ;;  %1376 = vmatpush1.bf16.msra.mxu1 %v1415_v15  ;;  %v1512_v15 = vld [vmem:[%s1604_s27 + $0x1f0] ss:$8 sps:$4 sm:$0xff]  }
  0x39   : > { %808 = vmatprep.subr.bf16.mxu0 %v1537_v1  ;;  %1363 = vmatprep.subr.bf16.mxu1 %v1537_v1  ;;  %v1491_v1 = vld [vmem:[%s1604_s27 + $0x1c4] ss:$8 sps:$4 sm:$0xff]  }
  0x3c   : > { %809 = vmatpush1.bf16.msra.mxu0 %v780_v17  ;;  %1377 = vmatpush1.bf16.msra.mxu1 %v780_v17 }
  0x3f   : > { %815 = vmatmul.mubr.bf16.vlgmr.msra.gmra.mrb[0].mxu0 %v1417_v18  ;;  %943 = vmatmul.mubr.bf16.vlgmr.msra.gmra.mrb[0].mxu1 %v1420_v19 }
  0x40   : > { %1315 = vmatprep.mubr.msk.bf16.mxu0 %vm681_vm0, %v1423_v20  ;;  %1331 = vmatprep.mubr.msk.bf16.mxu1 %vm681_vm0, %v1425_v21 }
  0x47   : > { %823 = vmatmul.mubr.bf16.gmra.mrb[4].mxu0 %v1427_v22  ;;  %951 = vmatmul.mubr.bf16.gmra.mrb[4].mxu1 %v1428_v23 }
  0x48   : > { %1316 = vmatprep.mubr.msk.bf16.mxu0 %vm681_vm0, %v1429_v24  ;;  %1332 = vmatprep.mubr.msk.bf16.mxu1 %vm681_vm0, %v1431_v25 }
  0x4f   : > { %831 = vmatmul.mubr.bf16.gmra.mrb[8].mxu0 %v1433_v26  ;;  %959 = vmatmul.mubr.bf16.gmra.mrb[8].mxu1 %v1434_v27 }
  0x50   : > { %1317 = vmatprep.mubr.msk.bf16.mxu0 %vm681_vm0, %v1435_v28  ;;  %1333 = vmatprep.mubr.msk.bf16.mxu1 %vm681_vm0, %v1437_v29 }
  0x57   : > { %839 = vmatmul.mubr.bf16.gmra.mrb[12].mxu0 %v1439_v30  ;;  %967 = vmatmul.mubr.bf16.gmra.mrb[12].mxu1 %v1440_v31 }
  0x58   : > { %1318 = vmatprep.mubr.msk.bf16.mxu0 %vm681_vm0, %v1441_v32  ;;  %1334 = vmatprep.mubr.msk.bf16.mxu1 %vm681_vm0, %v1443_v33 }
  0x5f   : > { %847 = vmatmul.mubr.bf16.gmra.mrb[16].mxu0 %v1445_v34  ;;  %975 = vmatmul.mubr.bf16.gmra.mrb[16].mxu1 %v1446_v35 }
  0x60   : > { %1319 = vmatprep.mubr.msk.bf16.mxu0 %vm681_vm0, %v1447_v36  ;;  %1335 = vmatprep.mubr.msk.bf16.mxu1 %vm681_vm0, %v1449_v37 }
  0x67   : > { %855 = vmatmul.mubr.bf16.gmra.mrb[20].mxu0 %v1451_v38  ;;  %983 = vmatmul.mubr.bf16.gmra.mrb[20].mxu1 %v1452_v39 }
  0x68   : > { %1320 = vmatprep.mubr.msk.bf16.mxu0 %vm681_vm0, %v1453_v40  ;;  %1336 = vmatprep.mubr.msk.bf16.mxu1 %vm681_vm0, %v1455_v41 }
  0x6f   : > { %863 = vmatmul.mubr.bf16.gmra.mrb[24].mxu0 %v1457_v42  ;;  %991 = vmatmul.mubr.bf16.gmra.mrb[24].mxu1 %v1458_v43 }
  0x70   : > { %1321 = vmatprep.mubr.msk.bf16.mxu0 %vm681_vm0, %v1459_v44  ;;  %1337 = vmatprep.mubr.msk.bf16.mxu1 %vm681_vm0, %v1461_v45 }
  0x77   : > { %871 = vmatmul.mubr.bf16.gmra.mrb[28].mxu0 %v1463_v46  ;;  %999 = vmatmul.mubr.bf16.gmra.mrb[28].mxu1 %v1464_v47 }
  0x78   : > { %1322 = vmatprep.mubr.msk.bf16.mxu0 %vm681_vm0, %v1465_v48  ;;  %1338 = vmatprep.mubr.msk.bf16.mxu1 %vm681_vm0, %v1467_v49 }
  0x7f   : > { %879 = vmatmul.mubr.bf16.gmra.mrb[32].mxu0 %v1469_v50  ;;  %1007 = vmatmul.mubr.bf16.gmra.mrb[32].mxu1 %v1470_v51 }
  0x80   : > { %1323 = vmatprep.mubr.msk.bf16.mxu0 %vm681_vm0, %v1471_v52  ;;  %1339 = vmatprep.mubr.msk.bf16.mxu1 %vm681_vm0, %v1473_v53 }
  0x87   : > { %887 = vmatmul.mubr.bf16.gmra.mrb[36].mxu0 %v1475_v54  ;;  %1015 = vmatmul.mubr.bf16.gmra.mrb[36].mxu1 %v1476_v55 }
  0x88   : > { %1324 = vmatprep.mubr.msk.bf16.mxu0 %vm681_vm0, %v1477_v56  ;;  %1340 = vmatprep.mubr.msk.bf16.mxu1 %vm681_vm0, %v1479_v57 }
  0x8f   : > { %895 = vmatmul.mubr.bf16.gmra.mrb[40].mxu0 %v1481_v58  ;;  %1023 = vmatmul.mubr.bf16.gmra.mrb[40].mxu1 %v1482_v59 }
  0x90   : > { %1325 = vmatprep.mubr.msk.bf16.mxu0 %vm681_vm0, %v1483_v60  ;;  %1341 = vmatprep.mubr.msk.bf16.mxu1 %vm681_vm0, %v1485_v61 }
  0x97   : > { %903 = vmatmul.mubr.bf16.gmra.mrb[44].mxu0 %v1487_v62  ;;  %1031 = vmatmul.mubr.bf16.gmra.mrb[44].mxu1 %v1488_v63 }
  0x98   : > { %1326 = vmatprep.mubr.msk.bf16.mxu0 %vm681_vm0, %v1489_v0  ;;  %1342 = vmatprep.mubr.msk.bf16.mxu1 %vm681_vm0, %v1491_v1 }
  0x9f   : > { %911 = vmatmul.mubr.bf16.gmra.mrb[48].mxu0 %v1493_v2  ;;  %1039 = vmatmul.mubr.bf16.gmra.mrb[48].mxu1 %v1494_v3 }
  0xa0   : > { %1327 = vmatprep.mubr.msk.bf16.mxu0 %vm681_vm0, %v1495_v4  ;;  %1343 = vmatprep.mubr.msk.bf16.mxu1 %vm681_vm0, %v1497_v5 }
  0xa7   : > { %919 = vmatmul.mubr.bf16.gmra.mrb[52].mxu0 %v1499_v6  ;;  %1047 = vmatmul.mubr.bf16.gmra.mrb[52].mxu1 %v1500_v7 }
  0xa8   : > { %1328 = vmatprep.mubr.msk.bf16.mxu0 %vm681_vm0, %v1501_v8  ;;  %1344 = vmatprep.mubr.msk.bf16.mxu1 %vm681_vm0, %v1503_v9 }
  0xaf   : > { %927 = vmatmul.mubr.bf16.gmra.mrb[56].mxu0 %v1505_v10  ;;  %1055 = vmatmul.mubr.bf16.gmra.mrb[56].mxu1 %v1506_v11 }
  0xb0   : > { %1329 = vmatprep.mubr.msk.bf16.mxu0 %vm681_vm0, %v1507_v12  ;;  %1345 = vmatprep.mubr.msk.bf16.mxu1 %vm681_vm0, %v1509_v13 }
  0xb7   : > { %935 = vmatmul.mubr.bf16.gmra.mrb[60].mxu0 %v1511_v14  ;;  %1063 = vmatmul.mubr.bf16.gmra.mrb[60].mxu1 %v1512_v15 }
 0x112   : > { %v816_v17 = vpop.f32.mrb[0].mxu0  ;;  %v944_v18 = vpop.f32.mrb[0].mxu1 }
 0x113   : > { %v817_v19 = vadd.f32 %v1755_v16, %v816_v17  ;;  %v945_v20 = vadd.f32 %v1755_v16, %v944_v18  ;;  %v818_v21 = vpop.f32.mrb[1].mxu0  ;;  %v946_v22 = vpop.f32.mrb[1].mxu1 }
 0x114   : > { %v819_v23 = vpop.f32.mrb[2].mxu0  ;;  %v947_v24 = vpop.f32.mrb[2].mxu1 }
 0x115   : > { %1072 = vst.msk [vmem:[%s1762_s4] sm:$0xff] %vm1071_vm2, %v817_v19  ;;  %1104 = vst.msk [vmem:[%s1762_s4 + $0x100] sm:$0xff] %vm1071_vm2, %v945_v20  ;;  %v820_v25 = vadd.f32 %v1755_v16, %v819_v23  ;;  %v948_v26 = vadd.f32 %v1755_v16, %v947_v24  ;;  %v821_v27 = vpop.f32.mrb[3].mxu0  ;;  %v949_v28 = vpop.f32.mrb[3].mxu1 }
 0x117   : > { %1073 = vst.msk [vmem:[%s1762_s4 + $0x8] sm:$0xff] %vm1071_vm2, %v820_v25  ;;  %1105 = vst.msk [vmem:[%s1762_s4 + $0x108] sm:$0xff] %vm1071_vm2, %v948_v26 }
 0x11a   : > { %v824_v29 = vpop.f32.mrb[4].mxu0  ;;  %v952_v30 = vpop.f32.mrb[4].mxu1 }
 0x11b   : > { %v825_v31 = vadd.f32 %v1755_v16, %v824_v29  ;;  %v953_v32 = vadd.f32 %v1755_v16, %v952_v30  ;;  %v826_v33 = vpop.f32.mrb[5].mxu0  ;;  %v954_v34 = vpop.f32.mrb[5].mxu1 }
 0x11c   : > { %v827_v35 = vpop.f32.mrb[6].mxu0  ;;  %v955_v36 = vpop.f32.mrb[6].mxu1 }
 0x11d   : > { %1074 = vst.msk [vmem:[%s1762_s4 + $0x10] sm:$0xff] %vm1071_vm2, %v825_v31  ;;  %1106 = vst.msk [vmem:[%s1762_s4 + $0x110] sm:$0xff] %vm1071_vm2, %v953_v32  ;;  %v828_v37 = vadd.f32 %v1755_v16, %v827_v35  ;;  %v956_v38 = vadd.f32 %v1755_v16, %v955_v36  ;;  %v829_v39 = vpop.f32.mrb[7].mxu0  ;;  %v957_v40 = vpop.f32.mrb[7].mxu1 }
 0x11f   : > { %1075 = vst.msk [vmem:[%s1762_s4 + $0x18] sm:$0xff] %vm1071_vm2, %v828_v37  ;;  %1107 = vst.msk [vmem:[%s1762_s4 + $0x118] sm:$0xff] %vm1071_vm2, %v956_v38 }
 0x122   : > { %v832_v41 = vpop.f32.mrb[8].mxu0  ;;  %v960_v42 = vpop.f32.mrb[8].mxu1 }
 0x123   : > { %v833_v43 = vadd.f32 %v1755_v16, %v832_v41  ;;  %v961_v44 = vadd.f32 %v1755_v16, %v960_v42  ;;  %v834_v45 = vpop.f32.mrb[9].mxu0  ;;  %v962_v46 = vpop.f32.mrb[9].mxu1 }
 0x124   : > { %v835_v47 = vpop.f32.mrb[10].mxu0  ;;  %v963_v48 = vpop.f32.mrb[10].mxu1 }
 0x125   : > { %1076 = vst.msk [vmem:[%s1762_s4 + $0x20] sm:$0xff] %vm1071_vm2, %v833_v43  ;;  %1108 = vst.msk [vmem:[%s1762_s4 + $0x120] sm:$0xff] %vm1071_vm2, %v961_v44  ;;  %v836_v49 = vadd.f32 %v1755_v16, %v835_v47  ;;  %v964_v50 = vadd.f32 %v1755_v16, %v963_v48  ;;  %v837_v51 = vpop.f32.mrb[11].mxu0  ;;  %v965_v52 = vpop.f32.mrb[11].mxu1 }
 0x127   : > { %1077 = vst.msk [vmem:[%s1762_s4 + $0x28] sm:$0xff] %vm1071_vm2, %v836_v49  ;;  %1109 = vst.msk [vmem:[%s1762_s4 + $0x128] sm:$0xff] %vm1071_vm2, %v964_v50 }
 0x12a   : > { %v840_v53 = vpop.f32.mrb[12].mxu0  ;;  %v968_v54 = vpop.f32.mrb[12].mxu1 }
 0x12b   : > { %v841_v55 = vadd.f32 %v1755_v16, %v840_v53  ;;  %v969_v56 = vadd.f32 %v1755_v16, %v968_v54  ;;  %v842_v57 = vpop.f32.mrb[13].mxu0  ;;  %v970_v58 = vpop.f32.mrb[13].mxu1 }
 0x12c   : > { %v843_v59 = vpop.f32.mrb[14].mxu0  ;;  %v971_v60 = vpop.f32.mrb[14].mxu1 }
 0x12d   : > { %1078 = vst.msk [vmem:[%s1762_s4 + $0x30] sm:$0xff] %vm1071_vm2, %v841_v55  ;;  %1110 = vst.msk [vmem:[%s1762_s4 + $0x130] sm:$0xff] %vm1071_vm2, %v969_v56  ;;  %v844_v61 = vadd.f32 %v1755_v16, %v843_v59  ;;  %v972_v62 = vadd.f32 %v1755_v16, %v971_v60  ;;  %v845_v63 = vpop.f32.mrb[15].mxu0  ;;  %v973_v0 = vpop.f32.mrb[15].mxu1 }
 0x12f   : > { %1079 = vst.msk [vmem:[%s1762_s4 + $0x38] sm:$0xff] %vm1071_vm2, %v844_v61  ;;  %1111 = vst.msk [vmem:[%s1762_s4 + $0x138] sm:$0xff] %vm1071_vm2, %v972_v62 }
 0x132   : > { %v848_v1 = vpop.f32.mrb[16].mxu0  ;;  %v976_v2 = vpop.f32.mrb[16].mxu1 }
 0x133   : > { %v849_v3 = vadd.f32 %v1755_v16, %v848_v1  ;;  %v977_v4 = vadd.f32 %v1755_v16, %v976_v2  ;;  %v850_v5 = vpop.f32.mrb[17].mxu0  ;;  %v978_v6 = vpop.f32.mrb[17].mxu1 }
 0x134   : > { %v851_v7 = vpop.f32.mrb[18].mxu0  ;;  %v979_v8 = vpop.f32.mrb[18].mxu1 }
 0x135   : > { %1080 = vst.msk [vmem:[%s1762_s4 + $0x40] sm:$0xff] %vm1071_vm2, %v849_v3  ;;  %1112 = vst.msk [vmem:[%s1762_s4 + $0x140] sm:$0xff] %vm1071_vm2, %v977_v4  ;;  %v852_v9 = vadd.f32 %v1755_v16, %v851_v7  ;;  %v980_v10 = vadd.f32 %v1755_v16, %v979_v8  ;;  %v853_v11 = vpop.f32.mrb[19].mxu0  ;;  %v981_v12 = vpop.f32.mrb[19].mxu1 }
 0x137   : > { %1081 = vst.msk [vmem:[%s1762_s4 + $0x48] sm:$0xff] %vm1071_vm2, %v852_v9  ;;  %1113 = vst.msk [vmem:[%s1762_s4 + $0x148] sm:$0xff] %vm1071_vm2, %v980_v10 }
 0x13a   : > { %v856_v13 = vpop.f32.mrb[20].mxu0  ;;  %v984_v14 = vpop.f32.mrb[20].mxu1 }
 0x13b   : > { %v857_v15 = vadd.f32 %v1755_v16, %v856_v13  ;;  %v985_v17 = vadd.f32 %v1755_v16, %v984_v14  ;;  %v858_v18 = vpop.f32.mrb[21].mxu0  ;;  %v986_v19 = vpop.f32.mrb[21].mxu1 }
 0x13c   : > { %v859_v20 = vpop.f32.mrb[22].mxu0  ;;  %v987_v21 = vpop.f32.mrb[22].mxu1 }
 0x13d   : > { %1082 = vst.msk [vmem:[%s1762_s4 + $0x50] sm:$0xff] %vm1071_vm2, %v857_v15  ;;  %1114 = vst.msk [vmem:[%s1762_s4 + $0x150] sm:$0xff] %vm1071_vm2, %v985_v17  ;;  %v860_v22 = vadd.f32 %v1755_v16, %v859_v20  ;;  %v988_v23 = vadd.f32 %v1755_v16, %v987_v21  ;;  %v861_v24 = vpop.f32.mrb[23].mxu0  ;;  %v989_v25 = vpop.f32.mrb[23].mxu1 }
 0x13f   : > { %1083 = vst.msk [vmem:[%s1762_s4 + $0x58] sm:$0xff] %vm1071_vm2, %v860_v22  ;;  %1115 = vst.msk [vmem:[%s1762_s4 + $0x158] sm:$0xff] %vm1071_vm2, %v988_v23 }
 0x142   : > { %v864_v26 = vpop.f32.mrb[24].mxu0  ;;  %v992_v27 = vpop.f32.mrb[24].mxu1 }
 0x143   : > { %v865_v28 = vadd.f32 %v1755_v16, %v864_v26  ;;  %v993_v29 = vadd.f32 %v1755_v16, %v992_v27  ;;  %v866_v30 = vpop.f32.mrb[25].mxu0  ;;  %v994_v31 = vpop.f32.mrb[25].mxu1 }
 0x144   : > { %v867_v32 = vpop.f32.mrb[26].mxu0  ;;  %v995_v33 = vpop.f32.mrb[26].mxu1 }
 0x145   : > { %1084 = vst.msk [vmem:[%s1762_s4 + $0x60] sm:$0xff] %vm1071_vm2, %v865_v28  ;;  %1116 = vst.msk [vmem:[%s1762_s4 + $0x160] sm:$0xff] %vm1071_vm2, %v993_v29  ;;  %v868_v34 = vadd.f32 %v1755_v16, %v867_v32  ;;  %v996_v35 = vadd.f32 %v1755_v16, %v995_v33  ;;  %v869_v36 = vpop.f32.mrb[27].mxu0  ;;  %v997_v37 = vpop.f32.mrb[27].mxu1 }
 0x147   : > { %1085 = vst.msk [vmem:[%s1762_s4 + $0x68] sm:$0xff] %vm1071_vm2, %v868_v34  ;;  %1117 = vst.msk [vmem:[%s1762_s4 + $0x168] sm:$0xff] %vm1071_vm2, %v996_v35 }
 0x14a   : > { %v872_v38 = vpop.f32.mrb[28].mxu0  ;;  %v1000_v39 = vpop.f32.mrb[28].mxu1 }
 0x14b   : > { %v873_v40 = vadd.f32 %v1755_v16, %v872_v38  ;;  %v1001_v41 = vadd.f32 %v1755_v16, %v1000_v39  ;;  %v874_v42 = vpop.f32.mrb[29].mxu0  ;;  %v1002_v43 = vpop.f32.mrb[29].mxu1 }
 0x14c   : > { %v875_v44 = vpop.f32.mrb[30].mxu0  ;;  %v1003_v45 = vpop.f32.mrb[30].mxu1 }
 0x14d   : > { %1086 = vst.msk [vmem:[%s1762_s4 + $0x70] sm:$0xff] %vm1071_vm2, %v873_v40  ;;  %1118 = vst.msk [vmem:[%s1762_s4 + $0x170] sm:$0xff] %vm1071_vm2, %v1001_v41  ;;  %v876_v46 = vadd.f32 %v1755_v16, %v875_v44  ;;  %v1004_v47 = vadd.f32 %v1755_v16, %v1003_v45  ;;  %v877_v48 = vpop.f32.mrb[31].mxu0  ;;  %v1005_v49 = vpop.f32.mrb[31].mxu1 }
 0x14f   : > { %1087 = vst.msk [vmem:[%s1762_s4 + $0x78] sm:$0xff] %vm1071_vm2, %v876_v46  ;;  %1119 = vst.msk [vmem:[%s1762_s4 + $0x178] sm:$0xff] %vm1071_vm2, %v1004_v47 }
 0x152   : > { %v880_v50 = vpop.f32.mrb[32].mxu0  ;;  %v1008_v51 = vpop.f32.mrb[32].mxu1 }
 0x153   : > { %v881_v52 = vadd.f32 %v1755_v16, %v880_v50  ;;  %v1009_v53 = vadd.f32 %v1755_v16, %v1008_v51  ;;  %v882_v54 = vpop.f32.mrb[33].mxu0  ;;  %v1010_v55 = vpop.f32.mrb[33].mxu1 }
 0x154   : > { %v883_v56 = vpop.f32.mrb[34].mxu0  ;;  %v1011_v57 = vpop.f32.mrb[34].mxu1 }
 0x155   : > { %1088 = vst.msk [vmem:[%s1762_s4 + $0x80] sm:$0xff] %vm1071_vm2, %v881_v52  ;;  %1120 = vst.msk [vmem:[%s1762_s4 + $0x180] sm:$0xff] %vm1071_vm2, %v1009_v53  ;;  %v884_v58 = vadd.f32 %v1755_v16, %v883_v56  ;;  %v1012_v59 = vadd.f32 %v1755_v16, %v1011_v57  ;;  %v885_v60 = vpop.f32.mrb[35].mxu0  ;;  %v1013_v61 = vpop.f32.mrb[35].mxu1 }
 0x157   : > { %1089 = vst.msk [vmem:[%s1762_s4 + $0x88] sm:$0xff] %vm1071_vm2, %v884_v58  ;;  %1121 = vst.msk [vmem:[%s1762_s4 + $0x188] sm:$0xff] %vm1071_vm2, %v1012_v59 }
 0x15a   : > { %v888_v62 = vpop.f32.mrb[36].mxu0  ;;  %v1016_v63 = vpop.f32.mrb[36].mxu1 }
 0x15b   : > { %v889_v0 = vadd.f32 %v1755_v16, %v888_v62  ;;  %v1017_v1 = vadd.f32 %v1755_v16, %v1016_v63  ;;  %v890_v2 = vpop.f32.mrb[37].mxu0  ;;  %v1018_v3 = vpop.f32.mrb[37].mxu1 }
 0x15c   : > { %v891_v4 = vpop.f32.mrb[38].mxu0  ;;  %v1019_v5 = vpop.f32.mrb[38].mxu1 }
 0x15d   : > { %1090 = vst.msk [vmem:[%s1762_s4 + $0x90] sm:$0xff] %vm1071_vm2, %v889_v0  ;;  %1122 = vst.msk [vmem:[%s1762_s4 + $0x190] sm:$0xff] %vm1071_vm2, %v1017_v1  ;;  %v892_v6 = vadd.f32 %v1755_v16, %v891_v4  ;;  %v1020_v7 = vadd.f32 %v1755_v16, %v1019_v5  ;;  %v893_v8 = vpop.f32.mrb[39].mxu0  ;;  %v1021_v9 = vpop.f32.mrb[39].mxu1 }
 0x15f   : > { %1091 = vst.msk [vmem:[%s1762_s4 + $0x98] sm:$0xff] %vm1071_vm2, %v892_v6  ;;  %1123 = vst.msk [vmem:[%s1762_s4 + $0x198] sm:$0xff] %vm1071_vm2, %v1020_v7 }
 0x162   : > { %v896_v10 = vpop.f32.mrb[40].mxu0  ;;  %v1024_v11 = vpop.f32.mrb[40].mxu1 }
 0x163   : > { %v897_v12 = vadd.f32 %v1755_v16, %v896_v10  ;;  %v1025_v13 = vadd.f32 %v1755_v16, %v1024_v11  ;;  %v898_v14 = vpop.f32.mrb[41].mxu0  ;;  %v1026_v15 = vpop.f32.mrb[41].mxu1 }
 0x164   : > { %v899_v17 = vpop.f32.mrb[42].mxu0  ;;  %v1027_v18 = vpop.f32.mrb[42].mxu1 }
 0x165   : > { %1092 = vst.msk [vmem:[%s1762_s4 + $0xa0] sm:$0xff] %vm1071_vm2, %v897_v12  ;;  %1124 = vst.msk [vmem:[%s1762_s4 + $0x1a0] sm:$0xff] %vm1071_vm2, %v1025_v13  ;;  %v900_v19 = vadd.f32 %v1755_v16, %v899_v17  ;;  %v1028_v20 = vadd.f32 %v1755_v16, %v1027_v18  ;;  %v901_v21 = vpop.f32.mrb[43].mxu0  ;;  %v1029_v22 = vpop.f32.mrb[43].mxu1 }
 0x167   : > { %1093 = vst.msk [vmem:[%s1762_s4 + $0xa8] sm:$0xff] %vm1071_vm2, %v900_v19  ;;  %1125 = vst.msk [vmem:[%s1762_s4 + $0x1a8] sm:$0xff] %vm1071_vm2, %v1028_v20 }
 0x16a   : > { %v904_v23 = vpop.f32.mrb[44].mxu0  ;;  %v1032_v24 = vpop.f32.mrb[44].mxu1 }
 0x16b   : > { %v905_v25 = vadd.f32 %v1755_v16, %v904_v23  ;;  %v1033_v26 = vadd.f32 %v1755_v16, %v1032_v24  ;;  %v906_v27 = vpop.f32.mrb[45].mxu0  ;;  %v1034_v28 = vpop.f32.mrb[45].mxu1 }
 0x16c   : > { %v907_v29 = vpop.f32.mrb[46].mxu0  ;;  %v1035_v30 = vpop.f32.mrb[46].mxu1 }
 0x16d   : > { %1094 = vst.msk [vmem:[%s1762_s4 + $0xb0] sm:$0xff] %vm1071_vm2, %v905_v25  ;;  %1126 = vst.msk [vmem:[%s1762_s4 + $0x1b0] sm:$0xff] %vm1071_vm2, %v1033_v26  ;;  %v908_v31 = vadd.f32 %v1755_v16, %v907_v29  ;;  %v1036_v32 = vadd.f32 %v1755_v16, %v1035_v30  ;;  %v909_v33 = vpop.f32.mrb[47].mxu0  ;;  %v1037_v34 = vpop.f32.mrb[47].mxu1 }
 0x16f   : > { %1095 = vst.msk [vmem:[%s1762_s4 + $0xb8] sm:$0xff] %vm1071_vm2, %v908_v31  ;;  %1127 = vst.msk [vmem:[%s1762_s4 + $0x1b8] sm:$0xff] %vm1071_vm2, %v1036_v32 }
 0x172   : > { %v912_v35 = vpop.f32.mrb[48].mxu0  ;;  %v1040_v36 = vpop.f32.mrb[48].mxu1 }
 0x173   : > { %v913_v37 = vadd.f32 %v1755_v16, %v912_v35  ;;  %v1041_v38 = vadd.f32 %v1755_v16, %v1040_v36  ;;  %v914_v39 = vpop.f32.mrb[49].mxu0  ;;  %v1042_v40 = vpop.f32.mrb[49].mxu1 }
 0x174   : > { %v915_v41 = vpop.f32.mrb[50].mxu0  ;;  %v1043_v42 = vpop.f32.mrb[50].mxu1 }
 0x175   : > { %1096 = vst.msk [vmem:[%s1762_s4 + $0xc0] sm:$0xff] %vm1071_vm2, %v913_v37  ;;  %1128 = vst.msk [vmem:[%s1762_s4 + $0x1c0] sm:$0xff] %vm1071_vm2, %v1041_v38  ;;  %v916_v43 = vadd.f32 %v1755_v16, %v915_v41  ;;  %v1044_v44 = vadd.f32 %v1755_v16, %v1043_v42  ;;  %v917_v45 = vpop.f32.mrb[51].mxu0  ;;  %v1045_v46 = vpop.f32.mrb[51].mxu1 }
 0x177   : > { %1097 = vst.msk [vmem:[%s1762_s4 + $0xc8] sm:$0xff] %vm1071_vm2, %v916_v43  ;;  %1129 = vst.msk [vmem:[%s1762_s4 + $0x1c8] sm:$0xff] %vm1071_vm2, %v1044_v44 }
 0x17a   : > { %v920_v47 = vpop.f32.mrb[52].mxu0  ;;  %v1048_v48 = vpop.f32.mrb[52].mxu1 }
 0x17b   : > { %v921_v49 = vadd.f32 %v1755_v16, %v920_v47  ;;  %v1049_v50 = vadd.f32 %v1755_v16, %v1048_v48  ;;  %v922_v51 = vpop.f32.mrb[53].mxu0  ;;  %v1050_v52 = vpop.f32.mrb[53].mxu1 }
 0x17c   : > { %v923_v53 = vpop.f32.mrb[54].mxu0  ;;  %v1051_v54 = vpop.f32.mrb[54].mxu1 }
 0x17d   : > { %1098 = vst.msk [vmem:[%s1762_s4 + $0xd0] sm:$0xff] %vm1071_vm2, %v921_v49  ;;  %1130 = vst.msk [vmem:[%s1762_s4 + $0x1d0] sm:$0xff] %vm1071_vm2, %v1049_v50  ;;  %v924_v55 = vadd.f32 %v1755_v16, %v923_v53  ;;  %v1052_v56 = vadd.f32 %v1755_v16, %v1051_v54  ;;  %v925_v57 = vpop.f32.mrb[55].mxu0  ;;  %v1053_v58 = vpop.f32.mrb[55].mxu1 }
 0x17f   : > { %1099 = vst.msk [vmem:[%s1762_s4 + $0xd8] sm:$0xff] %vm1071_vm2, %v924_v55  ;;  %1131 = vst.msk [vmem:[%s1762_s4 + $0x1d8] sm:$0xff] %vm1071_vm2, %v1052_v56 }
 0x182   : > { %v928_v59 = vpop.f32.mrb[56].mxu0  ;;  %v1056_v60 = vpop.f32.mrb[56].mxu1 }
 0x183   : > { %v929_v61 = vadd.f32 %v1755_v16, %v928_v59  ;;  %v1057_v62 = vadd.f32 %v1755_v16, %v1056_v60  ;;  %v930_v63 = vpop.f32.mrb[57].mxu0  ;;  %v1058_v0 = vpop.f32.mrb[57].mxu1 }
 0x184   : > { %v931_v1 = vpop.f32.mrb[58].mxu0  ;;  %v1059_v2 = vpop.f32.mrb[58].mxu1 }
 0x185   : > { %1100 = vst.msk [vmem:[%s1762_s4 + $0xe0] sm:$0xff] %vm1071_vm2, %v929_v61  ;;  %1132 = vst.msk [vmem:[%s1762_s4 + $0x1e0] sm:$0xff] %vm1071_vm2, %v1057_v62  ;;  %v932_v3 = vadd.f32 %v1755_v16, %v931_v1  ;;  %v1060_v4 = vadd.f32 %v1755_v16, %v1059_v2  ;;  %v933_v5 = vpop.f32.mrb[59].mxu0  ;;  %v1061_v6 = vpop.f32.mrb[59].mxu1 }
 0x187   : > { %1101 = vst.msk [vmem:[%s1762_s4 + $0xe8] sm:$0xff] %vm1071_vm2, %v932_v3  ;;  %1133 = vst.msk [vmem:[%s1762_s4 + $0x1e8] sm:$0xff] %vm1071_vm2, %v1060_v4 }
 0x18a   : > { %v936_v7 = vpop.f32.mrb[60].mxu0  ;;  %v1064_v8 = vpop.f32.mrb[60].mxu1 }
 0x18b   : > { %v937_v9 = vadd.f32 %v1755_v16, %v936_v7  ;;  %v1065_v10 = vadd.f32 %v1755_v16, %v1064_v8  ;;  %v938_v11 = vpop.f32.mrb[61].mxu0  ;;  %v1066_v12 = vpop.f32.mrb[61].mxu1 }
 0x18c   : > { %v939_v13 = vpop.f32.mrb[62].mxu0  ;;  %v1067_v14 = vpop.f32.mrb[62].mxu1 }
 0x18d   : > { %1102 = vst.msk [vmem:[%s1762_s4 + $0xf0] sm:$0xff] %vm1071_vm2, %v937_v9  ;;  %1134 = vst.msk [vmem:[%s1762_s4 + $0x1f0] sm:$0xff] %vm1071_vm2, %v1065_v10  ;;  %v940_v15 = vadd.f32 %v1755_v16, %v939_v13  ;;  %v1068_v17 = vadd.f32 %v1755_v16, %v1067_v14  ;;  %v941_v18 = vpop.f32.mrb[63].mxu0  ;;  %v1069_v19 = vpop.f32.mrb[63].mxu1 }
 0x18f   : > { %1103 = vst.msk [vmem:[%s1762_s4 + $0xf8] sm:$0xff] %vm1071_vm2, %v940_v15  ;;  %1135 = vst.msk [vmem:[%s1762_s4 + $0x1f8] sm:$0xff] %vm1071_vm2, %v1068_v17 }
 0x190 PF: > { %s13_s14 = sadd.s32 1, %s1535_s14   ;;  %s1969_s12 = smov %s1531_s13 }
 0x191   : > { %p10_p5 = scmp.ge.s32.totalorder %s13_s14, 4   ;;  %s1970_s13 = smov %s1972_s15 }
 0x193   :  { %12 = sbr.rel (!%p10_p5) target bundleno = 2 (0x2), region = 62 }

</bundles_post_ra>
